<compile_context>
chip_gen: v7x
topology: tpu7x:2x2x1
jax: 0.10.0
libtpu: 0.0.40
codegen_flags: <defaults>
</compile_context>

<pallas_src>
import functools
import math

import jax
import jax.numpy as jnp
from jax import lax
from jax.experimental import pallas as pl
from jax.experimental.pallas import tpu as pltpu


# ----------------------------------------------------------------------------
# In-kernel helpers (traced inside Pallas kernel bodies)
# ----------------------------------------------------------------------------

def _mm(a, b):
    """MXU matmul: bf16 operands, f32 accumulation."""
    return jnp.dot(a.astype(jnp.bfloat16), b.astype(jnp.bfloat16),
                   preferred_element_type=jnp.float32)


def _layernorm(x, g, b):
    mean = jnp.mean(x, axis=-1, keepdims=True)
    var = jnp.mean((x - mean) ** 2, axis=-1, keepdims=True)
    return (x - mean) * lax.rsqrt(var + 1e-5) * g + b


def _attention(q, k, v, mask, wq, wk, wv, wo, bo, heads, scale):
    """Multi-head attention on one batch slice, entirely in VMEM.

    q: (Lq, E) f32, k/v: (Lk, E) f32, mask: (1, Lk) or (Lq, Lk) int32
    (nonzero = keep; broadcasts against the (Lq, Lk) score matrix).
    wq/wk/wv: block-diagonal (E, E) bf16 expansions of the shared per-head
    (D, D) weights -> lane-dense projections.  Heads are contiguous D-chunks
    of E; per-head work uses static lane slices (no transposes, no gathers).
    """
    Lq, E = q.shape
    D = E // heads
    qp = _mm(q, wq)          # (Lq, E)
    kp = _mm(k, wk)          # (Lk, E)
    vp = _mm(v, wv)          # (Lk, E)
    keep = mask != 0
    neg = jnp.float32(-1e20)
    dn = (((1,), (1,)), ((), ()))          # contract last dims: (Lq,D)x(Lk,D)->(Lq,Lk)
    ctx = []
    for h in range(heads):                 # static unroll; all data stays in vregs/VMEM
        sl = slice(h * D, (h + 1) * D)
        e = lax.dot_general(qp[:, sl].astype(jnp.bfloat16),
                            kp[:, sl].astype(jnp.bfloat16),
                            dn, preferred_element_type=jnp.float32)
        # reference order: mask first, then scale by 1/sqrt(embed_size), then softmax
        e = jnp.where(keep, e, neg) * scale
        e = e - jnp.max(e, axis=-1, keepdims=True)
        p = jnp.exp(e)
        p = p * pl.reciprocal(jnp.sum(p, axis=-1, keepdims=True), approx=True)
        ctx.append(jnp.dot(p.astype(jnp.bfloat16),
                           vp[:, sl].astype(jnp.bfloat16),
                           preferred_element_type=jnp.float32))   # (Lq, D)
    out = jnp.concatenate(ctx, axis=-1)    # (Lq, E)
    return _mm(out, wo) + bo


# ----------------------------------------------------------------------------
# Fused layer kernels
# ----------------------------------------------------------------------------

def _tblock_kernel(v_ref, k_ref, q_ref, m_ref,
                   wq_ref, wk_ref, wv_ref, wo_ref, bo_ref,
                   n1g_ref, n1b_ref, w1_ref, b1_ref, w2_ref, b2_ref,
                   n2g_ref, n2b_ref, o_ref, *, heads, scale):
    q = q_ref[0]                                              # (Lq, E)
    attn = _attention(q, k_ref[0], v_ref[0], m_ref[0],
                      wq_ref[...], wk_ref[...], wv_ref[...],
                      wo_ref[...], bo_ref[...], heads, scale)
    x = _layernorm(attn + q, n1g_ref[...], n1b_ref[...])
    h = jnp.maximum(_mm(x, w1_ref[...]) + b1_ref[...], 0.0)   # ReLU
    f = _mm(h, w2_ref[...]) + b2_ref[...]
    o_ref[0] = _layernorm(f + x, n2g_ref[...], n2b_ref[...])


def _dblock_kernel(x_ref, enc_ref, tmask_ref, smask_ref,
                   swq_ref, swk_ref, swv_ref, swo_ref, sbo_ref, ng_ref, nb_ref,
                   wq_ref, wk_ref, wv_ref, wo_ref, bo_ref,
                   n1g_ref, n1b_ref, w1_ref, b1_ref, w2_ref, b2_ref,
                   n2g_ref, n2b_ref, o_ref, *, heads, scale):
    x = x_ref[0]                                              # (Lt, E)
    enc = enc_ref[0]                                          # (Ls, E)
    # masked self-attention + add & norm (causal mask is batch-invariant 2D)
    sa = _attention(x, x, x, tmask_ref[...],
                    swq_ref[...], swk_ref[...], swv_ref[...],
                    swo_ref[...], sbo_ref[...], heads, scale)
    query = _layernorm(sa + x, ng_ref[...], nb_ref[...])
    # cross-attention + transformer block (src key mask broadcasts over queries)
    ca = _attention(query, enc, enc, smask_ref[0],
                    wq_ref[...], wk_ref[...], wv_ref[...],
                    wo_ref[...], bo_ref[...], heads, scale)
    y = _layernorm(ca + query, n1g_ref[...], n1b_ref[...])
    h = jnp.maximum(_mm(y, w1_ref[...]) + b1_ref[...], 0.0)
    f = _mm(h, w2_ref[...]) + b2_ref[...]
    o_ref[0] = _layernorm(f + y, n2g_ref[...], n2b_ref[...])


def _linear_kernel(x_ref, w_ref, b_ref, o_ref):
    o_ref[...] = _mm(x_ref[...], w_ref[...]) + b_ref[...]


# ----------------------------------------------------------------------------
# pallas_call wrappers
# ----------------------------------------------------------------------------

_COMPILER_PARAMS = pltpu.CompilerParams(
    dimension_semantics=("parallel",),          # batch axis is independent
    vmem_limit_bytes=32 * 1024 * 1024)


def _dspec(L, W):
    """Per-batch (1, L, W) data block."""
    return pl.BlockSpec((1, L, W), lambda b: (b, 0, 0))


def _kmspec(Lk):
    """Per-batch (1, 1, Lk) key-mask block (broadcast over queries in-kernel)."""
    return pl.BlockSpec((1, 1, Lk), lambda b: (b, 0, 0))


def _wspec(shape):
    """Batch-invariant weight/table block (fetched once, reused across grid)."""
    return pl.BlockSpec(shape, lambda b: (0, 0))


def transformer_block_pallas(value, key, query, key_mask, p, heads):
    """key_mask: (N, 1, Lk) int32, nonzero = keep."""
    N, Lq, E = query.shape
    Lk = value.shape[1]
    F_E = p["w1_t"].shape[1]
    scale = 1.0 / math.sqrt(E)                  # divide by sqrt(embed_size), per reference
    a = p["attn"]
    kernel = functools.partial(_tblock_kernel, heads=heads, scale=scale)
    return pl.pallas_call(
        kernel,
        out_shape=jax.ShapeDtypeStruct((N, Lq, E), jnp.float32),
        grid=(N,),
        in_specs=[
            _dspec(Lk, E), _dspec(Lk, E), _dspec(Lq, E), _kmspec(Lk),
            _wspec((E, E)), _wspec((E, E)), _wspec((E, E)),
            _wspec((E, E)), _wspec((1, E)),
            _wspec((1, E)), _wspec((1, E)),
            _wspec((E, F_E)), _wspec((1, F_E)), _wspec((F_E, E)), _wspec((1, E)),
            _wspec((1, E)), _wspec((1, E)),
        ],
        out_specs=_dspec(Lq, E),
        compiler_params=_COMPILER_PARAMS,
    )(value, key, query, key_mask,
      a["wq_bd"], a["wk_bd"], a["wv_bd"], a["wo_t"], a["bo"],
      p["n1_g"], p["n1_b"], p["w1_t"], p["b1"], p["w2_t"], p["b2"],
      p["n2_g"], p["n2_b"])


def decoder_block_pallas(x, enc_out, src_key_mask, trg_mask2d, p, heads):
    """src_key_mask: (N, 1, Ls) int32; trg_mask2d: (Lt, Lt) int32 causal table."""
    N, Lt, E = x.shape
    Ls = enc_out.shape[1]
    tb = p["tblock"]
    F_E = tb["w1_t"].shape[1]
    scale = 1.0 / math.sqrt(E)
    sa, ca = p["attn"], tb["attn"]
    kernel = functools.partial(_dblock_kernel, heads=heads, scale=scale)
    return pl.pallas_call(
        kernel,
        out_shape=jax.ShapeDtypeStruct((N, Lt, E), jnp.float32),
        grid=(N,),
        in_specs=[
            _dspec(Lt, E), _dspec(Ls, E), _wspec((Lt, Lt)), _kmspec(Ls),
            _wspec((E, E)), _wspec((E, E)), _wspec((E, E)), _wspec((E, E)), _wspec((1, E)),
            _wspec((1, E)), _wspec((1, E)),
            _wspec((E, E)), _wspec((E, E)), _wspec((E, E)), _wspec((E, E)), _wspec((1, E)),
            _wspec((1, E)), _wspec((1, E)),
            _wspec((E, F_E)), _wspec((1, F_E)), _wspec((F_E, E)), _wspec((1, E)),
            _wspec((1, E)), _wspec((1, E)),
        ],
        out_specs=_dspec(Lt, E),
        compiler_params=_COMPILER_PARAMS,
    )(x, enc_out, trg_mask2d, src_key_mask,
      sa["wq_bd"], sa["wk_bd"], sa["wv_bd"], sa["wo_t"], sa["bo"],
      p["n_g"], p["n_b"],
      ca["wq_bd"], ca["wk_bd"], ca["wv_bd"], ca["wo_t"], ca["bo"],
      tb["n1_g"], tb["n1_b"], tb["w1_t"], tb["b1"], tb["w2_t"], tb["b2"],
      tb["n2_g"], tb["n2_b"])


def linear_pallas(x, w, b):
    M = x.shape[0]
    n_out = w.shape[1]
    return pl.pallas_call(
        _linear_kernel,
        out_shape=jax.ShapeDtypeStruct((M, n_out), jnp.float32),
    )(x, w, b)


# ----------------------------------------------------------------------------
# Model glue
# ----------------------------------------------------------------------------

def embed(ids, table):
    """Embedding lookup as a gather (cheap XLA op) rather than one-hot @ table."""
    return jnp.take(table, ids, axis=0)


def encoder_forward(src, src_key_mask, p, heads):
    """src_key_mask: (N, 1, Ls) int32."""
    N, Ls = src.shape
    # TODO(synk): original Encoder.forward discards the embedding sum and feeds
    # raw token ids to the layers (which cannot run in PyTorch either); we use
    # the embedded representation, i.e. the clearly intended semantics.
    positions = jnp.arange(Ls, dtype=jnp.int32)
    x = embed(src, p["word_emb"]) + embed(positions, p["pos_emb"])[None, :, :]
    for lp in p["layers"]:
        x = transformer_block_pallas(x, x, x, src_key_mask, lp, heads)
    return x


def decoder_forward(trg, enc_out, src_key_mask, p, heads):
    N, Lt = trg.shape
    E = p["word_emb"].shape[1]
    positions = jnp.arange(Lt, dtype=jnp.int32)
    x = embed(trg, p["word_emb"]) + embed(positions, p["pos_emb"])[None, :, :]
    trg_mask2d = jnp.tril(jnp.ones((Lt, Lt), jnp.int32))      # batch-invariant causal table
    for lp in p["layers"]:
        x = decoder_block_pallas(x, enc_out, src_key_mask, trg_mask2d, lp, heads)
    # final vocab projection, padded to a lane-dense multiple of 128 columns
    # (pad is constant-folded under jit since params are closed-over constants)
    V = p["fc_w_t"].shape[1]
    Vp = ((V + 127) // 128) * 128
    w_pad = jnp.pad(p["fc_w_t"], ((0, 0), (0, Vp - V)))
    b_pad = jnp.pad(p["fc_b"], ((0, 0), (0, Vp - V)))
    out = linear_pallas(x.reshape(N * Lt, E), w_pad, b_pad)[:, :V]
    return out.reshape(N, Lt, V)


def transformer_forward(src, trg, params, src_pad_idx, heads):
    # make_src_mask: (N, 1, Ls) keep-mask over keys (broadcast over heads/queries)
    src_key_mask = (src != src_pad_idx).astype(jnp.int32)[:, None, :]
    enc = encoder_forward(src, src_key_mask, params["encoder"], heads)
    return decoder_forward(trg, enc, src_key_mask, params["decoder"], heads)


# ----------------------------------------------------------------------------
# Deterministic parameter initialization
# ----------------------------------------------------------------------------

def _normal(key, shape, scale=0.02):
    return scale * jax.random.normal(key, shape, dtype=jnp.float32)


def init_attention_params(key, E, H):
    D = E // H
    ks = jax.random.split(key, 4)
    eye_h = jnp.eye(H, dtype=jnp.float32)
    wv_t = _normal(ks[0], (D, D))
    wk_t = _normal(ks[1], (D, D))
    wq_t = _normal(ks[2], (D, D))
    # Block-diagonal (E, E) expansion of the shared per-head (D, D) weight:
    # applying it to (L, E) == applying the (D, D) weight to every head chunk.
    return {
        "wv_bd": jnp.kron(eye_h, wv_t).astype(jnp.bfloat16),
        "wk_bd": jnp.kron(eye_h, wk_t).astype(jnp.bfloat16),
        "wq_bd": jnp.kron(eye_h, wq_t).astype(jnp.bfloat16),
        "wo_t": _normal(ks[3], (E, E)).astype(jnp.bfloat16),
        "bo": jnp.zeros((1, E), jnp.float32),
    }


def init_tblock_params(key, E, H, F):
    ks = jax.random.split(key, 3)
    return {
        "attn": init_attention_params(ks[0], E, H),
        "n1_g": jnp.ones((1, E), jnp.float32),
        "n1_b": jnp.zeros((1, E), jnp.float32),
        "n2_g": jnp.ones((1, E), jnp.float32),
        "n2_b": jnp.zeros((1, E), jnp.float32),
        "w1_t": _normal(ks[1], (E, F * E)).astype(jnp.bfloat16),
        "b1": jnp.zeros((1, F * E), jnp.float32),
        "w2_t": _normal(ks[2], (F * E, E)).astype(jnp.bfloat16),
        "b2": jnp.zeros((1, E), jnp.float32),
    }


def init_decoder_block_params(key, E, H, F):
    ks = jax.random.split(key, 2)
    return {
        "attn": init_attention_params(ks[0], E, H),
        "n_g": jnp.ones((1, E), jnp.float32),
        "n_b": jnp.zeros((1, E), jnp.float32),
        "tblock": init_tblock_params(ks[1], E, H, F),
    }


def init_params(key, src_vocab, trg_vocab, E, H, F, num_layers, max_len):
    k_enc, k_dec = jax.random.split(key)
    ke = jax.random.split(k_enc, num_layers + 2)
    kd = jax.random.split(k_dec, num_layers + 3)
    enc = {
        "word_emb": _normal(ke[0], (src_vocab, E), 1.0),
        "pos_emb": _normal(ke[1], (max_len, E), 1.0),
        "layers": [init_tblock_params(ke[2 + i], E, H, F) for i in range(num_layers)],
    }
    dec = {
        "word_emb": _normal(kd[0], (trg_vocab, E), 1.0),
        "pos_emb": _normal(kd[1], (max_len, E), 1.0),
        "layers": [init_decoder_block_params(kd[2 + i], E, H, F) for i in range(num_layers)],
        "fc_w_t": _normal(kd[2 + num_layers], (E, trg_vocab)).astype(jnp.bfloat16),
        "fc_b": jnp.zeros((1, trg_vocab), jnp.float32),
    }
    return {"encoder": enc, "decoder": dec}


# ----------------------------------------------------------------------------
# Demo
# ----------------------------------------------------------------------------

if __name__ == "__main__":
    key = jax.random.PRNGKey(0)
    src_vocab, trg_vocab = 50, 50
    src_pad_idx, trg_pad_idx = 0, 0
    embed_size, heads, forward_expansion, num_layers, max_length = 64, 8, 4, 2, 16
    N, Ls, Lt = 2, 8, 8

    kp, ks, kt = jax.random.split(key, 3)
    params = init_params(kp, src_vocab, trg_vocab, embed_size, heads,
                         forward_expansion, num_layers, max_length)

    src = jax.random.randint(ks, (N, Ls), 1, src_vocab, dtype=jnp.int32)
    src = src.at[0, 6:].set(src_pad_idx)   # include some padding to exercise src_mask
    trg = jax.random.randint(kt, (N, Lt), 1, trg_vocab, dtype=jnp.int32)

    fwd = jax.jit(lambda s, t: transformer_forward(s, t, params, src_pad_idx, heads))
    out = jax.block_until_ready(fwd(src, trg))

    assert out.shape == (N, Lt, trg_vocab), out.shape
    assert bool(jnp.all(jnp.isfinite(out)))
    print("KERNEL_OK")
</pallas_src>

<mosaic_0001>
module attributes {stable_mosaic.version = 11 : i64} {
  func.func @_linear_kernel(%arg0: memref<16x64xf32, #tpu.memory_space<vmem>>, %arg1: memref<64x128xbf16, #tpu.memory_space<vmem>>, %arg2: memref<1x128xf32, #tpu.memory_space<vmem>>, %arg3: memref<16x128xf32, #tpu.memory_space<vmem>>) attributes {dimension_semantics = [], scalar_prefetch = 0 : i64, scratch_operands = 0 : i64, tpu.core_type = #tpu.core_type<tc>} {
    %c0 = arith.constant 0 : index
    %c0_0 = arith.constant 0 : index
    %0 = vector.load %arg0[%c0, %c0_0] : memref<16x64xf32, #tpu.memory_space<vmem>>, vector<16x64xf32>
    %c0_1 = arith.constant 0 : index
    %c0_2 = arith.constant 0 : index
    %1 = vector.load %arg1[%c0_1, %c0_2] : memref<64x128xbf16, #tpu.memory_space<vmem>>, vector<64x128xbf16>
    %2 = arith.truncf %0 : vector<16x64xf32> to vector<16x64xbf16>
    %cst = arith.constant dense<0.000000e+00> : vector<16x128xf32>
    %3 = tpu.matmul %2, %1, %cst {dimension_numbers = #tpu.dot_dimension_numbers<[1], [0], [0], [1], [0, 0, 1, 1], [], []>} : vector<16x64xbf16>, vector<64x128xbf16>, vector<16x128xf32> -> vector<16x128xf32>
    %c0_3 = arith.constant 0 : index
    %c0_4 = arith.constant 0 : index
    %4 = vector.load %arg2[%c0_3, %c0_4] : memref<1x128xf32, #tpu.memory_space<vmem>>, vector<1x128xf32>
    %5 = vector.broadcast %4 : vector<1x128xf32> to vector<16x128xf32>
    %6 = arith.addf %3, %5 : vector<16x128xf32>
    %c0_5 = arith.constant 0 : index
    %c0_6 = arith.constant 0 : index
    %7 = vector.load %arg3[%c0_5, %c0_6] : memref<16x128xf32, #tpu.memory_space<vmem>>, vector<16x128xf32>
    tpu.vector_store %arg3[%c0_5, %c0_6], %6 {strides = array<i32>} : memref<16x128xf32, #tpu.memory_space<vmem>>, vector<16x128xf32>,
    return
  }
}

module attributes {stable_mosaic.version = 11 : i64} {
  func.func @_tblock_kernel(%arg0: i32, %arg1: memref<1x8x64xf32, #tpu.memory_space<vmem>>, %arg2: memref<1x8x64xf32, #tpu.memory_space<vmem>>, %arg3: memref<1x8x64xf32, #tpu.memory_space<vmem>>, %arg4: memref<1x1x8xi32, #tpu.memory_space<vmem>>, %arg5: memref<64x64xbf16, #tpu.memory_space<vmem>>, %arg6: memref<64x64xbf16, #tpu.memory_space<vmem>>, %arg7: memref<64x64xbf16, #tpu.memory_space<vmem>>, %arg8: memref<64x64xbf16, #tpu.memory_space<vmem>>, %arg9: memref<1x64xf32, #tpu.memory_space<vmem>>, %arg10: memref<1x64xf32, #tpu.memory_space<vmem>>, %arg11: memref<1x64xf32, #tpu.memory_space<vmem>>, %arg12: memref<64x256xbf16, #tpu.memory_space<vmem>>, %arg13: memref<1x256xf32, #tpu.memory_space<vmem>>, %arg14: memref<256x64xbf16, #tpu.memory_space<vmem>>, %arg15: memref<1x64xf32, #tpu.memory_space<vmem>>, %arg16: memref<1x64xf32, #tpu.memory_space<vmem>>, %arg17: memref<1x64xf32, #tpu.memory_space<vmem>>, %arg18: memref<1x8x64xf32, #tpu.memory_space<vmem>>) attributes {dimension_semantics = [#tpu.dimension_semantics<parallel>], iteration_bounds = array<i64: 2>, scalar_prefetch = 0 : i64, scratch_operands = 0 : i64, tpu.core_type = #tpu.core_type<tc>, window_params = [{transform_indices = @transform_0, window_bounds = array<i64: 1, 8, 64>}, {transform_indices = @transform_1, window_bounds = array<i64: 1, 8, 64>}, {transform_indices = @transform_2, window_bounds = array<i64: 1, 8, 64>}, {transform_indices = @transform_3, window_bounds = array<i64: 1, 1, 8>}, {pipeline_mode = #tpu.pipeline_mode<synchronous>, transform_indices = @transform_4, window_bounds = array<i64: 64, 64>}, {pipeline_mode = #tpu.pipeline_mode<synchronous>, transform_indices = @transform_5, window_bounds = array<i64: 64, 64>}, {pipeline_mode = #tpu.pipeline_mode<synchronous>, transform_indices = @transform_6, window_bounds = array<i64: 64, 64>}, {pipeline_mode = #tpu.pipeline_mode<synchronous>, transform_indices = @transform_7, window_bounds = array<i64: 64, 64>}, {pipeline_mode = #tpu.pipeline_mode<synchronous>, transform_indices = @transform_8, window_bounds = array<i64: 1, 64>}, {pipeline_mode = #tpu.pipeline_mode<synchronous>, transform_indices = @transform_9, window_bounds = array<i64: 1, 64>}, {pipeline_mode = #tpu.pipeline_mode<synchronous>, transform_indices = @transform_10, window_bounds = array<i64: 1, 64>}, {pipeline_mode = #tpu.pipeline_mode<synchronous>, transform_indices = @transform_11, window_bounds = array<i64: 64, 256>}, {pipeline_mode = #tpu.pipeline_mode<synchronous>, transform_indices = @transform_12, window_bounds = array<i64: 1, 256>}, {pipeline_mode = #tpu.pipeline_mode<synchronous>, transform_indices = @transform_13, window_bounds = array<i64: 256, 64>}, {pipeline_mode = #tpu.pipeline_mode<synchronous>, transform_indices = @transform_14, window_bounds = array<i64: 1, 64>}, {pipeline_mode = #tpu.pipeline_mode<synchronous>, transform_indices = @transform_15, window_bounds = array<i64: 1, 64>}, {pipeline_mode = #tpu.pipeline_mode<synchronous>, transform_indices = @transform_16, window_bounds = array<i64: 1, 64>}, {transform_indices = @transform_17, window_bounds = array<i64: 1, 8, 64>}]} {
    %c0 = arith.constant 0 : index
    %c0_0 = arith.constant 0 : index
    %c0_1 = arith.constant 0 : index
    %0 = vector.load %arg3[%c0, %c0_0, %c0_1] : memref<1x8x64xf32, #tpu.memory_space<vmem>>, vector<1x8x64xf32>
    %1 = vector.shape_cast %0 : vector<1x8x64xf32> to vector<8x64xf32>
    %c0_2 = arith.constant 0 : index
    %c0_3 = arith.constant 0 : index
    %c0_4 = arith.constant 0 : index
    %2 = vector.load %arg2[%c0_2, %c0_3, %c0_4] : memref<1x8x64xf32, #tpu.memory_space<vmem>>, vector<1x8x64xf32>
    %3 = vector.shape_cast %2 : vector<1x8x64xf32> to vector<8x64xf32>
    %c0_5 = arith.constant 0 : index
    %c0_6 = arith.constant 0 : index
    %c0_7 = arith.constant 0 : index
    %4 = vector.load %arg1[%c0_5, %c0_6, %c0_7] : memref<1x8x64xf32, #tpu.memory_space<vmem>>, vector<1x8x64xf32>
    %5 = vector.shape_cast %4 : vector<1x8x64xf32> to vector<8x64xf32>
    %c0_8 = arith.constant 0 : index
    %c0_9 = arith.constant 0 : index
    %c0_10 = arith.constant 0 : index
    %6 = vector.load %arg4[%c0_8, %c0_9, %c0_10] : memref<1x1x8xi32, #tpu.memory_space<vmem>>, vector<1x1x8xi32>
    %7 = vector.shape_cast %6 : vector<1x1x8xi32> to vector<1x8xi32>
    %c0_11 = arith.constant 0 : index
    %c0_12 = arith.constant 0 : index
    %8 = vector.load %arg5[%c0_11, %c0_12] : memref<64x64xbf16, #tpu.memory_space<vmem>>, vector<64x64xbf16>
    %c0_13 = arith.constant 0 : index
    %c0_14 = arith.constant 0 : index
    %9 = vector.load %arg6[%c0_13, %c0_14] : memref<64x64xbf16, #tpu.memory_space<vmem>>, vector<64x64xbf16>
    %c0_15 = arith.constant 0 : index
    %c0_16 = arith.constant 0 : index
    %10 = vector.load %arg7[%c0_15, %c0_16] : memref<64x64xbf16, #tpu.memory_space<vmem>>, vector<64x64xbf16>
    %c0_17 = arith.constant 0 : index
    %c0_18 = arith.constant 0 : index
    %11 = vector.load %arg8[%c0_17, %c0_18] : memref<64x64xbf16, #tpu.memory_space<vmem>>, vector<64x64xbf16>
    %c0_19 = arith.constant 0 : index
    %c0_20 = arith.constant 0 : index
    %12 = vector.load %arg9[%c0_19, %c0_20] : memref<1x64xf32, #tpu.memory_space<vmem>>, vector<1x64xf32>
    %13 = arith.truncf %1 : vector<8x64xf32> to vector<8x64xbf16>
    %cst = arith.constant dense<0.000000e+00> : vector<8x64xf32>
    %14 = tpu.matmul %13, %8, %cst {dimension_numbers = #tpu.dot_dimension_numbers<[1], [0], [0], [1], [0, 0, 1, 1], [], []>} : vector<8x64xbf16>, vector<64x64xbf16>, vector<8x64xf32> -> vector<8x64xf32>
    %15 = arith.truncf %3 : vector<8x64xf32> to vector<8x64xbf16>
    %cst_21 = arith.constant dense<0.000000e+00> : vector<8x64xf32>
    %16 = tpu.matmul %15, %9, %cst_21 {dimension_numbers = #tpu.dot_dimension_numbers<[1], [0], [0], [1], [0, 0, 1, 1], [], []>} : vector<8x64xbf16>, vector<64x64xbf16>, vector<8x64xf32> -> vector<8x64xf32>
    %17 = arith.truncf %5 : vector<8x64xf32> to vector<8x64xbf16>
    %cst_22 = arith.constant dense<0.000000e+00> : vector<8x64xf32>
    %18 = tpu.matmul %17, %10, %cst_22 {dimension_numbers = #tpu.dot_dimension_numbers<[1], [0], [0], [1], [0, 0, 1, 1], [], []>} : vector<8x64xbf16>, vector<64x64xbf16>, vector<8x64xf32> -> vector<8x64xf32>
    %c0_i32 = arith.constant 0 : i32
    %19 = vector.broadcast %c0_i32 : i32 to vector<1x8xi32>
    %20 = arith.cmpi ne, %7, %19 : vector<1x8xi32>
    %21 = vector.extract_strided_slice %14 {offsets = [0, 0], sizes = [8, 8], strides = [1, 1]} : vector<8x64xf32> to vector<8x8xf32>
    %22 = arith.truncf %21 : vector<8x8xf32> to vector<8x8xbf16>
    %23 = vector.extract_strided_slice %16 {offsets = [0, 0], sizes = [8, 8], strides = [1, 1]} : vector<8x64xf32> to vector<8x8xf32>
    %24 = arith.truncf %23 : vector<8x8xf32> to vector<8x8xbf16>
    %cst_23 = arith.constant dense<0.000000e+00> : vector<8x8xf32>
    %25 = tpu.matmul %22, %24, %cst_23 {dimension_numbers = #tpu.dot_dimension_numbers<[1], [1], [0], [0], [0, 0, 1, 0], [], []>} : vector<8x8xbf16>, vector<8x8xbf16>, vector<8x8xf32> -> vector<8x8xf32>
    %cst_24 = arith.constant -1.000000e+20 : f32
    %26 = vector.shape_cast %20 : vector<1x8xi1> to vector<1x8xi1>
    %27 = vector.broadcast %26 : vector<1x8xi1> to vector<8x8xi1>
    %28 = vector.broadcast %cst_24 : f32 to vector<8x8xf32>
    %29 = arith.select %27, %25, %28 : vector<8x8xi1>, vector<8x8xf32>
    %cst_25 = arith.constant 1.250000e-01 : f32
    %30 = vector.broadcast %cst_25 : f32 to vector<8x8xf32>
    %31 = arith.mulf %29, %30 : vector<8x8xf32>
    %cst_26 = arith.constant dense<0xFF800000> : vector<8xf32>
    %32 = vector.multi_reduction <maximumf>, %31, %cst_26 [1] : vector<8x8xf32> to vector<8xf32>
    %33 = vector.shape_cast %32 : vector<8xf32> to vector<8x1xf32>
    %34 = vector.broadcast %33 : vector<8x1xf32> to vector<8x8xf32>
    %35 = arith.subf %31, %34 : vector<8x8xf32>
    %36 = math.exp %35 : vector<8x8xf32>
    %cst_27 = arith.constant dense<0.000000e+00> : vector<8xf32>
    %37 = vector.multi_reduction <add>, %36, %cst_27 [1] : vector<8x8xf32> to vector<8xf32>
    %38 = vector.shape_cast %37 : vector<8xf32> to vector<8x1xf32>
    %39 = tpu.reciprocal %38 {approx = true} : vector<8x1xf32> -> vector<8x1xf32>
    %40 = vector.broadcast %39 : vector<8x1xf32> to vector<8x8xf32>
    %41 = arith.mulf %36, %40 : vector<8x8xf32>
    %42 = arith.truncf %41 : vector<8x8xf32> to vector<8x8xbf16>
    %43 = vector.extract_strided_slice %18 {offsets = [0, 0], sizes = [8, 8], strides = [1, 1]} : vector<8x64xf32> to vector<8x8xf32>
    %44 = arith.truncf %43 : vector<8x8xf32> to vector<8x8xbf16>
    %cst_28 = arith.constant dense<0.000000e+00> : vector<8x8xf32>
    %45 = tpu.matmul %42, %44, %cst_28 {dimension_numbers = #tpu.dot_dimension_numbers<[1], [0], [0], [1], [0, 0, 1, 1], [], []>} : vector<8x8xbf16>, vector<8x8xbf16>, vector<8x8xf32> -> vector<8x8xf32>
    %46 = vector.extract_strided_slice %14 {offsets = [0, 8], sizes = [8, 8], strides = [1, 1]} : vector<8x64xf32> to vector<8x8xf32>
    %47 = arith.truncf %46 : vector<8x8xf32> to vector<8x8xbf16>
    %48 = vector.extract_strided_slice %16 {offsets = [0, 8], sizes = [8, 8], strides = [1, 1]} : vector<8x64xf32> to vector<8x8xf32>
    %49 = arith.truncf %48 : vector<8x8xf32> to vector<8x8xbf16>
    %cst_29 = arith.constant dense<0.000000e+00> : vector<8x8xf32>
    %50 = tpu.matmul %47, %49, %cst_29 {dimension_numbers = #tpu.dot_dimension_numbers<[1], [1], [0], [0], [0, 0, 1, 0], [], []>} : vector<8x8xbf16>, vector<8x8xbf16>, vector<8x8xf32> -> vector<8x8xf32>
    %cst_30 = arith.constant -1.000000e+20 : f32
    %51 = vector.shape_cast %20 : vector<1x8xi1> to vector<1x8xi1>
    %52 = vector.broadcast %51 : vector<1x8xi1> to vector<8x8xi1>
    %53 = vector.broadcast %cst_30 : f32 to vector<8x8xf32>
    %54 = arith.select %52, %50, %53 : vector<8x8xi1>, vector<8x8xf32>
    %cst_31 = arith.constant 1.250000e-01 : f32
    %55 = vector.broadcast %cst_31 : f32 to vector<8x8xf32>
    %56 = arith.mulf %54, %55 : vector<8x8xf32>
    %cst_32 = arith.constant dense<0xFF800000> : vector<8xf32>
    %57 = vector.multi_reduction <maximumf>, %56, %cst_32 [1] : vector<8x8xf32> to vector<8xf32>
    %58 = vector.shape_cast %57 : vector<8xf32> to vector<8x1xf32>
    %59 = vector.broadcast %58 : vector<8x1xf32> to vector<8x8xf32>
    %60 = arith.subf %56, %59 : vector<8x8xf32>
    %61 = math.exp %60 : vector<8x8xf32>
    %cst_33 = arith.constant dense<0.000000e+00> : vector<8xf32>
    %62 = vector.multi_reduction <add>, %61, %cst_33 [1] : vector<8x8xf32> to vector<8xf32>
    %63 = vector.shape_cast %62 : vector<8xf32> to vector<8x1xf32>
    %64 = tpu.reciprocal %63 {approx = true} : vector<8x1xf32> -> vector<8x1xf32>
    %65 = vector.broadcast %64 : vector<8x1xf32> to vector<8x8xf32>
    %66 = arith.mulf %61, %65 : vector<8x8xf32>
    %67 = arith.truncf %66 : vector<8x8xf32> to vector<8x8xbf16>
    %68 = vector.extract_strided_slice %18 {offsets = [0, 8], sizes = [8, 8], strides = [1, 1]} : vector<8x64xf32> to vector<8x8xf32>
    %69 = arith.truncf %68 : vector<8x8xf32> to vector<8x8xbf16>
    %cst_34 = arith.constant dense<0.000000e+00> : vector<8x8xf32>
    %70 = tpu.matmul %67, %69, %cst_34 {dimension_numbers = #tpu.dot_dimension_numbers<[1], [0], [0], [1], [0, 0, 1, 1], [], []>} : vector<8x8xbf16>, vector<8x8xbf16>, vector<8x8xf32> -> vector<8x8xf32>
    %71 = vector.extract_strided_slice %14 {offsets = [0, 16], sizes = [8, 8], strides = [1, 1]} : vector<8x64xf32> to vector<8x8xf32>
    %72 = arith.truncf %71 : vector<8x8xf32> to vector<8x8xbf16>
    %73 = vector.extract_strided_slice %16 {offsets = [0, 16], sizes = [8, 8], strides = [1, 1]} : vector<8x64xf32> to vector<8x8xf32>
    %74 = arith.truncf %73 : vector<8x8xf32> to vector<8x8xbf16>
    %cst_35 = arith.constant dense<0.000000e+00> : vector<8x8xf32>
    %75 = tpu.matmul %72, %74, %cst_35 {dimension_numbers = #tpu.dot_dimension_numbers<[1], [1], [0], [0], [0, 0, 1, 0], [], []>} : vector<8x8xbf16>, vector<8x8xbf16>, vector<8x8xf32> -> vector<8x8xf32>
    %cst_36 = arith.constant -1.000000e+20 : f32
    %76 = vector.shape_cast %20 : vector<1x8xi1> to vector<1x8xi1>
    %77 = vector.broadcast %76 : vector<1x8xi1> to vector<8x8xi1>
    %78 = vector.broadcast %cst_36 : f32 to vector<8x8xf32>
    %79 = arith.select %77, %75, %78 : vector<8x8xi1>, vector<8x8xf32>
    %cst_37 = arith.constant 1.250000e-01 : f32
    %80 = vector.broadcast %cst_37 : f32 to vector<8x8xf32>
    %81 = arith.mulf %79, %80 : vector<8x8xf32>
    %cst_38 = arith.constant dense<0xFF800000> : vector<8xf32>
    %82 = vector.multi_reduction <maximumf>, %81, %cst_38 [1] : vector<8x8xf32> to vector<8xf32>
    %83 = vector.shape_cast %82 : vector<8xf32> to vector<8x1xf32>
    %84 = vector.broadcast %83 : vector<8x1xf32> to vector<8x8xf32>
    %85 = arith.subf %81, %84 : vector<8x8xf32>
    %86 = math.exp %85 : vector<8x8xf32>
    %cst_39 = arith.constant dense<0.000000e+00> : vector<8xf32>
    %87 = vector.multi_reduction <add>, %86, %cst_39 [1] : vector<8x8xf32> to vector<8xf32>
    %88 = vector.shape_cast %87 : vector<8xf32> to vector<8x1xf32>
    %89 = tpu.reciprocal %88 {approx = true} : vector<8x1xf32> -> vector<8x1xf32>
    %90 = vector.broadcast %89 : vector<8x1xf32> to vector<8x8xf32>
    %91 = arith.mulf %86, %90 : vector<8x8xf32>
    %92 = arith.truncf %91 : vector<8x8xf32> to vector<8x8xbf16>
    %93 = vector.extract_strided_slice %18 {offsets = [0, 16], sizes = [8, 8], strides = [1, 1]} : vector<8x64xf32> to vector<8x8xf32>
    %94 = arith.truncf %93 : vector<8x8xf32> to vector<8x8xbf16>
    %cst_40 = arith.constant dense<0.000000e+00> : vector<8x8xf32>
    %95 = tpu.matmul %92, %94, %cst_40 {dimension_numbers = #tpu.dot_dimension_numbers<[1], [0], [0], [1], [0, 0, 1, 1], [], []>} : vector<8x8xbf16>, vector<8x8xbf16>, vector<8x8xf32> -> vector<8x8xf32>
    %96 = vector.extract_strided_slice %14 {offsets = [0, 24], sizes = [8, 8], strides = [1, 1]} : vector<8x64xf32> to vector<8x8xf32>
    %97 = arith.truncf %96 : vector<8x8xf32> to vector<8x8xbf16>
    %98 = vector.extract_strided_slice %16 {offsets = [0, 24], sizes = [8, 8], strides = [1, 1]} : vector<8x64xf32> to vector<8x8xf32>
    %99 = arith.truncf %98 : vector<8x8xf32> to vector<8x8xbf16>
    %cst_41 = arith.constant dense<0.000000e+00> : vector<8x8xf32>
    %100 = tpu.matmul %97, %99, %cst_41 {dimension_numbers = #tpu.dot_dimension_numbers<[1], [1], [0], [0], [0, 0, 1, 0], [], []>} : vector<8x8xbf16>, vector<8x8xbf16>, vector<8x8xf32> -> vector<8x8xf32>
    %cst_42 = arith.constant -1.000000e+20 : f32
    %101 = vector.shape_cast %20 : vector<1x8xi1> to vector<1x8xi1>
    %102 = vector.broadcast %101 : vector<1x8xi1> to vector<8x8xi1>
    %103 = vector.broadcast %cst_42 : f32 to vector<8x8xf32>
    %104 = arith.select %102, %100, %103 : vector<8x8xi1>, vector<8x8xf32>
    %cst_43 = arith.constant 1.250000e-01 : f32
    %105 = vector.broadcast %cst_43 : f32 to vector<8x8xf32>
    %106 = arith.mulf %104, %105 : vector<8x8xf32>
    %cst_44 = arith.constant dense<0xFF800000> : vector<8xf32>
    %107 = vector.multi_reduction <maximumf>, %106, %cst_44 [1] : vector<8x8xf32> to vector<8xf32>
    %108 = vector.shape_cast %107 : vector<8xf32> to vector<8x1xf32>
    %109 = vector.broadcast %108 : vector<8x1xf32> to vector<8x8xf32>
    %110 = arith.subf %106, %109 : vector<8x8xf32>
    %111 = math.exp %110 : vector<8x8xf32>
    %cst_45 = arith.constant dense<0.000000e+00> : vector<8xf32>
    %112 = vector.multi_reduction <add>, %111, %cst_45 [1] : vector<8x8xf32> to vector<8xf32>
    %113 = vector.shape_cast %112 : vector<8xf32> to vector<8x1xf32>
    %114 = tpu.reciprocal %113 {approx = true} : vector<8x1xf32> -> vector<8x1xf32>
    %115 = vector.broadcast %114 : vector<8x1xf32> to vector<8x8xf32>
    %116 = arith.mulf %111, %115 : vector<8x8xf32>
    %117 = arith.truncf %116 : vector<8x8xf32> to vector<8x8xbf16>
    %118 = vector.extract_strided_slice %18 {offsets = [0, 24], sizes = [8, 8], strides = [1, 1]} : vector<8x64xf32> to vector<8x8xf32>
    %119 = arith.truncf %118 : vector<8x8xf32> to vector<8x8xbf16>
    %cst_46 = arith.constant dense<0.000000e+00> : vector<8x8xf32>
    %120 = tpu.matmul %117, %119, %cst_46 {dimension_numbers = #tpu.dot_dimension_numbers<[1], [0], [0], [1], [0, 0, 1, 1], [], []>} : vector<8x8xbf16>, vector<8x8xbf16>, vector<8x8xf32> -> vector<8x8xf32>
    %121 = vector.extract_strided_slice %14 {offsets = [0, 32], sizes = [8, 8], strides = [1, 1]} : vector<8x64xf32> to vector<8x8xf32>
    %122 = arith.truncf %121 : vector<8x8xf32> to vector<8x8xbf16>
    %123 = vector.extract_strided_slice %16 {offsets = [0, 32], sizes = [8, 8], strides = [1, 1]} : vector<8x64xf32> to vector<8x8xf32>
    %124 = arith.truncf %123 : vector<8x8xf32> to vector<8x8xbf16>
    %cst_47 = arith.constant dense<0.000000e+00> : vector<8x8xf32>
    %125 = tpu.matmul %122, %124, %cst_47 {dimension_numbers = #tpu.dot_dimension_numbers<[1], [1], [0], [0], [0, 0, 1, 0], [], []>} : vector<8x8xbf16>, vector<8x8xbf16>, vector<8x8xf32> -> vector<8x8xf32>
    %cst_48 = arith.constant -1.000000e+20 : f32
    %126 = vector.shape_cast %20 : vector<1x8xi1> to vector<1x8xi1>
    %127 = vector.broadcast %126 : vector<1x8xi1> to vector<8x8xi1>
    %128 = vector.broadcast %cst_48 : f32 to vector<8x8xf32>
    %129 = arith.select %127, %125, %128 : vector<8x8xi1>, vector<8x8xf32>
    %cst_49 = arith.constant 1.250000e-01 : f32
    %130 = vector.broadcast %cst_49 : f32 to vector<8x8xf32>
    %131 = arith.mulf %129, %130 : vector<8x8xf32>
    %cst_50 = arith.constant dense<0xFF800000> : vector<8xf32>
    %132 = vector.multi_reduction <maximumf>, %131, %cst_50 [1] : vector<8x8xf32> to vector<8xf32>
    %133 = vector.shape_cast %132 : vector<8xf32> to vector<8x1xf32>
    %134 = vector.broadcast %133 : vector<8x1xf32> to vector<8x8xf32>
    %135 = arith.subf %131, %134 : vector<8x8xf32>
    %136 = math.exp %135 : vector<8x8xf32>
    %cst_51 = arith.constant dense<0.000000e+00> : vector<8xf32>
    %137 = vector.multi_reduction <add>, %136, %cst_51 [1] : vector<8x8xf32> to vector<8xf32>
    %138 = vector.shape_cast %137 : vector<8xf32> to vector<8x1xf32>
    %139 = tpu.reciprocal %138 {approx = true} : vector<8x1xf32> -> vector<8x1xf32>
    %140 = vector.broadcast %139 : vector<8x1xf32> to vector<8x8xf32>
    %141 = arith.mulf %136, %140 : vector<8x8xf32>
    %142 = arith.truncf %141 : vector<8x8xf32> to vector<8x8xbf16>
    %143 = vector.extract_strided_slice %18 {offsets = [0, 32], sizes = [8, 8], strides = [1, 1]} : vector<8x64xf32> to vector<8x8xf32>
    %144 = arith.truncf %143 : vector<8x8xf32> to vector<8x8xbf16>
    %cst_52 = arith.constant dense<0.000000e+00> : vector<8x8xf32>
    %145 = tpu.matmul %142, %144, %cst_52 {dimension_numbers = #tpu.dot_dimension_numbers<[1], [0], [0], [1], [0, 0, 1, 1], [], []>} : vector<8x8xbf16>, vector<8x8xbf16>, vector<8x8xf32> -> vector<8x8xf32>
    %146 = vector.extract_strided_slice %14 {offsets = [0, 40], sizes = [8, 8], strides = [1, 1]} : vector<8x64xf32> to vector<8x8xf32>
    %147 = arith.truncf %146 : vector<8x8xf32> to vector<8x8xbf16>
    %148 = vector.extract_strided_slice %16 {offsets = [0, 40], sizes = [8, 8], strides = [1, 1]} : vector<8x64xf32> to vector<8x8xf32>
    %149 = arith.truncf %148 : vector<8x8xf32> to vector<8x8xbf16>
    %cst_53 = arith.constant dense<0.000000e+00> : vector<8x8xf32>
    %150 = tpu.matmul %147, %149, %cst_53 {dimension_numbers = #tpu.dot_dimension_numbers<[1], [1], [0], [0], [0, 0, 1, 0], [], []>} : vector<8x8xbf16>, vector<8x8xbf16>, vector<8x8xf32> -> vector<8x8xf32>
    %cst_54 = arith.constant -1.000000e+20 : f32
    %151 = vector.shape_cast %20 : vector<1x8xi1> to vector<1x8xi1>
    %152 = vector.broadcast %151 : vector<1x8xi1> to vector<8x8xi1>
    %153 = vector.broadcast %cst_54 : f32 to vector<8x8xf32>
    %154 = arith.select %152, %150, %153 : vector<8x8xi1>, vector<8x8xf32>
    %cst_55 = arith.constant 1.250000e-01 : f32
    %155 = vector.broadcast %cst_55 : f32 to vector<8x8xf32>
    %156 = arith.mulf %154, %155 : vector<8x8xf32>
    %cst_56 = arith.constant dense<0xFF800000> : vector<8xf32>
    %157 = vector.multi_reduction <maximumf>, %156, %cst_56 [1] : vector<8x8xf32> to vector<8xf32>
    %158 = vector.shape_cast %157 : vector<8xf32> to vector<8x1xf32>
    %159 = vector.broadcast %158 : vector<8x1xf32> to vector<8x8xf32>
    %160 = arith.subf %156, %159 : vector<8x8xf32>
    %161 = math.exp %160 : vector<8x8xf32>
    %cst_57 = arith.constant dense<0.000000e+00> : vector<8xf32>
    %162 = vector.multi_reduction <add>, %161, %cst_57 [1] : vector<8x8xf32> to vector<8xf32>
    %163 = vector.shape_cast %162 : vector<8xf32> to vector<8x1xf32>
    %164 = tpu.reciprocal %163 {approx = true} : vector<8x1xf32> -> vector<8x1xf32>
    %165 = vector.broadcast %164 : vector<8x1xf32> to vector<8x8xf32>
    %166 = arith.mulf %161, %165 : vector<8x8xf32>
    %167 = arith.truncf %166 : vector<8x8xf32> to vector<8x8xbf16>
    %168 = vector.extract_strided_slice %18 {offsets = [0, 40], sizes = [8, 8], strides = [1, 1]} : vector<8x64xf32> to vector<8x8xf32>
    %169 = arith.truncf %168 : vector<8x8xf32> to vector<8x8xbf16>
    %cst_58 = arith.constant dense<0.000000e+00> : vector<8x8xf32>
    %170 = tpu.matmul %167, %169, %cst_58 {dimension_numbers = #tpu.dot_dimension_numbers<[1], [0], [0], [1], [0, 0, 1, 1], [], []>} : vector<8x8xbf16>, vector<8x8xbf16>, vector<8x8xf32> -> vector<8x8xf32>
    %171 = vector.extract_strided_slice %14 {offsets = [0, 48], sizes = [8, 8], strides = [1, 1]} : vector<8x64xf32> to vector<8x8xf32>
    %172 = arith.truncf %171 : vector<8x8xf32> to vector<8x8xbf16>
    %173 = vector.extract_strided_slice %16 {offsets = [0, 48], sizes = [8, 8], strides = [1, 1]} : vector<8x64xf32> to vector<8x8xf32>
    %174 = arith.truncf %173 : vector<8x8xf32> to vector<8x8xbf16>
    %cst_59 = arith.constant dense<0.000000e+00> : vector<8x8xf32>
    %175 = tpu.matmul %172, %174, %cst_59 {dimension_numbers = #tpu.dot_dimension_numbers<[1], [1], [0], [0], [0, 0, 1, 0], [], []>} : vector<8x8xbf16>, vector<8x8xbf16>, vector<8x8xf32> -> vector<8x8xf32>
    %cst_60 = arith.constant -1.000000e+20 : f32
    %176 = vector.shape_cast %20 : vector<1x8xi1> to vector<1x8xi1>
    %177 = vector.broadcast %176 : vector<1x8xi1> to vector<8x8xi1>
    %178 = vector.broadcast %cst_60 : f32 to vector<8x8xf32>
    %179 = arith.select %177, %175, %178 : vector<8x8xi1>, vector<8x8xf32>
    %cst_61 = arith.constant 1.250000e-01 : f32
    %180 = vector.broadcast %cst_61 : f32 to vector<8x8xf32>
    %181 = arith.mulf %179, %180 : vector<8x8xf32>
    %cst_62 = arith.constant dense<0xFF800000> : vector<8xf32>
    %182 = vector.multi_reduction <maximumf>, %181, %cst_62 [1] : vector<8x8xf32> to vector<8xf32>
    %183 = vector.shape_cast %182 : vector<8xf32> to vector<8x1xf32>
    %184 = vector.broadcast %183 : vector<8x1xf32> to vector<8x8xf32>
    %185 = arith.subf %181, %184 : vector<8x8xf32>
    %186 = math.exp %185 : vector<8x8xf32>
    %cst_63 = arith.constant dense<0.000000e+00> : vector<8xf32>
    %187 = vector.multi_reduction <add>, %186, %cst_63 [1] : vector<8x8xf32> to vector<8xf32>
    %188 = vector.shape_cast %187 : vector<8xf32> to vector<8x1xf32>
    %189 = tpu.reciprocal %188 {approx = true} : vector<8x1xf32> -> vector<8x1xf32>
    %190 = vector.broadcast %189 : vector<8x1xf32> to vector<8x8xf32>
    %191 = arith.mulf %186, %190 : vector<8x8xf32>
    %192 = arith.truncf %191 : vector<8x8xf32> to vector<8x8xbf16>
    %193 = vector.extract_strided_slice %18 {offsets = [0, 48], sizes = [8, 8], strides = [1, 1]} : vector<8x64xf32> to vector<8x8xf32>
    %194 = arith.truncf %193 : vector<8x8xf32> to vector<8x8xbf16>
    %cst_64 = arith.constant dense<0.000000e+00> : vector<8x8xf32>
    %195 = tpu.matmul %192, %194, %cst_64 {dimension_numbers = #tpu.dot_dimension_numbers<[1], [0], [0], [1], [0, 0, 1, 1], [], []>} : vector<8x8xbf16>, vector<8x8xbf16>, vector<8x8xf32> -> vector<8x8xf32>
    %196 = vector.extract_strided_slice %14 {offsets = [0, 56], sizes = [8, 8], strides = [1, 1]} : vector<8x64xf32> to vector<8x8xf32>
    %197 = arith.truncf %196 : vector<8x8xf32> to vector<8x8xbf16>
    %198 = vector.extract_strided_slice %16 {offsets = [0, 56], sizes = [8, 8], strides = [1, 1]} : vector<8x64xf32> to vector<8x8xf32>
    %199 = arith.truncf %198 : vector<8x8xf32> to vector<8x8xbf16>
    %cst_65 = arith.constant dense<0.000000e+00> : vector<8x8xf32>
    %200 = tpu.matmul %197, %199, %cst_65 {dimension_numbers = #tpu.dot_dimension_numbers<[1], [1], [0], [0], [0, 0, 1, 0], [], []>} : vector<8x8xbf16>, vector<8x8xbf16>, vector<8x8xf32> -> vector<8x8xf32>
    %cst_66 = arith.constant -1.000000e+20 : f32
    %201 = vector.shape_cast %20 : vector<1x8xi1> to vector<1x8xi1>
    %202 = vector.broadcast %201 : vector<1x8xi1> to vector<8x8xi1>
    %203 = vector.broadcast %cst_66 : f32 to vector<8x8xf32>
    %204 = arith.select %202, %200, %203 : vector<8x8xi1>, vector<8x8xf32>
    %cst_67 = arith.constant 1.250000e-01 : f32
    %205 = vector.broadcast %cst_67 : f32 to vector<8x8xf32>
    %206 = arith.mulf %204, %205 : vector<8x8xf32>
    %cst_68 = arith.constant dense<0xFF800000> : vector<8xf32>
    %207 = vector.multi_reduction <maximumf>, %206, %cst_68 [1] : vector<8x8xf32> to vector<8xf32>
    %208 = vector.shape_cast %207 : vector<8xf32> to vector<8x1xf32>
    %209 = vector.broadcast %208 : vector<8x1xf32> to vector<8x8xf32>
    %210 = arith.subf %206, %209 : vector<8x8xf32>
    %211 = math.exp %210 : vector<8x8xf32>
    %cst_69 = arith.constant dense<0.000000e+00> : vector<8xf32>
    %212 = vector.multi_reduction <add>, %211, %cst_69 [1] : vector<8x8xf32> to vector<8xf32>
    %213 = vector.shape_cast %212 : vector<8xf32> to vector<8x1xf32>
    %214 = tpu.reciprocal %213 {approx = true} : vector<8x1xf32> -> vector<8x1xf32>
    %215 = vector.broadcast %214 : vector<8x1xf32> to vector<8x8xf32>
    %216 = arith.mulf %211, %215 : vector<8x8xf32>
    %217 = arith.truncf %216 : vector<8x8xf32> to vector<8x8xbf16>
    %218 = vector.extract_strided_slice %18 {offsets = [0, 56], sizes = [8, 8], strides = [1, 1]} : vector<8x64xf32> to vector<8x8xf32>
    %219 = arith.truncf %218 : vector<8x8xf32> to vector<8x8xbf16>
    %cst_70 = arith.constant dense<0.000000e+00> : vector<8x8xf32>
    %220 = tpu.matmul %217, %219, %cst_70 {dimension_numbers = #tpu.dot_dimension_numbers<[1], [0], [0], [1], [0, 0, 1, 1], [], []>} : vector<8x8xbf16>, vector<8x8xbf16>, vector<8x8xf32> -> vector<8x8xf32>
    %221 = tpu.concatenate %45, %70, %95, %120, %145, %170, %195, %220 in 1 : vector<8x8xf32>, vector<8x8xf32>, vector<8x8xf32>, vector<8x8xf32>, vector<8x8xf32>, vector<8x8xf32>, vector<8x8xf32>, vector<8x8xf32> -> vector<8x64xf32>
    %222 = arith.truncf %221 : vector<8x64xf32> to vector<8x64xbf16>
    %cst_71 = arith.constant dense<0.000000e+00> : vector<8x64xf32>
    %223 = tpu.matmul %222, %11, %cst_71 {dimension_numbers = #tpu.dot_dimension_numbers<[1], [0], [0], [1], [0, 0, 1, 1], [], []>} : vector<8x64xbf16>, vector<64x64xbf16>, vector<8x64xf32> -> vector<8x64xf32>
    %224 = vector.broadcast %12 : vector<1x64xf32> to vector<8x64xf32>
    %225 = arith.addf %223, %224 : vector<8x64xf32>
    %226 = arith.addf %225, %1 : vector<8x64xf32>
    %c0_72 = arith.constant 0 : index
    %c0_73 = arith.constant 0 : index
    %227 = vector.load %arg10[%c0_72, %c0_73] : memref<1x64xf32, #tpu.memory_space<vmem>>, vector<1x64xf32>
    %c0_74 = arith.constant 0 : index
    %c0_75 = arith.constant 0 : index
    %228 = vector.load %arg11[%c0_74, %c0_75] : memref<1x64xf32, #tpu.memory_space<vmem>>, vector<1x64xf32>
    %cst_76 = arith.constant dense<0.000000e+00> : vector<8xf32>
    %229 = vector.multi_reduction <add>, %226, %cst_76 [1] : vector<8x64xf32> to vector<8xf32>
    %230 = vector.shape_cast %229 : vector<8xf32> to vector<8x1xf32>
    %cst_77 = arith.constant 6.400000e+01 : f32
    %231 = vector.broadcast %cst_77 : f32 to vector<8x1xf32>
    %232 = arith.divf %230, %231 : vector<8x1xf32>
    %233 = vector.broadcast %232 : vector<8x1xf32> to vector<8x64xf32>
    %234 = arith.subf %226, %233 : vector<8x64xf32>
    %235 = arith.mulf %234, %234 : vector<8x64xf32>
    %cst_78 = arith.constant dense<0.000000e+00> : vector<8xf32>
    %236 = vector.multi_reduction <add>, %235, %cst_78 [1] : vector<8x64xf32> to vector<8xf32>
    %237 = vector.shape_cast %236 : vector<8xf32> to vector<8x1xf32>
    %cst_79 = arith.constant 6.400000e+01 : f32
    %238 = vector.broadcast %cst_79 : f32 to vector<8x1xf32>
    %239 = arith.divf %237, %238 : vector<8x1xf32>
    %240 = vector.broadcast %232 : vector<8x1xf32> to vector<8x64xf32>
    %241 = arith.subf %226, %240 : vector<8x64xf32>
    %cst_80 = arith.constant 9.99999974E-6 : f32
    %242 = vector.broadcast %cst_80 : f32 to vector<8x1xf32>
    %243 = arith.addf %239, %242 : vector<8x1xf32>
    %244 = math.rsqrt %243 : vector<8x1xf32>
    %245 = vector.broadcast %244 : vector<8x1xf32> to vector<8x64xf32>
    %246 = arith.mulf %241, %245 : vector<8x64xf32>
    %247 = vector.broadcast %227 : vector<1x64xf32> to vector<8x64xf32>
    %248 = arith.mulf %246, %247 : vector<8x64xf32>
    %249 = vector.broadcast %228 : vector<1x64xf32> to vector<8x64xf32>
    %250 = arith.addf %248, %249 : vector<8x64xf32>
    %c0_81 = arith.constant 0 : index
    %c0_82 = arith.constant 0 : index
    %251 = vector.load %arg12[%c0_81, %c0_82] : memref<64x256xbf16, #tpu.memory_space<vmem>>, vector<64x256xbf16>
    %252 = arith.truncf %250 : vector<8x64xf32> to vector<8x64xbf16>
    %cst_83 = arith.constant dense<0.000000e+00> : vector<8x256xf32>
    %253 = tpu.matmul %252, %251, %cst_83 {dimension_numbers = #tpu.dot_dimension_numbers<[1], [0], [0], [1], [0, 0, 1, 1], [], []>} : vector<8x64xbf16>, vector<64x256xbf16>, vector<8x256xf32> -> vector<8x256xf32>
    %c0_84 = arith.constant 0 : index
    %c0_85 = arith.constant 0 : index
    %254 = vector.load %arg13[%c0_84, %c0_85] : memref<1x256xf32, #tpu.memory_space<vmem>>, vector<1x256xf32>
    %255 = vector.broadcast %254 : vector<1x256xf32> to vector<8x256xf32>
    %256 = arith.addf %253, %255 : vector<8x256xf32>
    %cst_86 = arith.constant 0.000000e+00 : f32
    %257 = vector.broadcast %cst_86 : f32 to vector<8x256xf32>
    %258 = arith.maximumf %256, %257 : vector<8x256xf32>
    %c0_87 = arith.constant 0 : index
    %c0_88 = arith.constant 0 : index
    %259 = vector.load %arg14[%c0_87, %c0_88] : memref<256x64xbf16, #tpu.memory_space<vmem>>, vector<256x64xbf16>
    %260 = arith.truncf %258 : vector<8x256xf32> to vector<8x256xbf16>
    %cst_89 = arith.constant dense<0.000000e+00> : vector<8x64xf32>
    %261 = tpu.matmul %260, %259, %cst_89 {dimension_numbers = #tpu.dot_dimension_numbers<[1], [0], [0], [1], [0, 0, 1, 1], [], []>} : vector<8x256xbf16>, vector<256x64xbf16>, vector<8x64xf32> -> vector<8x64xf32>
    %c0_90 = arith.constant 0 : index
    %c0_91 = arith.constant 0 : index
    %262 = vector.load %arg15[%c0_90, %c0_91] : memref<1x64xf32, #tpu.memory_space<vmem>>, vector<1x64xf32>
    %263 = vector.broadcast %262 : vector<1x64xf32> to vector<8x64xf32>
    %264 = arith.addf %261, %263 : vector<8x64xf32>
    %265 = arith.addf %264, %250 : vector<8x64xf32>
    %c0_92 = arith.constant 0 : index
    %c0_93 = arith.constant 0 : index
    %266 = vector.load %arg16[%c0_92, %c0_93] : memref<1x64xf32, #tpu.memory_space<vmem>>, vector<1x64xf32>
    %c0_94 = arith.constant 0 : index
    %c0_95 = arith.constant 0 : index
    %267 = vector.load %arg17[%c0_94, %c0_95] : memref<1x64xf32, #tpu.memory_space<vmem>>, vector<1x64xf32>
    %cst_96 = arith.constant dense<0.000000e+00> : vector<8xf32>
    %268 = vector.multi_reduction <add>, %265, %cst_96 [1] : vector<8x64xf32> to vector<8xf32>
    %269 = vector.shape_cast %268 : vector<8xf32> to vector<8x1xf32>
    %cst_97 = arith.constant 6.400000e+01 : f32
    %270 = vector.broadcast %cst_97 : f32 to vector<8x1xf32>
    %271 = arith.divf %269, %270 : vector<8x1xf32>
    %272 = vector.broadcast %271 : vector<8x1xf32> to vector<8x64xf32>
    %273 = arith.subf %265, %272 : vector<8x64xf32>
    %274 = arith.mulf %273, %273 : vector<8x64xf32>
    %cst_98 = arith.constant dense<0.000000e+00> : vector<8xf32>
    %275 = vector.multi_reduction <add>, %274, %cst_98 [1] : vector<8x64xf32> to vector<8xf32>
    %276 = vector.shape_cast %275 : vector<8xf32> to vector<8x1xf32>
    %cst_99 = arith.constant 6.400000e+01 : f32
    %277 = vector.broadcast %cst_99 : f32 to vector<8x1xf32>
    %278 = arith.divf %276, %277 : vector<8x1xf32>
    %279 = vector.broadcast %271 : vector<8x1xf32> to vector<8x64xf32>
    %280 = arith.subf %265, %279 : vector<8x64xf32>
    %cst_100 = arith.constant 9.99999974E-6 : f32
    %281 = vector.broadcast %cst_100 : f32 to vector<8x1xf32>
    %282 = arith.addf %278, %281 : vector<8x1xf32>
    %283 = math.rsqrt %282 : vector<8x1xf32>
    %284 = vector.broadcast %283 : vector<8x1xf32> to vector<8x64xf32>
    %285 = arith.mulf %280, %284 : vector<8x64xf32>
    %286 = vector.broadcast %266 : vector<1x64xf32> to vector<8x64xf32>
    %287 = arith.mulf %285, %286 : vector<8x64xf32>
    %288 = vector.broadcast %267 : vector<1x64xf32> to vector<8x64xf32>
    %289 = arith.addf %287, %288 : vector<8x64xf32>
    %c0_101 = arith.constant 0 : index
    %c0_102 = arith.constant 0 : index
    %c0_103 = arith.constant 0 : index
    %290 = vector.load %arg18[%c0_101, %c0_102, %c0_103] : memref<1x8x64xf32, #tpu.memory_space<vmem>>, vector<1x8x64xf32>
    %291 = vector.shape_cast %290 : vector<1x8x64xf32> to vector<8x64xf32>
    %292 = vector.shape_cast %289 : vector<8x64xf32> to vector<1x8x64xf32>
    tpu.vector_store %arg18[%c0_101, %c0_102, %c0_103], %292 {strides = array<i32>} : memref<1x8x64xf32, #tpu.memory_space<vmem>>, vector<1x8x64xf32>,
    return
  }
  func.func @transform_0(%arg0: i32) -> (i32, i32, i32) {
    %c0_i32 = arith.constant 0 : i32
    %c0_i32_0 = arith.constant 0 : i32
    %c0_i32_1 = arith.constant 0 : i32
    return %arg0, %c0_i32, %c0_i32_0 : i32, i32, i32
  }
  func.func @transform_1(%arg0: i32) -> (i32, i32, i32) {
    %c0_i32 = arith.constant 0 : i32
    %c0_i32_0 = arith.constant 0 : i32
    %c0_i32_1 = arith.constant 0 : i32
    return %arg0, %c0_i32, %c0_i32_0 : i32, i32, i32
  }
  func.func @transform_2(%arg0: i32) -> (i32, i32, i32) {
    %c0_i32 = arith.constant 0 : i32
    %c0_i32_0 = arith.constant 0 : i32
    %c0_i32_1 = arith.constant 0 : i32
    return %arg0, %c0_i32, %c0_i32_0 : i32, i32, i32
  }
  func.func @transform_3(%arg0: i32) -> (i32, i32, i32) {
    %c0_i32 = arith.constant 0 : i32
    %c0_i32_0 = arith.constant 0 : i32
    %c0_i32_1 = arith.constant 0 : i32
    return %arg0, %c0_i32, %c0_i32_0 : i32, i32, i32
  }
  func.func @transform_4(%arg0: i32) -> (i32, i32) {
    %c0_i32 = arith.constant 0 : i32
    %c0_i32_0 = arith.constant 0 : i32
    %c0_i32_1 = arith.constant 0 : i32
    return %c0_i32, %c0_i32_0 : i32, i32
  }
  func.func @transform_5(%arg0: i32) -> (i32, i32) {
    %c0_i32 = arith.constant 0 : i32
    %c0_i32_0 = arith.constant 0 : i32
    %c0_i32_1 = arith.constant 0 : i32
    return %c0_i32, %c0_i32_0 : i32, i32
  }
  func.func @transform_6(%arg0: i32) -> (i32, i32) {
    %c0_i32 = arith.constant 0 : i32
    %c0_i32_0 = arith.constant 0 : i32
    %c0_i32_1 = arith.constant 0 : i32
    return %c0_i32, %c0_i32_0 : i32, i32
  }
  func.func @transform_7(%arg0: i32) -> (i32, i32) {
    %c0_i32 = arith.constant 0 : i32
    %c0_i32_0 = arith.constant 0 : i32
    %c0_i32_1 = arith.constant 0 : i32
    return %c0_i32, %c0_i32_0 : i32, i32
  }
  func.func @transform_8(%arg0: i32) -> (i32, i32) {
    %c0_i32 = arith.constant 0 : i32
    %c0_i32_0 = arith.constant 0 : i32
    %c0_i32_1 = arith.constant 0 : i32
    return %c0_i32, %c0_i32_0 : i32, i32
  }
  func.func @transform_9(%arg0: i32) -> (i32, i32) {
    %c0_i32 = arith.constant 0 : i32
    %c0_i32_0 = arith.constant 0 : i32
    %c0_i32_1 = arith.constant 0 : i32
    return %c0_i32, %c0_i32_0 : i32, i32
  }
  func.func @transform_10(%arg0: i32) -> (i32, i32) {
    %c0_i32 = arith.constant 0 : i32
    %c0_i32_0 = arith.constant 0 : i32
    %c0_i32_1 = arith.constant 0 : i32
    return %c0_i32, %c0_i32_0 : i32, i32
  }
  func.func @transform_11(%arg0: i32) -> (i32, i32) {
    %c0_i32 = arith.constant 0 : i32
    %c0_i32_0 = arith.constant 0 : i32
    %c0_i32_1 = arith.constant 0 : i32
    return %c0_i32, %c0_i32_0 : i32, i32
  }
  func.func @transform_12(%arg0: i32) -> (i32, i32) {
    %c0_i32 = arith.constant 0 : i32
    %c0_i32_0 = arith.constant 0 : i32
    %c0_i32_1 = arith.constant 0 : i32
    return %c0_i32, %c0_i32_0 : i32, i32
  }
  func.func @transform_13(%arg0: i32) -> (i32, i32) {
    %c0_i32 = arith.constant 0 : i32
    %c0_i32_0 = arith.constant 0 : i32
    %c0_i32_1 = arith.constant 0 : i32
    return %c0_i32, %c0_i32_0 : i32, i32
  }
  func.func @transform_14(%arg0: i32) -> (i32, i32) {
    %c0_i32 = arith.constant 0 : i32
    %c0_i32_0 = arith.constant 0 : i32
    %c0_i32_1 = arith.constant 0 : i32
    return %c0_i32, %c0_i32_0 : i32, i32
  }
  func.func @transform_15(%arg0: i32) -> (i32, i32) {
    %c0_i32 = arith.constant 0 : i32
    %c0_i32_0 = arith.constant 0 : i32
    %c0_i32_1 = arith.constant 0 : i32
    return %c0_i32, %c0_i32_0 : i32, i32
  }
  func.func @transform_16(%arg0: i32) -> (i32, i32) {
    %c0_i32 = arith.constant 0 : i32
    %c0_i32_0 = arith.constant 0 : i32
    %c0_i32_1 = arith.constant 0 : i32
    return %c0_i32, %c0_i32_0 : i32, i32
  }
  func.func @transform_17(%arg0: i32) -> (i32, i32, i32) {
    %c0_i32 = arith.constant 0 : i32
    %c0_i32_0 = arith.constant 0 : i32
    %c0_i32_1 = arith.constant 0 : i32
    return %arg0, %c0_i32, %c0_i32_0 : i32, i32, i32
  }
}

module attributes {stable_mosaic.version = 11 : i64} {
  func.func @_dblock_kernel(%arg0: i32, %arg1: memref<1x8x64xf32, #tpu.memory_space<vmem>>, %arg2: memref<1x8x64xf32, #tpu.memory_space<vmem>>, %arg3: memref<8x8xi32, #tpu.memory_space<vmem>>, %arg4: memref<1x1x8xi32, #tpu.memory_space<vmem>>, %arg5: memref<64x64xbf16, #tpu.memory_space<vmem>>, %arg6: memref<64x64xbf16, #tpu.memory_space<vmem>>, %arg7: memref<64x64xbf16, #tpu.memory_space<vmem>>, %arg8: memref<64x64xbf16, #tpu.memory_space<vmem>>, %arg9: memref<1x64xf32, #tpu.memory_space<vmem>>, %arg10: memref<1x64xf32, #tpu.memory_space<vmem>>, %arg11: memref<1x64xf32, #tpu.memory_space<vmem>>, %arg12: memref<64x64xbf16, #tpu.memory_space<vmem>>, %arg13: memref<64x64xbf16, #tpu.memory_space<vmem>>, %arg14: memref<64x64xbf16, #tpu.memory_space<vmem>>, %arg15: memref<64x64xbf16, #tpu.memory_space<vmem>>, %arg16: memref<1x64xf32, #tpu.memory_space<vmem>>, %arg17: memref<1x64xf32, #tpu.memory_space<vmem>>, %arg18: memref<1x64xf32, #tpu.memory_space<vmem>>, %arg19: memref<64x256xbf16, #tpu.memory_space<vmem>>, %arg20: memref<1x256xf32, #tpu.memory_space<vmem>>, %arg21: memref<256x64xbf16, #tpu.memory_space<vmem>>, %arg22: memref<1x64xf32, #tpu.memory_space<vmem>>, %arg23: memref<1x64xf32, #tpu.memory_space<vmem>>, %arg24: memref<1x64xf32, #tpu.memory_space<vmem>>, %arg25: memref<1x8x64xf32, #tpu.memory_space<vmem>>) attributes {dimension_semantics = [#tpu.dimension_semantics<parallel>], iteration_bounds = array<i64: 2>, scalar_prefetch = 0 : i64, scratch_operands = 0 : i64, tpu.core_type = #tpu.core_type<tc>, window_params = [{transform_indices = @transform_0, window_bounds = array<i64: 1, 8, 64>}, {transform_indices = @transform_1, window_bounds = array<i64: 1, 8, 64>}, {pipeline_mode = #tpu.pipeline_mode<synchronous>, transform_indices = @transform_2, window_bounds = array<i64: 8, 8>}, {transform_indices = @transform_3, window_bounds = array<i64: 1, 1, 8>}, {pipeline_mode = #tpu.pipeline_mode<synchronous>, transform_indices = @transform_4, window_bounds = array<i64: 64, 64>}, {pipeline_mode = #tpu.pipeline_mode<synchronous>, transform_indices = @transform_5, window_bounds = array<i64: 64, 64>}, {pipeline_mode = #tpu.pipeline_mode<synchronous>, transform_indices = @transform_6, window_bounds = array<i64: 64, 64>}, {pipeline_mode = #tpu.pipeline_mode<synchronous>, transform_indices = @transform_7, window_bounds = array<i64: 64, 64>}, {pipeline_mode = #tpu.pipeline_mode<synchronous>, transform_indices = @transform_8, window_bounds = array<i64: 1, 64>}, {pipeline_mode = #tpu.pipeline_mode<synchronous>, transform_indices = @transform_9, window_bounds = array<i64: 1, 64>}, {pipeline_mode = #tpu.pipeline_mode<synchronous>, transform_indices = @transform_10, window_bounds = array<i64: 1, 64>}, {pipeline_mode = #tpu.pipeline_mode<synchronous>, transform_indices = @transform_11, window_bounds = array<i64: 64, 64>}, {pipeline_mode = #tpu.pipeline_mode<synchronous>, transform_indices = @transform_12, window_bounds = array<i64: 64, 64>}, {pipeline_mode = #tpu.pipeline_mode<synchronous>, transform_indices = @transform_13, window_bounds = array<i64: 64, 64>}, {pipeline_mode = #tpu.pipeline_mode<synchronous>, transform_indices = @transform_14, window_bounds = array<i64: 64, 64>}, {pipeline_mode = #tpu.pipeline_mode<synchronous>, transform_indices = @transform_15, window_bounds = array<i64: 1, 64>}, {pipeline_mode = #tpu.pipeline_mode<synchronous>, transform_indices = @transform_16, window_bounds = array<i64: 1, 64>}, {pipeline_mode = #tpu.pipeline_mode<synchronous>, transform_indices = @transform_17, window_bounds = array<i64: 1, 64>}, {pipeline_mode = #tpu.pipeline_mode<synchronous>, transform_indices = @transform_18, window_bounds = array<i64: 64, 256>}, {pipeline_mode = #tpu.pipeline_mode<synchronous>, transform_indices = @transform_19, window_bounds = array<i64: 1, 256>}, {pipeline_mode = #tpu.pipeline_mode<synchronous>, transform_indices = @transform_20, window_bounds = array<i64: 256, 64>}, {pipeline_mode = #tpu.pipeline_mode<synchronous>, transform_indices = @transform_21, window_bounds = array<i64: 1, 64>}, {pipeline_mode = #tpu.pipeline_mode<synchronous>, transform_indices = @transform_22, window_bounds = array<i64: 1, 64>}, {pipeline_mode = #tpu.pipeline_mode<synchronous>, transform_indices = @transform_23, window_bounds = array<i64: 1, 64>}, {transform_indices = @transform_24, window_bounds = array<i64: 1, 8, 64>}]} {
    %c0 = arith.constant 0 : index
    %c0_0 = arith.constant 0 : index
    %c0_1 = arith.constant 0 : index
    %0 = vector.load %arg1[%c0, %c0_0, %c0_1] : memref<1x8x64xf32, #tpu.memory_space<vmem>>, vector<1x8x64xf32>
    %1 = vector.shape_cast %0 : vector<1x8x64xf32> to vector<8x64xf32>
    %c0_2 = arith.constant 0 : index
    %c0_3 = arith.constant 0 : index
    %c0_4 = arith.constant 0 : index
    %2 = vector.load %arg2[%c0_2, %c0_3, %c0_4] : memref<1x8x64xf32, #tpu.memory_space<vmem>>, vector<1x8x64xf32>
    %3 = vector.shape_cast %2 : vector<1x8x64xf32> to vector<8x64xf32>
    %c0_5 = arith.constant 0 : index
    %c0_6 = arith.constant 0 : index
    %4 = vector.load %arg3[%c0_5, %c0_6] : memref<8x8xi32, #tpu.memory_space<vmem>>, vector<8x8xi32>
    %c0_7 = arith.constant 0 : index
    %c0_8 = arith.constant 0 : index
    %5 = vector.load %arg5[%c0_7, %c0_8] : memref<64x64xbf16, #tpu.memory_space<vmem>>, vector<64x64xbf16>
    %c0_9 = arith.constant 0 : index
    %c0_10 = arith.constant 0 : index
    %6 = vector.load %arg6[%c0_9, %c0_10] : memref<64x64xbf16, #tpu.memory_space<vmem>>, vector<64x64xbf16>
    %c0_11 = arith.constant 0 : index
    %c0_12 = arith.constant 0 : index
    %7 = vector.load %arg7[%c0_11, %c0_12] : memref<64x64xbf16, #tpu.memory_space<vmem>>, vector<64x64xbf16>
    %c0_13 = arith.constant 0 : index
    %c0_14 = arith.constant 0 : index
    %8 = vector.load %arg8[%c0_13, %c0_14] : memref<64x64xbf16, #tpu.memory_space<vmem>>, vector<64x64xbf16>
    %c0_15 = arith.constant 0 : index
    %c0_16 = arith.constant 0 : index
    %9 = vector.load %arg9[%c0_15, %c0_16] : memref<1x64xf32, #tpu.memory_space<vmem>>, vector<1x64xf32>
    %10 = arith.truncf %1 : vector<8x64xf32> to vector<8x64xbf16>
    %cst = arith.constant dense<0.000000e+00> : vector<8x64xf32>
    %11 = tpu.matmul %10, %5, %cst {dimension_numbers = #tpu.dot_dimension_numbers<[1], [0], [0], [1], [0, 0, 1, 1], [], []>} : vector<8x64xbf16>, vector<64x64xbf16>, vector<8x64xf32> -> vector<8x64xf32>
    %12 = arith.truncf %1 : vector<8x64xf32> to vector<8x64xbf16>
    %cst_17 = arith.constant dense<0.000000e+00> : vector<8x64xf32>
    %13 = tpu.matmul %12, %6, %cst_17 {dimension_numbers = #tpu.dot_dimension_numbers<[1], [0], [0], [1], [0, 0, 1, 1], [], []>} : vector<8x64xbf16>, vector<64x64xbf16>, vector<8x64xf32> -> vector<8x64xf32>
    %14 = arith.truncf %1 : vector<8x64xf32> to vector<8x64xbf16>
    %cst_18 = arith.constant dense<0.000000e+00> : vector<8x64xf32>
    %15 = tpu.matmul %14, %7, %cst_18 {dimension_numbers = #tpu.dot_dimension_numbers<[1], [0], [0], [1], [0, 0, 1, 1], [], []>} : vector<8x64xbf16>, vector<64x64xbf16>, vector<8x64xf32> -> vector<8x64xf32>
    %c0_i32 = arith.constant 0 : i32
    %16 = vector.broadcast %c0_i32 : i32 to vector<8x8xi32>
    %17 = arith.cmpi ne, %4, %16 : vector<8x8xi32>
    %18 = vector.extract_strided_slice %11 {offsets = [0, 0], sizes = [8, 8], strides = [1, 1]} : vector<8x64xf32> to vector<8x8xf32>
    %19 = arith.truncf %18 : vector<8x8xf32> to vector<8x8xbf16>
    %20 = vector.extract_strided_slice %13 {offsets = [0, 0], sizes = [8, 8], strides = [1, 1]} : vector<8x64xf32> to vector<8x8xf32>
    %21 = arith.truncf %20 : vector<8x8xf32> to vector<8x8xbf16>
    %cst_19 = arith.constant dense<0.000000e+00> : vector<8x8xf32>
    %22 = tpu.matmul %19, %21, %cst_19 {dimension_numbers = #tpu.dot_dimension_numbers<[1], [1], [0], [0], [0, 0, 1, 0], [], []>} : vector<8x8xbf16>, vector<8x8xbf16>, vector<8x8xf32> -> vector<8x8xf32>
    %cst_20 = arith.constant -1.000000e+20 : f32
    %23 = vector.broadcast %cst_20 : f32 to vector<8x8xf32>
    %24 = arith.select %17, %22, %23 : vector<8x8xi1>, vector<8x8xf32>
    %cst_21 = arith.constant 1.250000e-01 : f32
    %25 = vector.broadcast %cst_21 : f32 to vector<8x8xf32>
    %26 = arith.mulf %24, %25 : vector<8x8xf32>
    %cst_22 = arith.constant dense<0xFF800000> : vector<8xf32>
    %27 = vector.multi_reduction <maximumf>, %26, %cst_22 [1] : vector<8x8xf32> to vector<8xf32>
    %28 = vector.shape_cast %27 : vector<8xf32> to vector<8x1xf32>
    %29 = vector.broadcast %28 : vector<8x1xf32> to vector<8x8xf32>
    %30 = arith.subf %26, %29 : vector<8x8xf32>
    %31 = math.exp %30 : vector<8x8xf32>
    %cst_23 = arith.constant dense<0.000000e+00> : vector<8xf32>
    %32 = vector.multi_reduction <add>, %31, %cst_23 [1] : vector<8x8xf32> to vector<8xf32>
    %33 = vector.shape_cast %32 : vector<8xf32> to vector<8x1xf32>
    %34 = tpu.reciprocal %33 {approx = true} : vector<8x1xf32> -> vector<8x1xf32>
    %35 = vector.broadcast %34 : vector<8x1xf32> to vector<8x8xf32>
    %36 = arith.mulf %31, %35 : vector<8x8xf32>
    %37 = arith.truncf %36 : vector<8x8xf32> to vector<8x8xbf16>
    %38 = vector.extract_strided_slice %15 {offsets = [0, 0], sizes = [8, 8], strides = [1, 1]} : vector<8x64xf32> to vector<8x8xf32>
    %39 = arith.truncf %38 : vector<8x8xf32> to vector<8x8xbf16>
    %cst_24 = arith.constant dense<0.000000e+00> : vector<8x8xf32>
    %40 = tpu.matmul %37, %39, %cst_24 {dimension_numbers = #tpu.dot_dimension_numbers<[1], [0], [0], [1], [0, 0, 1, 1], [], []>} : vector<8x8xbf16>, vector<8x8xbf16>, vector<8x8xf32> -> vector<8x8xf32>
    %41 = vector.extract_strided_slice %11 {offsets = [0, 8], sizes = [8, 8], strides = [1, 1]} : vector<8x64xf32> to vector<8x8xf32>
    %42 = arith.truncf %41 : vector<8x8xf32> to vector<8x8xbf16>
    %43 = vector.extract_strided_slice %13 {offsets = [0, 8], sizes = [8, 8], strides = [1, 1]} : vector<8x64xf32> to vector<8x8xf32>
    %44 = arith.truncf %43 : vector<8x8xf32> to vector<8x8xbf16>
    %cst_25 = arith.constant dense<0.000000e+00> : vector<8x8xf32>
    %45 = tpu.matmul %42, %44, %cst_25 {dimension_numbers = #tpu.dot_dimension_numbers<[1], [1], [0], [0], [0, 0, 1, 0], [], []>} : vector<8x8xbf16>, vector<8x8xbf16>, vector<8x8xf32> -> vector<8x8xf32>
    %cst_26 = arith.constant -1.000000e+20 : f32
    %46 = vector.broadcast %cst_26 : f32 to vector<8x8xf32>
    %47 = arith.select %17, %45, %46 : vector<8x8xi1>, vector<8x8xf32>
    %cst_27 = arith.constant 1.250000e-01 : f32
    %48 = vector.broadcast %cst_27 : f32 to vector<8x8xf32>
    %49 = arith.mulf %47, %48 : vector<8x8xf32>
    %cst_28 = arith.constant dense<0xFF800000> : vector<8xf32>
    %50 = vector.multi_reduction <maximumf>, %49, %cst_28 [1] : vector<8x8xf32> to vector<8xf32>
    %51 = vector.shape_cast %50 : vector<8xf32> to vector<8x1xf32>
    %52 = vector.broadcast %51 : vector<8x1xf32> to vector<8x8xf32>
    %53 = arith.subf %49, %52 : vector<8x8xf32>
    %54 = math.exp %53 : vector<8x8xf32>
    %cst_29 = arith.constant dense<0.000000e+00> : vector<8xf32>
    %55 = vector.multi_reduction <add>, %54, %cst_29 [1] : vector<8x8xf32> to vector<8xf32>
    %56 = vector.shape_cast %55 : vector<8xf32> to vector<8x1xf32>
    %57 = tpu.reciprocal %56 {approx = true} : vector<8x1xf32> -> vector<8x1xf32>
    %58 = vector.broadcast %57 : vector<8x1xf32> to vector<8x8xf32>
    %59 = arith.mulf %54, %58 : vector<8x8xf32>
    %60 = arith.truncf %59 : vector<8x8xf32> to vector<8x8xbf16>
    %61 = vector.extract_strided_slice %15 {offsets = [0, 8], sizes = [8, 8], strides = [1, 1]} : vector<8x64xf32> to vector<8x8xf32>
    %62 = arith.truncf %61 : vector<8x8xf32> to vector<8x8xbf16>
    %cst_30 = arith.constant dense<0.000000e+00> : vector<8x8xf32>
    %63 = tpu.matmul %60, %62, %cst_30 {dimension_numbers = #tpu.dot_dimension_numbers<[1], [0], [0], [1], [0, 0, 1, 1], [], []>} : vector<8x8xbf16>, vector<8x8xbf16>, vector<8x8xf32> -> vector<8x8xf32>
    %64 = vector.extract_strided_slice %11 {offsets = [0, 16], sizes = [8, 8], strides = [1, 1]} : vector<8x64xf32> to vector<8x8xf32>
    %65 = arith.truncf %64 : vector<8x8xf32> to vector<8x8xbf16>
    %66 = vector.extract_strided_slice %13 {offsets = [0, 16], sizes = [8, 8], strides = [1, 1]} : vector<8x64xf32> to vector<8x8xf32>
    %67 = arith.truncf %66 : vector<8x8xf32> to vector<8x8xbf16>
    %cst_31 = arith.constant dense<0.000000e+00> : vector<8x8xf32>
    %68 = tpu.matmul %65, %67, %cst_31 {dimension_numbers = #tpu.dot_dimension_numbers<[1], [1], [0], [0], [0, 0, 1, 0], [], []>} : vector<8x8xbf16>, vector<8x8xbf16>, vector<8x8xf32> -> vector<8x8xf32>
    %cst_32 = arith.constant -1.000000e+20 : f32
    %69 = vector.broadcast %cst_32 : f32 to vector<8x8xf32>
    %70 = arith.select %17, %68, %69 : vector<8x8xi1>, vector<8x8xf32>
    %cst_33 = arith.constant 1.250000e-01 : f32
    %71 = vector.broadcast %cst_33 : f32 to vector<8x8xf32>
    %72 = arith.mulf %70, %71 : vector<8x8xf32>
    %cst_34 = arith.constant dense<0xFF800000> : vector<8xf32>
    %73 = vector.multi_reduction <maximumf>, %72, %cst_34 [1] : vector<8x8xf32> to vector<8xf32>
    %74 = vector.shape_cast %73 : vector<8xf32> to vector<8x1xf32>
    %75 = vector.broadcast %74 : vector<8x1xf32> to vector<8x8xf32>
    %76 = arith.subf %72, %75 : vector<8x8xf32>
    %77 = math.exp %76 : vector<8x8xf32>
    %cst_35 = arith.constant dense<0.000000e+00> : vector<8xf32>
    %78 = vector.multi_reduction <add>, %77, %cst_35 [1] : vector<8x8xf32> to vector<8xf32>
    %79 = vector.shape_cast %78 : vector<8xf32> to vector<8x1xf32>
    %80 = tpu.reciprocal %79 {approx = true} : vector<8x1xf32> -> vector<8x1xf32>
    %81 = vector.broadcast %80 : vector<8x1xf32> to vector<8x8xf32>
    %82 = arith.mulf %77, %81 : vector<8x8xf32>
    %83 = arith.truncf %82 : vector<8x8xf32> to vector<8x8xbf16>
    %84 = vector.extract_strided_slice %15 {offsets = [0, 16], sizes = [8, 8], strides = [1, 1]} : vector<8x64xf32> to vector<8x8xf32>
    %85 = arith.truncf %84 : vector<8x8xf32> to vector<8x8xbf16>
    %cst_36 = arith.constant dense<0.000000e+00> : vector<8x8xf32>
    %86 = tpu.matmul %83, %85, %cst_36 {dimension_numbers = #tpu.dot_dimension_numbers<[1], [0], [0], [1], [0, 0, 1, 1], [], []>} : vector<8x8xbf16>, vector<8x8xbf16>, vector<8x8xf32> -> vector<8x8xf32>
    %87 = vector.extract_strided_slice %11 {offsets = [0, 24], sizes = [8, 8], strides = [1, 1]} : vector<8x64xf32> to vector<8x8xf32>
    %88 = arith.truncf %87 : vector<8x8xf32> to vector<8x8xbf16>
    %89 = vector.extract_strided_slice %13 {offsets = [0, 24], sizes = [8, 8], strides = [1, 1]} : vector<8x64xf32> to vector<8x8xf32>
    %90 = arith.truncf %89 : vector<8x8xf32> to vector<8x8xbf16>
    %cst_37 = arith.constant dense<0.000000e+00> : vector<8x8xf32>
    %91 = tpu.matmul %88, %90, %cst_37 {dimension_numbers = #tpu.dot_dimension_numbers<[1], [1], [0], [0], [0, 0, 1, 0], [], []>} : vector<8x8xbf16>, vector<8x8xbf16>, vector<8x8xf32> -> vector<8x8xf32>
    %cst_38 = arith.constant -1.000000e+20 : f32
    %92 = vector.broadcast %cst_38 : f32 to vector<8x8xf32>
    %93 = arith.select %17, %91, %92 : vector<8x8xi1>, vector<8x8xf32>
    %cst_39 = arith.constant 1.250000e-01 : f32
    %94 = vector.broadcast %cst_39 : f32 to vector<8x8xf32>
    %95 = arith.mulf %93, %94 : vector<8x8xf32>
    %cst_40 = arith.constant dense<0xFF800000> : vector<8xf32>
    %96 = vector.multi_reduction <maximumf>, %95, %cst_40 [1] : vector<8x8xf32> to vector<8xf32>
    %97 = vector.shape_cast %96 : vector<8xf32> to vector<8x1xf32>
    %98 = vector.broadcast %97 : vector<8x1xf32> to vector<8x8xf32>
    %99 = arith.subf %95, %98 : vector<8x8xf32>
    %100 = math.exp %99 : vector<8x8xf32>
    %cst_41 = arith.constant dense<0.000000e+00> : vector<8xf32>
    %101 = vector.multi_reduction <add>, %100, %cst_41 [1] : vector<8x8xf32> to vector<8xf32>
    %102 = vector.shape_cast %101 : vector<8xf32> to vector<8x1xf32>
    %103 = tpu.reciprocal %102 {approx = true} : vector<8x1xf32> -> vector<8x1xf32>
    %104 = vector.broadcast %103 : vector<8x1xf32> to vector<8x8xf32>
    %105 = arith.mulf %100, %104 : vector<8x8xf32>
    %106 = arith.truncf %105 : vector<8x8xf32> to vector<8x8xbf16>
    %107 = vector.extract_strided_slice %15 {offsets = [0, 24], sizes = [8, 8], strides = [1, 1]} : vector<8x64xf32> to vector<8x8xf32>
    %108 = arith.truncf %107 : vector<8x8xf32> to vector<8x8xbf16>
    %cst_42 = arith.constant dense<0.000000e+00> : vector<8x8xf32>
    %109 = tpu.matmul %106, %108, %cst_42 {dimension_numbers = #tpu.dot_dimension_numbers<[1], [0], [0], [1], [0, 0, 1, 1], [], []>} : vector<8x8xbf16>, vector<8x8xbf16>, vector<8x8xf32> -> vector<8x8xf32>
    %110 = vector.extract_strided_slice %11 {offsets = [0, 32], sizes = [8, 8], strides = [1, 1]} : vector<8x64xf32> to vector<8x8xf32>
    %111 = arith.truncf %110 : vector<8x8xf32> to vector<8x8xbf16>
    %112 = vector.extract_strided_slice %13 {offsets = [0, 32], sizes = [8, 8], strides = [1, 1]} : vector<8x64xf32> to vector<8x8xf32>
    %113 = arith.truncf %112 : vector<8x8xf32> to vector<8x8xbf16>
    %cst_43 = arith.constant dense<0.000000e+00> : vector<8x8xf32>
    %114 = tpu.matmul %111, %113, %cst_43 {dimension_numbers = #tpu.dot_dimension_numbers<[1], [1], [0], [0], [0, 0, 1, 0], [], []>} : vector<8x8xbf16>, vector<8x8xbf16>, vector<8x8xf32> -> vector<8x8xf32>
    %cst_44 = arith.constant -1.000000e+20 : f32
    %115 = vector.broadcast %cst_44 : f32 to vector<8x8xf32>
    %116 = arith.select %17, %114, %115 : vector<8x8xi1>, vector<8x8xf32>
    %cst_45 = arith.constant 1.250000e-01 : f32
    %117 = vector.broadcast %cst_45 : f32 to vector<8x8xf32>
    %118 = arith.mulf %116, %117 : vector<8x8xf32>
    %cst_46 = arith.constant dense<0xFF800000> : vector<8xf32>
    %119 = vector.multi_reduction <maximumf>, %118, %cst_46 [1] : vector<8x8xf32> to vector<8xf32>
    %120 = vector.shape_cast %119 : vector<8xf32> to vector<8x1xf32>
    %121 = vector.broadcast %120 : vector<8x1xf32> to vector<8x8xf32>
    %122 = arith.subf %118, %121 : vector<8x8xf32>
    %123 = math.exp %122 : vector<8x8xf32>
    %cst_47 = arith.constant dense<0.000000e+00> : vector<8xf32>
    %124 = vector.multi_reduction <add>, %123, %cst_47 [1] : vector<8x8xf32> to vector<8xf32>
    %125 = vector.shape_cast %124 : vector<8xf32> to vector<8x1xf32>
    %126 = tpu.reciprocal %125 {approx = true} : vector<8x1xf32> -> vector<8x1xf32>
    %127 = vector.broadcast %126 : vector<8x1xf32> to vector<8x8xf32>
    %128 = arith.mulf %123, %127 : vector<8x8xf32>
    %129 = arith.truncf %128 : vector<8x8xf32> to vector<8x8xbf16>
    %130 = vector.extract_strided_slice %15 {offsets = [0, 32], sizes = [8, 8], strides = [1, 1]} : vector<8x64xf32> to vector<8x8xf32>
    %131 = arith.truncf %130 : vector<8x8xf32> to vector<8x8xbf16>
    %cst_48 = arith.constant dense<0.000000e+00> : vector<8x8xf32>
    %132 = tpu.matmul %129, %131, %cst_48 {dimension_numbers = #tpu.dot_dimension_numbers<[1], [0], [0], [1], [0, 0, 1, 1], [], []>} : vector<8x8xbf16>, vector<8x8xbf16>, vector<8x8xf32> -> vector<8x8xf32>
    %133 = vector.extract_strided_slice %11 {offsets = [0, 40], sizes = [8, 8], strides = [1, 1]} : vector<8x64xf32> to vector<8x8xf32>
    %134 = arith.truncf %133 : vector<8x8xf32> to vector<8x8xbf16>
    %135 = vector.extract_strided_slice %13 {offsets = [0, 40], sizes = [8, 8], strides = [1, 1]} : vector<8x64xf32> to vector<8x8xf32>
    %136 = arith.truncf %135 : vector<8x8xf32> to vector<8x8xbf16>
    %cst_49 = arith.constant dense<0.000000e+00> : vector<8x8xf32>
    %137 = tpu.matmul %134, %136, %cst_49 {dimension_numbers = #tpu.dot_dimension_numbers<[1], [1], [0], [0], [0, 0, 1, 0], [], []>} : vector<8x8xbf16>, vector<8x8xbf16>, vector<8x8xf32> -> vector<8x8xf32>
    %cst_50 = arith.constant -1.000000e+20 : f32
    %138 = vector.broadcast %cst_50 : f32 to vector<8x8xf32>
    %139 = arith.select %17, %137, %138 : vector<8x8xi1>, vector<8x8xf32>
    %cst_51 = arith.constant 1.250000e-01 : f32
    %140 = vector.broadcast %cst_51 : f32 to vector<8x8xf32>
    %141 = arith.mulf %139, %140 : vector<8x8xf32>
    %cst_52 = arith.constant dense<0xFF800000> : vector<8xf32>
    %142 = vector.multi_reduction <maximumf>, %141, %cst_52 [1] : vector<8x8xf32> to vector<8xf32>
    %143 = vector.shape_cast %142 : vector<8xf32> to vector<8x1xf32>
    %144 = vector.broadcast %143 : vector<8x1xf32> to vector<8x8xf32>
    %145 = arith.subf %141, %144 : vector<8x8xf32>
    %146 = math.exp %145 : vector<8x8xf32>
    %cst_53 = arith.constant dense<0.000000e+00> : vector<8xf32>
    %147 = vector.multi_reduction <add>, %146, %cst_53 [1] : vector<8x8xf32> to vector<8xf32>
    %148 = vector.shape_cast %147 : vector<8xf32> to vector<8x1xf32>
    %149 = tpu.reciprocal %148 {approx = true} : vector<8x1xf32> -> vector<8x1xf32>
    %150 = vector.broadcast %149 : vector<8x1xf32> to vector<8x8xf32>
    %151 = arith.mulf %146, %150 : vector<8x8xf32>
    %152 = arith.truncf %151 : vector<8x8xf32> to vector<8x8xbf16>
    %153 = vector.extract_strided_slice %15 {offsets = [0, 40], sizes = [8, 8], strides = [1, 1]} : vector<8x64xf32> to vector<8x8xf32>
    %154 = arith.truncf %153 : vector<8x8xf32> to vector<8x8xbf16>
    %cst_54 = arith.constant dense<0.000000e+00> : vector<8x8xf32>
    %155 = tpu.matmul %152, %154, %cst_54 {dimension_numbers = #tpu.dot_dimension_numbers<[1], [0], [0], [1], [0, 0, 1, 1], [], []>} : vector<8x8xbf16>, vector<8x8xbf16>, vector<8x8xf32> -> vector<8x8xf32>
    %156 = vector.extract_strided_slice %11 {offsets = [0, 48], sizes = [8, 8], strides = [1, 1]} : vector<8x64xf32> to vector<8x8xf32>
    %157 = arith.truncf %156 : vector<8x8xf32> to vector<8x8xbf16>
    %158 = vector.extract_strided_slice %13 {offsets = [0, 48], sizes = [8, 8], strides = [1, 1]} : vector<8x64xf32> to vector<8x8xf32>
    %159 = arith.truncf %158 : vector<8x8xf32> to vector<8x8xbf16>
    %cst_55 = arith.constant dense<0.000000e+00> : vector<8x8xf32>
    %160 = tpu.matmul %157, %159, %cst_55 {dimension_numbers = #tpu.dot_dimension_numbers<[1], [1], [0], [0], [0, 0, 1, 0], [], []>} : vector<8x8xbf16>, vector<8x8xbf16>, vector<8x8xf32> -> vector<8x8xf32>
    %cst_56 = arith.constant -1.000000e+20 : f32
    %161 = vector.broadcast %cst_56 : f32 to vector<8x8xf32>
    %162 = arith.select %17, %160, %161 : vector<8x8xi1>, vector<8x8xf32>
    %cst_57 = arith.constant 1.250000e-01 : f32
    %163 = vector.broadcast %cst_57 : f32 to vector<8x8xf32>
    %164 = arith.mulf %162, %163 : vector<8x8xf32>
    %cst_58 = arith.constant dense<0xFF800000> : vector<8xf32>
    %165 = vector.multi_reduction <maximumf>, %164, %cst_58 [1] : vector<8x8xf32> to vector<8xf32>
    %166 = vector.shape_cast %165 : vector<8xf32> to vector<8x1xf32>
    %167 = vector.broadcast %166 : vector<8x1xf32> to vector<8x8xf32>
    %168 = arith.subf %164, %167 : vector<8x8xf32>
    %169 = math.exp %168 : vector<8x8xf32>
    %cst_59 = arith.constant dense<0.000000e+00> : vector<8xf32>
    %170 = vector.multi_reduction <add>, %169, %cst_59 [1] : vector<8x8xf32> to vector<8xf32>
    %171 = vector.shape_cast %170 : vector<8xf32> to vector<8x1xf32>
    %172 = tpu.reciprocal %171 {approx = true} : vector<8x1xf32> -> vector<8x1xf32>
    %173 = vector.broadcast %172 : vector<8x1xf32> to vector<8x8xf32>
    %174 = arith.mulf %169, %173 : vector<8x8xf32>
    %175 = arith.truncf %174 : vector<8x8xf32> to vector<8x8xbf16>
    %176 = vector.extract_strided_slice %15 {offsets = [0, 48], sizes = [8, 8], strides = [1, 1]} : vector<8x64xf32> to vector<8x8xf32>
    %177 = arith.truncf %176 : vector<8x8xf32> to vector<8x8xbf16>
    %cst_60 = arith.constant dense<0.000000e+00> : vector<8x8xf32>
    %178 = tpu.matmul %175, %177, %cst_60 {dimension_numbers = #tpu.dot_dimension_numbers<[1], [0], [0], [1], [0, 0, 1, 1], [], []>} : vector<8x8xbf16>, vector<8x8xbf16>, vector<8x8xf32> -> vector<8x8xf32>
    %179 = vector.extract_strided_slice %11 {offsets = [0, 56], sizes = [8, 8], strides = [1, 1]} : vector<8x64xf32> to vector<8x8xf32>
    %180 = arith.truncf %179 : vector<8x8xf32> to vector<8x8xbf16>
    %181 = vector.extract_strided_slice %13 {offsets = [0, 56], sizes = [8, 8], strides = [1, 1]} : vector<8x64xf32> to vector<8x8xf32>
    %182 = arith.truncf %181 : vector<8x8xf32> to vector<8x8xbf16>
    %cst_61 = arith.constant dense<0.000000e+00> : vector<8x8xf32>
    %183 = tpu.matmul %180, %182, %cst_61 {dimension_numbers = #tpu.dot_dimension_numbers<[1], [1], [0], [0], [0, 0, 1, 0], [], []>} : vector<8x8xbf16>, vector<8x8xbf16>, vector<8x8xf32> -> vector<8x8xf32>
    %cst_62 = arith.constant -1.000000e+20 : f32
    %184 = vector.broadcast %cst_62 : f32 to vector<8x8xf32>
    %185 = arith.select %17, %183, %184 : vector<8x8xi1>, vector<8x8xf32>
    %cst_63 = arith.constant 1.250000e-01 : f32
    %186 = vector.broadcast %cst_63 : f32 to vector<8x8xf32>
    %187 = arith.mulf %185, %186 : vector<8x8xf32>
    %cst_64 = arith.constant dense<0xFF800000> : vector<8xf32>
    %188 = vector.multi_reduction <maximumf>, %187, %cst_64 [1] : vector<8x8xf32> to vector<8xf32>
    %189 = vector.shape_cast %188 : vector<8xf32> to vector<8x1xf32>
    %190 = vector.broadcast %189 : vector<8x1xf32> to vector<8x8xf32>
    %191 = arith.subf %187, %190 : vector<8x8xf32>
    %192 = math.exp %191 : vector<8x8xf32>
    %cst_65 = arith.constant dense<0.000000e+00> : vector<8xf32>
    %193 = vector.multi_reduction <add>, %192, %cst_65 [1] : vector<8x8xf32> to vector<8xf32>
    %194 = vector.shape_cast %193 : vector<8xf32> to vector<8x1xf32>
    %195 = tpu.reciprocal %194 {approx = true} : vector<8x1xf32> -> vector<8x1xf32>
    %196 = vector.broadcast %195 : vector<8x1xf32> to vector<8x8xf32>
    %197 = arith.mulf %192, %196 : vector<8x8xf32>
    %198 = arith.truncf %197 : vector<8x8xf32> to vector<8x8xbf16>
    %199 = vector.extract_strided_slice %15 {offsets = [0, 56], sizes = [8, 8], strides = [1, 1]} : vector<8x64xf32> to vector<8x8xf32>
    %200 = arith.truncf %199 : vector<8x8xf32> to vector<8x8xbf16>
    %cst_66 = arith.constant dense<0.000000e+00> : vector<8x8xf32>
    %201 = tpu.matmul %198, %200, %cst_66 {dimension_numbers = #tpu.dot_dimension_numbers<[1], [0], [0], [1], [0, 0, 1, 1], [], []>} : vector<8x8xbf16>, vector<8x8xbf16>, vector<8x8xf32> -> vector<8x8xf32>
    %202 = tpu.concatenate %40, %63, %86, %109, %132, %155, %178, %201 in 1 : vector<8x8xf32>, vector<8x8xf32>, vector<8x8xf32>, vector<8x8xf32>, vector<8x8xf32>, vector<8x8xf32>, vector<8x8xf32>, vector<8x8xf32> -> vector<8x64xf32>
    %203 = arith.truncf %202 : vector<8x64xf32> to vector<8x64xbf16>
    %cst_67 = arith.constant dense<0.000000e+00> : vector<8x64xf32>
    %204 = tpu.matmul %203, %8, %cst_67 {dimension_numbers = #tpu.dot_dimension_numbers<[1], [0], [0], [1], [0, 0, 1, 1], [], []>} : vector<8x64xbf16>, vector<64x64xbf16>, vector<8x64xf32> -> vector<8x64xf32>
    %205 = vector.broadcast %9 : vector<1x64xf32> to vector<8x64xf32>
    %206 = arith.addf %204, %205 : vector<8x64xf32>
    %207 = arith.addf %206, %1 : vector<8x64xf32>
    %c0_68 = arith.constant 0 : index
    %c0_69 = arith.constant 0 : index
    %208 = vector.load %arg10[%c0_68, %c0_69] : memref<1x64xf32, #tpu.memory_space<vmem>>, vector<1x64xf32>
    %c0_70 = arith.constant 0 : index
    %c0_71 = arith.constant 0 : index
    %209 = vector.load %arg11[%c0_70, %c0_71] : memref<1x64xf32, #tpu.memory_space<vmem>>, vector<1x64xf32>
    %cst_72 = arith.constant dense<0.000000e+00> : vector<8xf32>
    %210 = vector.multi_reduction <add>, %207, %cst_72 [1] : vector<8x64xf32> to vector<8xf32>
    %211 = vector.shape_cast %210 : vector<8xf32> to vector<8x1xf32>
    %cst_73 = arith.constant 6.400000e+01 : f32
    %212 = vector.broadcast %cst_73 : f32 to vector<8x1xf32>
    %213 = arith.divf %211, %212 : vector<8x1xf32>
    %214 = vector.broadcast %213 : vector<8x1xf32> to vector<8x64xf32>
    %215 = arith.subf %207, %214 : vector<8x64xf32>
    %216 = arith.mulf %215, %215 : vector<8x64xf32>
    %cst_74 = arith.constant dense<0.000000e+00> : vector<8xf32>
    %217 = vector.multi_reduction <add>, %216, %cst_74 [1] : vector<8x64xf32> to vector<8xf32>
    %218 = vector.shape_cast %217 : vector<8xf32> to vector<8x1xf32>
    %cst_75 = arith.constant 6.400000e+01 : f32
    %219 = vector.broadcast %cst_75 : f32 to vector<8x1xf32>
    %220 = arith.divf %218, %219 : vector<8x1xf32>
    %221 = vector.broadcast %213 : vector<8x1xf32> to vector<8x64xf32>
    %222 = arith.subf %207, %221 : vector<8x64xf32>
    %cst_76 = arith.constant 9.99999974E-6 : f32
    %223 = vector.broadcast %cst_76 : f32 to vector<8x1xf32>
    %224 = arith.addf %220, %223 : vector<8x1xf32>
    %225 = math.rsqrt %224 : vector<8x1xf32>
    %226 = vector.broadcast %225 : vector<8x1xf32> to vector<8x64xf32>
    %227 = arith.mulf %222, %226 : vector<8x64xf32>
    %228 = vector.broadcast %208 : vector<1x64xf32> to vector<8x64xf32>
    %229 = arith.mulf %227, %228 : vector<8x64xf32>
    %230 = vector.broadcast %209 : vector<1x64xf32> to vector<8x64xf32>
    %231 = arith.addf %229, %230 : vector<8x64xf32>
    %c0_77 = arith.constant 0 : index
    %c0_78 = arith.constant 0 : index
    %c0_79 = arith.constant 0 : index
    %232 = vector.load %arg4[%c0_77, %c0_78, %c0_79] : memref<1x1x8xi32, #tpu.memory_space<vmem>>, vector<1x1x8xi32>
    %233 = vector.shape_cast %232 : vector<1x1x8xi32> to vector<1x8xi32>
    %c0_80 = arith.constant 0 : index
    %c0_81 = arith.constant 0 : index
    %234 = vector.load %arg12[%c0_80, %c0_81] : memref<64x64xbf16, #tpu.memory_space<vmem>>, vector<64x64xbf16>
    %c0_82 = arith.constant 0 : index
    %c0_83 = arith.constant 0 : index
    %235 = vector.load %arg13[%c0_82, %c0_83] : memref<64x64xbf16, #tpu.memory_space<vmem>>, vector<64x64xbf16>
    %c0_84 = arith.constant 0 : index
    %c0_85 = arith.constant 0 : index
    %236 = vector.load %arg14[%c0_84, %c0_85] : memref<64x64xbf16, #tpu.memory_space<vmem>>, vector<64x64xbf16>
    %c0_86 = arith.constant 0 : index
    %c0_87 = arith.constant 0 : index
    %237 = vector.load %arg15[%c0_86, %c0_87] : memref<64x64xbf16, #tpu.memory_space<vmem>>, vector<64x64xbf16>
    %c0_88 = arith.constant 0 : index
    %c0_89 = arith.constant 0 : index
    %238 = vector.load %arg16[%c0_88, %c0_89] : memref<1x64xf32, #tpu.memory_space<vmem>>, vector<1x64xf32>
    %239 = arith.truncf %231 : vector<8x64xf32> to vector<8x64xbf16>
    %cst_90 = arith.constant dense<0.000000e+00> : vector<8x64xf32>
    %240 = tpu.matmul %239, %234, %cst_90 {dimension_numbers = #tpu.dot_dimension_numbers<[1], [0], [0], [1], [0, 0, 1, 1], [], []>} : vector<8x64xbf16>, vector<64x64xbf16>, vector<8x64xf32> -> vector<8x64xf32>
    %241 = arith.truncf %3 : vector<8x64xf32> to vector<8x64xbf16>
    %cst_91 = arith.constant dense<0.000000e+00> : vector<8x64xf32>
    %242 = tpu.matmul %241, %235, %cst_91 {dimension_numbers = #tpu.dot_dimension_numbers<[1], [0], [0], [1], [0, 0, 1, 1], [], []>} : vector<8x64xbf16>, vector<64x64xbf16>, vector<8x64xf32> -> vector<8x64xf32>
    %243 = arith.truncf %3 : vector<8x64xf32> to vector<8x64xbf16>
    %cst_92 = arith.constant dense<0.000000e+00> : vector<8x64xf32>
    %244 = tpu.matmul %243, %236, %cst_92 {dimension_numbers = #tpu.dot_dimension_numbers<[1], [0], [0], [1], [0, 0, 1, 1], [], []>} : vector<8x64xbf16>, vector<64x64xbf16>, vector<8x64xf32> -> vector<8x64xf32>
    %c0_i32_93 = arith.constant 0 : i32
    %245 = vector.broadcast %c0_i32_93 : i32 to vector<1x8xi32>
    %246 = arith.cmpi ne, %233, %245 : vector<1x8xi32>
    %247 = vector.extract_strided_slice %240 {offsets = [0, 0], sizes = [8, 8], strides = [1, 1]} : vector<8x64xf32> to vector<8x8xf32>
    %248 = arith.truncf %247 : vector<8x8xf32> to vector<8x8xbf16>
    %249 = vector.extract_strided_slice %242 {offsets = [0, 0], sizes = [8, 8], strides = [1, 1]} : vector<8x64xf32> to vector<8x8xf32>
    %250 = arith.truncf %249 : vector<8x8xf32> to vector<8x8xbf16>
    %cst_94 = arith.constant dense<0.000000e+00> : vector<8x8xf32>
    %251 = tpu.matmul %248, %250, %cst_94 {dimension_numbers = #tpu.dot_dimension_numbers<[1], [1], [0], [0], [0, 0, 1, 0], [], []>} : vector<8x8xbf16>, vector<8x8xbf16>, vector<8x8xf32> -> vector<8x8xf32>
    %cst_95 = arith.constant -1.000000e+20 : f32
    %252 = vector.shape_cast %246 : vector<1x8xi1> to vector<1x8xi1>
    %253 = vector.broadcast %252 : vector<1x8xi1> to vector<8x8xi1>
    %254 = vector.broadcast %cst_95 : f32 to vector<8x8xf32>
    %255 = arith.select %253, %251, %254 : vector<8x8xi1>, vector<8x8xf32>
    %cst_96 = arith.constant 1.250000e-01 : f32
    %256 = vector.broadcast %cst_96 : f32 to vector<8x8xf32>
    %257 = arith.mulf %255, %256 : vector<8x8xf32>
    %cst_97 = arith.constant dense<0xFF800000> : vector<8xf32>
    %258 = vector.multi_reduction <maximumf>, %257, %cst_97 [1] : vector<8x8xf32> to vector<8xf32>
    %259 = vector.shape_cast %258 : vector<8xf32> to vector<8x1xf32>
    %260 = vector.broadcast %259 : vector<8x1xf32> to vector<8x8xf32>
    %261 = arith.subf %257, %260 : vector<8x8xf32>
    %262 = math.exp %261 : vector<8x8xf32>
    %cst_98 = arith.constant dense<0.000000e+00> : vector<8xf32>
    %263 = vector.multi_reduction <add>, %262, %cst_98 [1] : vector<8x8xf32> to vector<8xf32>
    %264 = vector.shape_cast %263 : vector<8xf32> to vector<8x1xf32>
    %265 = tpu.reciprocal %264 {approx = true} : vector<8x1xf32> -> vector<8x1xf32>
    %266 = vector.broadcast %265 : vector<8x1xf32> to vector<8x8xf32>
    %267 = arith.mulf %262, %266 : vector<8x8xf32>
    %268 = arith.truncf %267 : vector<8x8xf32> to vector<8x8xbf16>
    %269 = vector.extract_strided_slice %244 {offsets = [0, 0], sizes = [8, 8], strides = [1, 1]} : vector<8x64xf32> to vector<8x8xf32>
    %270 = arith.truncf %269 : vector<8x8xf32> to vector<8x8xbf16>
    %cst_99 = arith.constant dense<0.000000e+00> : vector<8x8xf32>
    %271 = tpu.matmul %268, %270, %cst_99 {dimension_numbers = #tpu.dot_dimension_numbers<[1], [0], [0], [1], [0, 0, 1, 1], [], []>} : vector<8x8xbf16>, vector<8x8xbf16>, vector<8x8xf32> -> vector<8x8xf32>
    %272 = vector.extract_strided_slice %240 {offsets = [0, 8], sizes = [8, 8], strides = [1, 1]} : vector<8x64xf32> to vector<8x8xf32>
    %273 = arith.truncf %272 : vector<8x8xf32> to vector<8x8xbf16>
    %274 = vector.extract_strided_slice %242 {offsets = [0, 8], sizes = [8, 8], strides = [1, 1]} : vector<8x64xf32> to vector<8x8xf32>
    %275 = arith.truncf %274 : vector<8x8xf32> to vector<8x8xbf16>
    %cst_100 = arith.constant dense<0.000000e+00> : vector<8x8xf32>
    %276 = tpu.matmul %273, %275, %cst_100 {dimension_numbers = #tpu.dot_dimension_numbers<[1], [1], [0], [0], [0, 0, 1, 0], [], []>} : vector<8x8xbf16>, vector<8x8xbf16>, vector<8x8xf32> -> vector<8x8xf32>
    %cst_101 = arith.constant -1.000000e+20 : f32
    %277 = vector.shape_cast %246 : vector<1x8xi1> to vector<1x8xi1>
    %278 = vector.broadcast %277 : vector<1x8xi1> to vector<8x8xi1>
    %279 = vector.broadcast %cst_101 : f32 to vector<8x8xf32>
    %280 = arith.select %278, %276, %279 : vector<8x8xi1>, vector<8x8xf32>
    %cst_102 = arith.constant 1.250000e-01 : f32
    %281 = vector.broadcast %cst_102 : f32 to vector<8x8xf32>
    %282 = arith.mulf %280, %281 : vector<8x8xf32>
    %cst_103 = arith.constant dense<0xFF800000> : vector<8xf32>
    %283 = vector.multi_reduction <maximumf>, %282, %cst_103 [1] : vector<8x8xf32> to vector<8xf32>
    %284 = vector.shape_cast %283 : vector<8xf32> to vector<8x1xf32>
    %285 = vector.broadcast %284 : vector<8x1xf32> to vector<8x8xf32>
    %286 = arith.subf %282, %285 : vector<8x8xf32>
    %287 = math.exp %286 : vector<8x8xf32>
    %cst_104 = arith.constant dense<0.000000e+00> : vector<8xf32>
    %288 = vector.multi_reduction <add>, %287, %cst_104 [1] : vector<8x8xf32> to vector<8xf32>
    %289 = vector.shape_cast %288 : vector<8xf32> to vector<8x1xf32>
    %290 = tpu.reciprocal %289 {approx = true} : vector<8x1xf32> -> vector<8x1xf32>
    %291 = vector.broadcast %290 : vector<8x1xf32> to vector<8x8xf32>
    %292 = arith.mulf %287, %291 : vector<8x8xf32>
    %293 = arith.truncf %292 : vector<8x8xf32> to vector<8x8xbf16>
    %294 = vector.extract_strided_slice %244 {offsets = [0, 8], sizes = [8, 8], strides = [1, 1]} : vector<8x64xf32> to vector<8x8xf32>
    %295 = arith.truncf %294 : vector<8x8xf32> to vector<8x8xbf16>
    %cst_105 = arith.constant dense<0.000000e+00> : vector<8x8xf32>
    %296 = tpu.matmul %293, %295, %cst_105 {dimension_numbers = #tpu.dot_dimension_numbers<[1], [0], [0], [1], [0, 0, 1, 1], [], []>} : vector<8x8xbf16>, vector<8x8xbf16>, vector<8x8xf32> -> vector<8x8xf32>
    %297 = vector.extract_strided_slice %240 {offsets = [0, 16], sizes = [8, 8], strides = [1, 1]} : vector<8x64xf32> to vector<8x8xf32>
    %298 = arith.truncf %297 : vector<8x8xf32> to vector<8x8xbf16>
    %299 = vector.extract_strided_slice %242 {offsets = [0, 16], sizes = [8, 8], strides = [1, 1]} : vector<8x64xf32> to vector<8x8xf32>
    %300 = arith.truncf %299 : vector<8x8xf32> to vector<8x8xbf16>
    %cst_106 = arith.constant dense<0.000000e+00> : vector<8x8xf32>
    %301 = tpu.matmul %298, %300, %cst_106 {dimension_numbers = #tpu.dot_dimension_numbers<[1], [1], [0], [0], [0, 0, 1, 0], [], []>} : vector<8x8xbf16>, vector<8x8xbf16>, vector<8x8xf32> -> vector<8x8xf32>
    %cst_107 = arith.constant -1.000000e+20 : f32
    %302 = vector.shape_cast %246 : vector<1x8xi1> to vector<1x8xi1>
    %303 = vector.broadcast %302 : vector<1x8xi1> to vector<8x8xi1>
    %304 = vector.broadcast %cst_107 : f32 to vector<8x8xf32>
    %305 = arith.select %303, %301, %304 : vector<8x8xi1>, vector<8x8xf32>
    %cst_108 = arith.constant 1.250000e-01 : f32
    %306 = vector.broadcast %cst_108 : f32 to vector<8x8xf32>
    %307 = arith.mulf %305, %306 : vector<8x8xf32>
    %cst_109 = arith.constant dense<0xFF800000> : vector<8xf32>
    %308 = vector.multi_reduction <maximumf>, %307, %cst_109 [1] : vector<8x8xf32> to vector<8xf32>
    %309 = vector.shape_cast %308 : vector<8xf32> to vector<8x1xf32>
    %310 = vector.broadcast %309 : vector<8x1xf32> to vector<8x8xf32>
    %311 = arith.subf %307, %310 : vector<8x8xf32>
    %312 = math.exp %311 : vector<8x8xf32>
    %cst_110 = arith.constant dense<0.000000e+00> : vector<8xf32>
    %313 = vector.multi_reduction <add>, %312, %cst_110 [1] : vector<8x8xf32> to vector<8xf32>
    %314 = vector.shape_cast %313 : vector<8xf32> to vector<8x1xf32>
    %315 = tpu.reciprocal %314 {approx = true} : vector<8x1xf32> -> vector<8x1xf32>
    %316 = vector.broadcast %315 : vector<8x1xf32> to vector<8x8xf32>
    %317 = arith.mulf %312, %316 : vector<8x8xf32>
    %318 = arith.truncf %317 : vector<8x8xf32> to vector<8x8xbf16>
    %319 = vector.extract_strided_slice %244 {offsets = [0, 16], sizes = [8, 8], strides = [1, 1]} : vector<8x64xf32> to vector<8x8xf32>
    %320 = arith.truncf %319 : vector<8x8xf32> to vector<8x8xbf16>
    %cst_111 = arith.constant dense<0.000000e+00> : vector<8x8xf32>
    %321 = tpu.matmul %318, %320, %cst_111 {dimension_numbers = #tpu.dot_dimension_numbers<[1], [0], [0], [1], [0, 0, 1, 1], [], []>} : vector<8x8xbf16>, vector<8x8xbf16>, vector<8x8xf32> -> vector<8x8xf32>
    %322 = vector.extract_strided_slice %240 {offsets = [0, 24], sizes = [8, 8], strides = [1, 1]} : vector<8x64xf32> to vector<8x8xf32>
    %323 = arith.truncf %322 : vector<8x8xf32> to vector<8x8xbf16>
    %324 = vector.extract_strided_slice %242 {offsets = [0, 24], sizes = [8, 8], strides = [1, 1]} : vector<8x64xf32> to vector<8x8xf32>
    %325 = arith.truncf %324 : vector<8x8xf32> to vector<8x8xbf16>
    %cst_112 = arith.constant dense<0.000000e+00> : vector<8x8xf32>
    %326 = tpu.matmul %323, %325, %cst_112 {dimension_numbers = #tpu.dot_dimension_numbers<[1], [1], [0], [0], [0, 0, 1, 0], [], []>} : vector<8x8xbf16>, vector<8x8xbf16>, vector<8x8xf32> -> vector<8x8xf32>
    %cst_113 = arith.constant -1.000000e+20 : f32
    %327 = vector.shape_cast %246 : vector<1x8xi1> to vector<1x8xi1>
    %328 = vector.broadcast %327 : vector<1x8xi1> to vector<8x8xi1>
    %329 = vector.broadcast %cst_113 : f32 to vector<8x8xf32>
    %330 = arith.select %328, %326, %329 : vector<8x8xi1>, vector<8x8xf32>
    %cst_114 = arith.constant 1.250000e-01 : f32
    %331 = vector.broadcast %cst_114 : f32 to vector<8x8xf32>
    %332 = arith.mulf %330, %331 : vector<8x8xf32>
    %cst_115 = arith.constant dense<0xFF800000> : vector<8xf32>
    %333 = vector.multi_reduction <maximumf>, %332, %cst_115 [1] : vector<8x8xf32> to vector<8xf32>
    %334 = vector.shape_cast %333 : vector<8xf32> to vector<8x1xf32>
    %335 = vector.broadcast %334 : vector<8x1xf32> to vector<8x8xf32>
    %336 = arith.subf %332, %335 : vector<8x8xf32>
    %337 = math.exp %336 : vector<8x8xf32>
    %cst_116 = arith.constant dense<0.000000e+00> : vector<8xf32>
    %338 = vector.multi_reduction <add>, %337, %cst_116 [1] : vector<8x8xf32> to vector<8xf32>
    %339 = vector.shape_cast %338 : vector<8xf32> to vector<8x1xf32>
    %340 = tpu.reciprocal %339 {approx = true} : vector<8x1xf32> -> vector<8x1xf32>
    %341 = vector.broadcast %340 : vector<8x1xf32> to vector<8x8xf32>
    %342 = arith.mulf %337, %341 : vector<8x8xf32>
    %343 = arith.truncf %342 : vector<8x8xf32> to vector<8x8xbf16>
    %344 = vector.extract_strided_slice %244 {offsets = [0, 24], sizes = [8, 8], strides = [1, 1]} : vector<8x64xf32> to vector<8x8xf32>
    %345 = arith.truncf %344 : vector<8x8xf32> to vector<8x8xbf16>
    %cst_117 = arith.constant dense<0.000000e+00> : vector<8x8xf32>
    %346 = tpu.matmul %343, %345, %cst_117 {dimension_numbers = #tpu.dot_dimension_numbers<[1], [0], [0], [1], [0, 0, 1, 1], [], []>} : vector<8x8xbf16>, vector<8x8xbf16>, vector<8x8xf32> -> vector<8x8xf32>
    %347 = vector.extract_strided_slice %240 {offsets = [0, 32], sizes = [8, 8], strides = [1, 1]} : vector<8x64xf32> to vector<8x8xf32>
    %348 = arith.truncf %347 : vector<8x8xf32> to vector<8x8xbf16>
    %349 = vector.extract_strided_slice %242 {offsets = [0, 32], sizes = [8, 8], strides = [1, 1]} : vector<8x64xf32> to vector<8x8xf32>
    %350 = arith.truncf %349 : vector<8x8xf32> to vector<8x8xbf16>
    %cst_118 = arith.constant dense<0.000000e+00> : vector<8x8xf32>
    %351 = tpu.matmul %348, %350, %cst_118 {dimension_numbers = #tpu.dot_dimension_numbers<[1], [1], [0], [0], [0, 0, 1, 0], [], []>} : vector<8x8xbf16>, vector<8x8xbf16>, vector<8x8xf32> -> vector<8x8xf32>
    %cst_119 = arith.constant -1.000000e+20 : f32
    %352 = vector.shape_cast %246 : vector<1x8xi1> to vector<1x8xi1>
    %353 = vector.broadcast %352 : vector<1x8xi1> to vector<8x8xi1>
    %354 = vector.broadcast %cst_119 : f32 to vector<8x8xf32>
    %355 = arith.select %353, %351, %354 : vector<8x8xi1>, vector<8x8xf32>
    %cst_120 = arith.constant 1.250000e-01 : f32
    %356 = vector.broadcast %cst_120 : f32 to vector<8x8xf32>
    %357 = arith.mulf %355, %356 : vector<8x8xf32>
    %cst_121 = arith.constant dense<0xFF800000> : vector<8xf32>
    %358 = vector.multi_reduction <maximumf>, %357, %cst_121 [1] : vector<8x8xf32> to vector<8xf32>
    %359 = vector.shape_cast %358 : vector<8xf32> to vector<8x1xf32>
    %360 = vector.broadcast %359 : vector<8x1xf32> to vector<8x8xf32>
    %361 = arith.subf %357, %360 : vector<8x8xf32>
    %362 = math.exp %361 : vector<8x8xf32>
    %cst_122 = arith.constant dense<0.000000e+00> : vector<8xf32>
    %363 = vector.multi_reduction <add>, %362, %cst_122 [1] : vector<8x8xf32> to vector<8xf32>
    %364 = vector.shape_cast %363 : vector<8xf32> to vector<8x1xf32>
    %365 = tpu.reciprocal %364 {approx = true} : vector<8x1xf32> -> vector<8x1xf32>
    %366 = vector.broadcast %365 : vector<8x1xf32> to vector<8x8xf32>
    %367 = arith.mulf %362, %366 : vector<8x8xf32>
    %368 = arith.truncf %367 : vector<8x8xf32> to vector<8x8xbf16>
    %369 = vector.extract_strided_slice %244 {offsets = [0, 32], sizes = [8, 8], strides = [1, 1]} : vector<8x64xf32> to vector<8x8xf32>
    %370 = arith.truncf %369 : vector<8x8xf32> to vector<8x8xbf16>
    %cst_123 = arith.constant dense<0.000000e+00> : vector<8x8xf32>
    %371 = tpu.matmul %368, %370, %cst_123 {dimension_numbers = #tpu.dot_dimension_numbers<[1], [0], [0], [1], [0, 0, 1, 1], [], []>} : vector<8x8xbf16>, vector<8x8xbf16>, vector<8x8xf32> -> vector<8x8xf32>
    %372 = vector.extract_strided_slice %240 {offsets = [0, 40], sizes = [8, 8], strides = [1, 1]} : vector<8x64xf32> to vector<8x8xf32>
    %373 = arith.truncf %372 : vector<8x8xf32> to vector<8x8xbf16>
    %374 = vector.extract_strided_slice %242 {offsets = [0, 40], sizes = [8, 8], strides = [1, 1]} : vector<8x64xf32> to vector<8x8xf32>
    %375 = arith.truncf %374 : vector<8x8xf32> to vector<8x8xbf16>
    %cst_124 = arith.constant dense<0.000000e+00> : vector<8x8xf32>
    %376 = tpu.matmul %373, %375, %cst_124 {dimension_numbers = #tpu.dot_dimension_numbers<[1], [1], [0], [0], [0, 0, 1, 0], [], []>} : vector<8x8xbf16>, vector<8x8xbf16>, vector<8x8xf32> -> vector<8x8xf32>
    %cst_125 = arith.constant -1.000000e+20 : f32
    %377 = vector.shape_cast %246 : vector<1x8xi1> to vector<1x8xi1>
    %378 = vector.broadcast %377 : vector<1x8xi1> to vector<8x8xi1>
    %379 = vector.broadcast %cst_125 : f32 to vector<8x8xf32>
    %380 = arith.select %378, %376, %379 : vector<8x8xi1>, vector<8x8xf32>
    %cst_126 = arith.constant 1.250000e-01 : f32
    %381 = vector.broadcast %cst_126 : f32 to vector<8x8xf32>
    %382 = arith.mulf %380, %381 : vector<8x8xf32>
    %cst_127 = arith.constant dense<0xFF800000> : vector<8xf32>
    %383 = vector.multi_reduction <maximumf>, %382, %cst_127 [1] : vector<8x8xf32> to vector<8xf32>
    %384 = vector.shape_cast %383 : vector<8xf32> to vector<8x1xf32>
    %385 = vector.broadcast %384 : vector<8x1xf32> to vector<8x8xf32>
    %386 = arith.subf %382, %385 : vector<8x8xf32>
    %387 = math.exp %386 : vector<8x8xf32>
    %cst_128 = arith.constant dense<0.000000e+00> : vector<8xf32>
    %388 = vector.multi_reduction <add>, %387, %cst_128 [1] : vector<8x8xf32> to vector<8xf32>
    %389 = vector.shape_cast %388 : vector<8xf32> to vector<8x1xf32>
    %390 = tpu.reciprocal %389 {approx = true} : vector<8x1xf32> -> vector<8x1xf32>
    %391 = vector.broadcast %390 : vector<8x1xf32> to vector<8x8xf32>
    %392 = arith.mulf %387, %391 : vector<8x8xf32>
    %393 = arith.truncf %392 : vector<8x8xf32> to vector<8x8xbf16>
    %394 = vector.extract_strided_slice %244 {offsets = [0, 40], sizes = [8, 8], strides = [1, 1]} : vector<8x64xf32> to vector<8x8xf32>
    %395 = arith.truncf %394 : vector<8x8xf32> to vector<8x8xbf16>
    %cst_129 = arith.constant dense<0.000000e+00> : vector<8x8xf32>
    %396 = tpu.matmul %393, %395, %cst_129 {dimension_numbers = #tpu.dot_dimension_numbers<[1], [0], [0], [1], [0, 0, 1, 1], [], []>} : vector<8x8xbf16>, vector<8x8xbf16>, vector<8x8xf32> -> vector<8x8xf32>
    %397 = vector.extract_strided_slice %240 {offsets = [0, 48], sizes = [8, 8], strides = [1, 1]} : vector<8x64xf32> to vector<8x8xf32>
    %398 = arith.truncf %397 : vector<8x8xf32> to vector<8x8xbf16>
    %399 = vector.extract_strided_slice %242 {offsets = [0, 48], sizes = [8, 8], strides = [1, 1]} : vector<8x64xf32> to vector<8x8xf32>
    %400 = arith.truncf %399 : vector<8x8xf32> to vector<8x8xbf16>
    %cst_130 = arith.constant dense<0.000000e+00> : vector<8x8xf32>
    %401 = tpu.matmul %398, %400, %cst_130 {dimension_numbers = #tpu.dot_dimension_numbers<[1], [1], [0], [0], [0, 0, 1, 0], [], []>} : vector<8x8xbf16>, vector<8x8xbf16>, vector<8x8xf32> -> vector<8x8xf32>
    %cst_131 = arith.constant -1.000000e+20 : f32
    %402 = vector.shape_cast %246 : vector<1x8xi1> to vector<1x8xi1>
    %403 = vector.broadcast %402 : vector<1x8xi1> to vector<8x8xi1>
    %404 = vector.broadcast %cst_131 : f32 to vector<8x8xf32>
    %405 = arith.select %403, %401, %404 : vector<8x8xi1>, vector<8x8xf32>
    %cst_132 = arith.constant 1.250000e-01 : f32
    %406 = vector.broadcast %cst_132 : f32 to vector<8x8xf32>
    %407 = arith.mulf %405, %406 : vector<8x8xf32>
    %cst_133 = arith.constant dense<0xFF800000> : vector<8xf32>
    %408 = vector.multi_reduction <maximumf>, %407, %cst_133 [1] : vector<8x8xf32> to vector<8xf32>
    %409 = vector.shape_cast %408 : vector<8xf32> to vector<8x1xf32>
    %410 = vector.broadcast %409 : vector<8x1xf32> to vector<8x8xf32>
    %411 = arith.subf %407, %410 : vector<8x8xf32>
    %412 = math.exp %411 : vector<8x8xf32>
    %cst_134 = arith.constant dense<0.000000e+00> : vector<8xf32>
    %413 = vector.multi_reduction <add>, %412, %cst_134 [1] : vector<8x8xf32> to vector<8xf32>
    %414 = vector.shape_cast %413 : vector<8xf32> to vector<8x1xf32>
    %415 = tpu.reciprocal %414 {approx = true} : vector<8x1xf32> -> vector<8x1xf32>
    %416 = vector.broadcast %415 : vector<8x1xf32> to vector<8x8xf32>
    %417 = arith.mulf %412, %416 : vector<8x8xf32>
    %418 = arith.truncf %417 : vector<8x8xf32> to vector<8x8xbf16>
    %419 = vector.extract_strided_slice %244 {offsets = [0, 48], sizes = [8, 8], strides = [1, 1]} : vector<8x64xf32> to vector<8x8xf32>
    %420 = arith.truncf %419 : vector<8x8xf32> to vector<8x8xbf16>
    %cst_135 = arith.constant dense<0.000000e+00> : vector<8x8xf32>
    %421 = tpu.matmul %418, %420, %cst_135 {dimension_numbers = #tpu.dot_dimension_numbers<[1], [0], [0], [1], [0, 0, 1, 1], [], []>} : vector<8x8xbf16>, vector<8x8xbf16>, vector<8x8xf32> -> vector<8x8xf32>
    %422 = vector.extract_strided_slice %240 {offsets = [0, 56], sizes = [8, 8], strides = [1, 1]} : vector<8x64xf32> to vector<8x8xf32>
    %423 = arith.truncf %422 : vector<8x8xf32> to vector<8x8xbf16>
    %424 = vector.extract_strided_slice %242 {offsets = [0, 56], sizes = [8, 8], strides = [1, 1]} : vector<8x64xf32> to vector<8x8xf32>
    %425 = arith.truncf %424 : vector<8x8xf32> to vector<8x8xbf16>
    %cst_136 = arith.constant dense<0.000000e+00> : vector<8x8xf32>
    %426 = tpu.matmul %423, %425, %cst_136 {dimension_numbers = #tpu.dot_dimension_numbers<[1], [1], [0], [0], [0, 0, 1, 0], [], []>} : vector<8x8xbf16>, vector<8x8xbf16>, vector<8x8xf32> -> vector<8x8xf32>
    %cst_137 = arith.constant -1.000000e+20 : f32
    %427 = vector.shape_cast %246 : vector<1x8xi1> to vector<1x8xi1>
    %428 = vector.broadcast %427 : vector<1x8xi1> to vector<8x8xi1>
    %429 = vector.broadcast %cst_137 : f32 to vector<8x8xf32>
    %430 = arith.select %428, %426, %429 : vector<8x8xi1>, vector<8x8xf32>
    %cst_138 = arith.constant 1.250000e-01 : f32
    %431 = vector.broadcast %cst_138 : f32 to vector<8x8xf32>
    %432 = arith.mulf %430, %431 : vector<8x8xf32>
    %cst_139 = arith.constant dense<0xFF800000> : vector<8xf32>
    %433 = vector.multi_reduction <maximumf>, %432, %cst_139 [1] : vector<8x8xf32> to vector<8xf32>
    %434 = vector.shape_cast %433 : vector<8xf32> to vector<8x1xf32>
    %435 = vector.broadcast %434 : vector<8x1xf32> to vector<8x8xf32>
    %436 = arith.subf %432, %435 : vector<8x8xf32>
    %437 = math.exp %436 : vector<8x8xf32>
    %cst_140 = arith.constant dense<0.000000e+00> : vector<8xf32>
    %438 = vector.multi_reduction <add>, %437, %cst_140 [1] : vector<8x8xf32> to vector<8xf32>
    %439 = vector.shape_cast %438 : vector<8xf32> to vector<8x1xf32>
    %440 = tpu.reciprocal %439 {approx = true} : vector<8x1xf32> -> vector<8x1xf32>
    %441 = vector.broadcast %440 : vector<8x1xf32> to vector<8x8xf32>
    %442 = arith.mulf %437, %441 : vector<8x8xf32>
    %443 = arith.truncf %442 : vector<8x8xf32> to vector<8x8xbf16>
    %444 = vector.extract_strided_slice %244 {offsets = [0, 56], sizes = [8, 8], strides = [1, 1]} : vector<8x64xf32> to vector<8x8xf32>
    %445 = arith.truncf %444 : vector<8x8xf32> to vector<8x8xbf16>
    %cst_141 = arith.constant dense<0.000000e+00> : vector<8x8xf32>
    %446 = tpu.matmul %443, %445, %cst_141 {dimension_numbers = #tpu.dot_dimension_numbers<[1], [0], [0], [1], [0, 0, 1, 1], [], []>} : vector<8x8xbf16>, vector<8x8xbf16>, vector<8x8xf32> -> vector<8x8xf32>
    %447 = tpu.concatenate %271, %296, %321, %346, %371, %396, %421, %446 in 1 : vector<8x8xf32>, vector<8x8xf32>, vector<8x8xf32>, vector<8x8xf32>, vector<8x8xf32>, vector<8x8xf32>, vector<8x8xf32>, vector<8x8xf32> -> vector<8x64xf32>
    %448 = arith.truncf %447 : vector<8x64xf32> to vector<8x64xbf16>
    %cst_142 = arith.constant dense<0.000000e+00> : vector<8x64xf32>
    %449 = tpu.matmul %448, %237, %cst_142 {dimension_numbers = #tpu.dot_dimension_numbers<[1], [0], [0], [1], [0, 0, 1, 1], [], []>} : vector<8x64xbf16>, vector<64x64xbf16>, vector<8x64xf32> -> vector<8x64xf32>
    %450 = vector.broadcast %238 : vector<1x64xf32> to vector<8x64xf32>
    %451 = arith.addf %449, %450 : vector<8x64xf32>
    %452 = arith.addf %451, %231 : vector<8x64xf32>
    %c0_143 = arith.constant 0 : index
    %c0_144 = arith.constant 0 : index
    %453 = vector.load %arg17[%c0_143, %c0_144] : memref<1x64xf32, #tpu.memory_space<vmem>>, vector<1x64xf32>
    %c0_145 = arith.constant 0 : index
    %c0_146 = arith.constant 0 : index
    %454 = vector.load %arg18[%c0_145, %c0_146] : memref<1x64xf32, #tpu.memory_space<vmem>>, vector<1x64xf32>
    %cst_147 = arith.constant dense<0.000000e+00> : vector<8xf32>
    %455 = vector.multi_reduction <add>, %452, %cst_147 [1] : vector<8x64xf32> to vector<8xf32>
    %456 = vector.shape_cast %455 : vector<8xf32> to vector<8x1xf32>
    %cst_148 = arith.constant 6.400000e+01 : f32
    %457 = vector.broadcast %cst_148 : f32 to vector<8x1xf32>
    %458 = arith.divf %456, %457 : vector<8x1xf32>
    %459 = vector.broadcast %458 : vector<8x1xf32> to vector<8x64xf32>
    %460 = arith.subf %452, %459 : vector<8x64xf32>
    %461 = arith.mulf %460, %460 : vector<8x64xf32>
    %cst_149 = arith.constant dense<0.000000e+00> : vector<8xf32>
    %462 = vector.multi_reduction <add>, %461, %cst_149 [1] : vector<8x64xf32> to vector<8xf32>
    %463 = vector.shape_cast %462 : vector<8xf32> to vector<8x1xf32>
    %cst_150 = arith.constant 6.400000e+01 : f32
    %464 = vector.broadcast %cst_150 : f32 to vector<8x1xf32>
    %465 = arith.divf %463, %464 : vector<8x1xf32>
    %466 = vector.broadcast %458 : vector<8x1xf32> to vector<8x64xf32>
    %467 = arith.subf %452, %466 : vector<8x64xf32>
    %cst_151 = arith.constant 9.99999974E-6 : f32
    %468 = vector.broadcast %cst_151 : f32 to vector<8x1xf32>
    %469 = arith.addf %465, %468 : vector<8x1xf32>
    %470 = math.rsqrt %469 : vector<8x1xf32>
    %471 = vector.broadcast %470 : vector<8x1xf32> to vector<8x64xf32>
    %472 = arith.mulf %467, %471 : vector<8x64xf32>
    %473 = vector.broadcast %453 : vector<1x64xf32> to vector<8x64xf32>
    %474 = arith.mulf %472, %473 : vector<8x64xf32>
    %475 = vector.broadcast %454 : vector<1x64xf32> to vector<8x64xf32>
    %476 = arith.addf %474, %475 : vector<8x64xf32>
    %c0_152 = arith.constant 0 : index
    %c0_153 = arith.constant 0 : index
    %477 = vector.load %arg19[%c0_152, %c0_153] : memref<64x256xbf16, #tpu.memory_space<vmem>>, vector<64x256xbf16>
    %478 = arith.truncf %476 : vector<8x64xf32> to vector<8x64xbf16>
    %cst_154 = arith.constant dense<0.000000e+00> : vector<8x256xf32>
    %479 = tpu.matmul %478, %477, %cst_154 {dimension_numbers = #tpu.dot_dimension_numbers<[1], [0], [0], [1], [0, 0, 1, 1], [], []>} : vector<8x64xbf16>, vector<64x256xbf16>, vector<8x256xf32> -> vector<8x256xf32>
    %c0_155 = arith.constant 0 : index
    %c0_156 = arith.constant 0 : index
    %480 = vector.load %arg20[%c0_155, %c0_156] : memref<1x256xf32, #tpu.memory_space<vmem>>, vector<1x256xf32>
    %481 = vector.broadcast %480 : vector<1x256xf32> to vector<8x256xf32>
    %482 = arith.addf %479, %481 : vector<8x256xf32>
    %cst_157 = arith.constant 0.000000e+00 : f32
    %483 = vector.broadcast %cst_157 : f32 to vector<8x256xf32>
    %484 = arith.maximumf %482, %483 : vector<8x256xf32>
    %c0_158 = arith.constant 0 : index
    %c0_159 = arith.constant 0 : index
    %485 = vector.load %arg21[%c0_158, %c0_159] : memref<256x64xbf16, #tpu.memory_space<vmem>>, vector<256x64xbf16>
    %486 = arith.truncf %484 : vector<8x256xf32> to vector<8x256xbf16>
    %cst_160 = arith.constant dense<0.000000e+00> : vector<8x64xf32>
    %487 = tpu.matmul %486, %485, %cst_160 {dimension_numbers = #tpu.dot_dimension_numbers<[1], [0], [0], [1], [0, 0, 1, 1], [], []>} : vector<8x256xbf16>, vector<256x64xbf16>, vector<8x64xf32> -> vector<8x64xf32>
    %c0_161 = arith.constant 0 : index
    %c0_162 = arith.constant 0 : index
    %488 = vector.load %arg22[%c0_161, %c0_162] : memref<1x64xf32, #tpu.memory_space<vmem>>, vector<1x64xf32>
    %489 = vector.broadcast %488 : vector<1x64xf32> to vector<8x64xf32>
    %490 = arith.addf %487, %489 : vector<8x64xf32>
    %491 = arith.addf %490, %476 : vector<8x64xf32>
    %c0_163 = arith.constant 0 : index
    %c0_164 = arith.constant 0 : index
    %492 = vector.load %arg23[%c0_163, %c0_164] : memref<1x64xf32, #tpu.memory_space<vmem>>, vector<1x64xf32>
    %c0_165 = arith.constant 0 : index
    %c0_166 = arith.constant 0 : index
    %493 = vector.load %arg24[%c0_165, %c0_166] : memref<1x64xf32, #tpu.memory_space<vmem>>, vector<1x64xf32>
    %cst_167 = arith.constant dense<0.000000e+00> : vector<8xf32>
    %494 = vector.multi_reduction <add>, %491, %cst_167 [1] : vector<8x64xf32> to vector<8xf32>
    %495 = vector.shape_cast %494 : vector<8xf32> to vector<8x1xf32>
    %cst_168 = arith.constant 6.400000e+01 : f32
    %496 = vector.broadcast %cst_168 : f32 to vector<8x1xf32>
    %497 = arith.divf %495, %496 : vector<8x1xf32>
    %498 = vector.broadcast %497 : vector<8x1xf32> to vector<8x64xf32>
    %499 = arith.subf %491, %498 : vector<8x64xf32>
    %500 = arith.mulf %499, %499 : vector<8x64xf32>
    %cst_169 = arith.constant dense<0.000000e+00> : vector<8xf32>
    %501 = vector.multi_reduction <add>, %500, %cst_169 [1] : vector<8x64xf32> to vector<8xf32>
    %502 = vector.shape_cast %501 : vector<8xf32> to vector<8x1xf32>
    %cst_170 = arith.constant 6.400000e+01 : f32
    %503 = vector.broadcast %cst_170 : f32 to vector<8x1xf32>
    %504 = arith.divf %502, %503 : vector<8x1xf32>
    %505 = vector.broadcast %497 : vector<8x1xf32> to vector<8x64xf32>
    %506 = arith.subf %491, %505 : vector<8x64xf32>
    %cst_171 = arith.constant 9.99999974E-6 : f32
    %507 = vector.broadcast %cst_171 : f32 to vector<8x1xf32>
    %508 = arith.addf %504, %507 : vector<8x1xf32>
    %509 = math.rsqrt %508 : vector<8x1xf32>
    %510 = vector.broadcast %509 : vector<8x1xf32> to vector<8x64xf32>
    %511 = arith.mulf %506, %510 : vector<8x64xf32>
    %512 = vector.broadcast %492 : vector<1x64xf32> to vector<8x64xf32>
    %513 = arith.mulf %511, %512 : vector<8x64xf32>
    %514 = vector.broadcast %493 : vector<1x64xf32> to vector<8x64xf32>
    %515 = arith.addf %513, %514 : vector<8x64xf32>
    %c0_172 = arith.constant 0 : index
    %c0_173 = arith.constant 0 : index
    %c0_174 = arith.constant 0 : index
    %516 = vector.load %arg25[%c0_172, %c0_173, %c0_174] : memref<1x8x64xf32, #tpu.memory_space<vmem>>, vector<1x8x64xf32>
    %517 = vector.shape_cast %516 : vector<1x8x64xf32> to vector<8x64xf32>
    %518 = vector.shape_cast %515 : vector<8x64xf32> to vector<1x8x64xf32>
    tpu.vector_store %arg25[%c0_172, %c0_173, %c0_174], %518 {strides = array<i32>} : memref<1x8x64xf32, #tpu.memory_space<vmem>>, vector<1x8x64xf32>,
    return
  }
  func.func @transform_0(%arg0: i32) -> (i32, i32, i32) {
    %c0_i32 = arith.constant 0 : i32
    %c0_i32_0 = arith.constant 0 : i32
    %c0_i32_1 = arith.constant 0 : i32
    return %arg0, %c0_i32, %c0_i32_0 : i32, i32, i32
  }
  func.func @transform_1(%arg0: i32) -> (i32, i32, i32) {
    %c0_i32 = arith.constant 0 : i32
    %c0_i32_0 = arith.constant 0 : i32
    %c0_i32_1 = arith.constant 0 : i32
    return %arg0, %c0_i32, %c0_i32_0 : i32, i32, i32
  }
  func.func @transform_2(%arg0: i32) -> (i32, i32) {
    %c0_i32 = arith.constant 0 : i32
    %c0_i32_0 = arith.constant 0 : i32
    %c0_i32_1 = arith.constant 0 : i32
    return %c0_i32, %c0_i32_0 : i32, i32
  }
  func.func @transform_3(%arg0: i32) -> (i32, i32, i32) {
    %c0_i32 = arith.constant 0 : i32
    %c0_i32_0 = arith.constant 0 : i32
    %c0_i32_1 = arith.constant 0 : i32
    return %arg0, %c0_i32, %c0_i32_0 : i32, i32, i32
  }
  func.func @transform_4(%arg0: i32) -> (i32, i32) {
    %c0_i32 = arith.constant 0 : i32
    %c0_i32_0 = arith.constant 0 : i32
    %c0_i32_1 = arith.constant 0 : i32
    return %c0_i32, %c0_i32_0 : i32, i32
  }
  func.func @transform_5(%arg0: i32) -> (i32, i32) {
    %c0_i32 = arith.constant 0 : i32
    %c0_i32_0 = arith.constant 0 : i32
    %c0_i32_1 = arith.constant 0 : i32
    return %c0_i32, %c0_i32_0 : i32, i32
  }
  func.func @transform_6(%arg0: i32) -> (i32, i32) {
    %c0_i32 = arith.constant 0 : i32
    %c0_i32_0 = arith.constant 0 : i32
    %c0_i32_1 = arith.constant 0 : i32
    return %c0_i32, %c0_i32_0 : i32, i32
  }
  func.func @transform_7(%arg0: i32) -> (i32, i32) {
    %c0_i32 = arith.constant 0 : i32
    %c0_i32_0 = arith.constant 0 : i32
    %c0_i32_1 = arith.constant 0 : i32
    return %c0_i32, %c0_i32_0 : i32, i32
  }
  func.func @transform_8(%arg0: i32) -> (i32, i32) {
    %c0_i32 = arith.constant 0 : i32
    %c0_i32_0 = arith.constant 0 : i32
    %c0_i32_1 = arith.constant 0 : i32
    return %c0_i32, %c0_i32_0 : i32, i32
  }
  func.func @transform_9(%arg0: i32) -> (i32, i32) {
    %c0_i32 = arith.constant 0 : i32
    %c0_i32_0 = arith.constant 0 : i32
    %c0_i32_1 = arith.constant 0 : i32
    return %c0_i32, %c0_i32_0 : i32, i32
  }
  func.func @transform_10(%arg0: i32) -> (i32, i32) {
    %c0_i32 = arith.constant 0 : i32
    %c0_i32_0 = arith.constant 0 : i32
    %c0_i32_1 = arith.constant 0 : i32
    return %c0_i32, %c0_i32_0 : i32, i32
  }
  func.func @transform_11(%arg0: i32) -> (i32, i32) {
    %c0_i32 = arith.constant 0 : i32
    %c0_i32_0 = arith.constant 0 : i32
    %c0_i32_1 = arith.constant 0 : i32
    return %c0_i32, %c0_i32_0 : i32, i32
  }
  func.func @transform_12(%arg0: i32) -> (i32, i32) {
    %c0_i32 = arith.constant 0 : i32
    %c0_i32_0 = arith.constant 0 : i32
    %c0_i32_1 = arith.constant 0 : i32
    return %c0_i32, %c0_i32_0 : i32, i32
  }
  func.func @transform_13(%arg0: i32) -> (i32, i32) {
    %c0_i32 = arith.constant 0 : i32
    %c0_i32_0 = arith.constant 0 : i32
    %c0_i32_1 = arith.constant 0 : i32
    return %c0_i32, %c0_i32_0 : i32, i32
  }
  func.func @transform_14(%arg0: i32) -> (i32, i32) {
    %c0_i32 = arith.constant 0 : i32
    %c0_i32_0 = arith.constant 0 : i32
    %c0_i32_1 = arith.constant 0 : i32
    return %c0_i32, %c0_i32_0 : i32, i32
  }
  func.func @transform_15(%arg0: i32) -> (i32, i32) {
    %c0_i32 = arith.constant 0 : i32
    %c0_i32_0 = arith.constant 0 : i32
    %c0_i32_1 = arith.constant 0 : i32
    return %c0_i32, %c0_i32_0 : i32, i32
  }
  func.func @transform_16(%arg0: i32) -> (i32, i32) {
    %c0_i32 = arith.constant 0 : i32
    %c0_i32_0 = arith.constant 0 : i32
    %c0_i32_1 = arith.constant 0 : i32
    return %c0_i32, %c0_i32_0 : i32, i32
  }
  func.func @transform_17(%arg0: i32) -> (i32, i32) {
    %c0_i32 = arith.constant 0 : i32
    %c0_i32_0 = arith.constant 0 : i32
    %c0_i32_1 = arith.constant 0 : i32
    return %c0_i32, %c0_i32_0 : i32, i32
  }
  func.func @transform_18(%arg0: i32) -> (i32, i32) {
    %c0_i32 = arith.constant 0 : i32
    %c0_i32_0 = arith.constant 0 : i32
    %c0_i32_1 = arith.constant 0 : i32
    return %c0_i32, %c0_i32_0 : i32, i32
  }
  func.func @transform_19(%arg0: i32) -> (i32, i32) {
    %c0_i32 = arith.constant 0 : i32
    %c0_i32_0 = arith.constant 0 : i32
    %c0_i32_1 = arith.constant 0 : i32
    return %c0_i32, %c0_i32_0 : i32, i32
  }
  func.func @transform_20(%arg0: i32) -> (i32, i32) {
    %c0_i32 = arith.constant 0 : i32
    %c0_i32_0 = arith.constant 0 : i32
    %c0_i32_1 = arith.constant 0 : i32
    return %c0_i32, %c0_i32_0 : i32, i32
  }
  func.func @transform_21(%arg0: i32) -> (i32, i32) {
    %c0_i32 = arith.constant 0 : i32
    %c0_i32_0 = arith.constant 0 : i32
    %c0_i32_1 = arith.constant 0 : i32
    return %c0_i32, %c0_i32_0 : i32, i32
  }
  func.func @transform_22(%arg0: i32) -> (i32, i32) {
    %c0_i32 = arith.constant 0 : i32
    %c0_i32_0 = arith.constant 0 : i32
    %c0_i32_1 = arith.constant 0 : i32
    return %c0_i32, %c0_i32_0 : i32, i32
  }
  func.func @transform_23(%arg0: i32) -> (i32, i32) {
    %c0_i32 = arith.constant 0 : i32
    %c0_i32_0 = arith.constant 0 : i32
    %c0_i32_1 = arith.constant 0 : i32
    return %c0_i32, %c0_i32_0 : i32, i32
  }
  func.func @transform_24(%arg0: i32) -> (i32, i32, i32) {
    %c0_i32 = arith.constant 0 : i32
    %c0_i32_0 = arith.constant 0 : i32
    %c0_i32_1 = arith.constant 0 : i32
    return %arg0, %c0_i32, %c0_i32_0 : i32, i32, i32
  }
}

</mosaic_0001>

<bundles_post_ra>
// kernel: _lambda_.9
= control target key start
LH: loop header
LB: loop body
LE: loop exit
PB: predicated region body
PF: predicated region fallthrough
CT: control target
= control target key end

     0   :  { %v137_v0 = vmov 0.0   ;;  %vm138_vm0 = vmmov 0   ;;  %vm57_vm1 = vcmask 523264   ;;  %s186_s1 = inlined_call_operand.vmem [shape: bf16[64,128], index: 1, kind: input, shape index: {}]   ;;  %s187_s0 = inlined_call_operand.vmem [shape: f32[16,64], index: 0, kind: input, shape index: {}]   ;;  %s188_s2 = inlined_call_operand.vmem [shape: f32[1,128], index: 2, kind: input, shape index: {}]   ;;  %s189_s3 = inlined_call_operand.vmem [shape: f32[16,128], index: 3, kind: output, shape index: {}]  }
   0x1   :  { %119 = vmatprep.subr.bf16.mxu0 %v137_v0  ;;  %v133_v1 = vld [vmem:[%s186_s1] sm:$0xff]   ;;  %127 = vmatprep.mubr.msk.bf16.mxu0 %vm138_vm0, %v137_v0  ;;  %v134_v2 = vld [vmem:[%s186_s1 + $0x8] sm:$0xff]   ;;  %v135_v3 = vld [vmem:[%s186_s1 + $0x10] sm:$0xff]  }
   0x2   :  { %120 = vmatpush3.bf16.msra.mxu0 %v133_v1  ;;  %v136_v4 = vld [vmem:[%s186_s1 + $0x18] sm:$0xff]   ;;  %v15_v5 = vld [vmem:[%s187_s0] sm:$0xff]  ;;  %v16_v6 = vld [vmem:[%s187_s0 + $0x8] sm:$0xff] }
   0x3   :  { %121 = vmatprep.subr.bf16.mxu0 %v137_v0  ;;  %v25_v7 = vpack.c.bf16 %v16_v6, %v15_v5  ;;  %v108_v8 = vld [vmem:[%s188_s2] ss:$0 sm:$0xff] }
   0x6   :  { %122 = vmatpush3.bf16.msra.mxu0 %v134_v2 }
   0x7   :  { %123 = vmatprep.subr.bf16.mxu0 %v137_v0 }
   0xa   :  { %124 = vmatpush3.bf16.msra.mxu0 %v135_v3 }
   0xb   :  { %125 = vmatprep.subr.bf16.mxu0 %v137_v0 }
   0xe   :  { %126 = vmatpush3.bf16.msra.mxu0 %v136_v4 }
  0x11   :  { %128 = vmatmul.mubr.msk.bf16.vlgmr.msra.gmra.mrb[0].mxu0 %vm57_vm1, %v25_v7 }
  0xe4   :  { %v95_v9 = vpop.f32.mrb[0].mxu0 }
  0xe5   :  { %v96_v10 = vadd.f32 %v108_v8, %v95_v9  ;;  %v129_v11 = vpop.f32.mrb[1].mxu0 }
  0xe6   :  { %v98_v12 = vpop.f32.mrb[2].mxu0 }
  0xe7   :  { %102 = vst [vmem:[%s189_s3] sm:$0xff] %v96_v10  ;;  %v99_v13 = vadd.f32 %v108_v8, %v98_v12  ;;  %v130_v14 = vpop.f32.mrb[3].mxu0 }
  0xe9   :  { %103 = vst [vmem:[%s189_s3 + $0x8] sm:$0xff] %v99_v13 }

// kernel: _lambda_.5
= control target key start
LH: loop header
LB: loop body
LE: loop exit
PB: predicated region body
PF: predicated region fallthrough
CT: control target
= control target key end

     0   :  { %s2803_s24 = smov 0   ;;  %s3215_s0 = inlined_call_operand.vmem [shape: f32[2,8,64], index: 0, kind: input, shape index: {}, may-alias: {0,1,2}]   ;;  %s3216_s1 = inlined_call_operand.vmem [shape: f32[2,8,64], index: 1, kind: input, shape index: {}, may-alias: {0,1,2}]   ;;  %s3217_s2 = inlined_call_operand.vmem [shape: f32[2,8,64], index: 2, kind: input, shape index: {}, may-alias: {0,1,2}]   ;;  %s3218_s3 = inlined_call_operand.vmem [shape: s32[2,1,8], index: 3, kind: input, shape index: {}]   ;;  %s3219_s4 = inlined_call_operand.vmem [shape: bf16[64,64], index: 4, kind: input, shape index: {}]   ;;  %s3220_s5 = inlined_call_operand.vmem [shape: bf16[64,64], index: 5, kind: input, shape index: {}]   ;;  %s3221_s6 = inlined_call_operand.vmem [shape: bf16[64,64], index: 6, kind: input, shape index: {}]   ;;  %s3222_s7 = inlined_call_operand.vmem [shape: bf16[64,64], index: 7, kind: input, shape index: {}]   ;;  %s3223_s8 = inlined_call_operand.vmem [shape: f32[1,64], index: 8, kind: input, shape index: {}, may-alias: {8,10,14,16}]   ;;  %s3224_s9 = inlined_call_operand.vmem [shape: f32[1,64], index: 9, kind: input, shape index: {}, may-alias: {9,15}]   ;;  %s3225_s10 = inlined_call_operand.vmem [shape: f32[1,64], index: 10, kind: input, shape index: {}, may-alias: {8,10,14,16}]   ;;  %s3226_s11 = inlined_call_operand.vmem [shape: bf16[64,256], index: 11, kind: input, shape index: {}]   ;;  %s3227_s12 = inlined_call_operand.vmem [shape: f32[1,256], index: 12, kind: input, shape index: {}]   ;;  %s3228_s13 = inlined_call_operand.vmem [shape: bf16[256,64], index: 13, kind: input, shape index: {}]   ;;  %s3229_s14 = inlined_call_operand.vmem [shape: f32[1,64], index: 14, kind: input, shape index: {}, may-alias: {8,10,14,16}]   ;;  %s3230_s15 = inlined_call_operand.vmem [shape: f32[1,64], index: 15, kind: input, shape index: {}, may-alias: {9,15}]   ;;  %s3231_s16 = inlined_call_operand.vmem [shape: f32[1,64], index: 16, kind: input, shape index: {}, may-alias: {8,10,14,16}]   ;;  %s3232_s17 = inlined_call_operand.vmem [shape: f32[2,8,64], index: 17, kind: output, shape index: {}]  }
   0x1   :  { %3233 = sst [smem:[#allocation2_spill]] %s3215_s0 }
   0x2   :  { %3234 = sst [smem:[#allocation3_spill]] %s3216_s1 }
   0x3 LB: > { %s2287_s25 = sadd.s32 4294967295, %s2694_s24   ;;  %p2291_p0 = scmp.ge.s32.totalorder %s2694_s24, 1  ;;  %s2694_s24 = sphi %s2803_s24, %s27_s24  }
   0x4   : > { %p512_p1 = scmp.lt.s32.totalorder %s2694_s24, 3 }
   0x6   : > { %p513_p2 = pnand %p2291_p0, %p512_p1 }
   0x7   : > { %v2608_v0 = vld [vmem:[%s3219_s4] sm:$0xff] (!%p513_p2)   ;;  %v2696_v1 = vmov (!%p513_p2), 0.0   ;;  %v2609_v2 = vld [vmem:[%s3219_s4 + $0x8] sm:$0xff] (!%p513_p2)   ;;  %vm2697_vm0 = vmmov (!%p513_p2), 0   ;;  %p573_p3 = scmp.lt.s32.totalorder (!%p513_p2), %s2287_s25, 1  ;;  %v2610_v3 = vld [vmem:[%s3219_s4 + $0x10] sm:$0xff] (!%p513_p2)   ;;  %v886_v57 = vlaneseq (!%p513_p2) }
   0x8   : > { %516 = sbr.rel (%p513_p2) target bundleno = 2607 (0xa2f), region = 88  ;;  %2439 = vmatprep.subr.bf16.mxu1 (!%p513_p2), %v2696_v1  ;;  %2463 = vmatprep.subr.bf16.mxu0 (!%p513_p2), %v2696_v1  ;;  %v2611_v4 = vld [vmem:[%s3219_s4 + $0x18] sm:$0xff] (!%p513_p2)   ;;  %v2612_v6 = vld [vmem:[%s3220_s5] sm:$0xff] (!%p513_p2)   ;;  %vm655_vm1 = vcmask (!%p513_p2), 523264   ;;  %v2613_v8 = vld [vmem:[%s3220_s5 + $0x8] sm:$0xff] (!%p513_p2)   ;;  %s3235_s1 = sld [smem:[#allocation3_spill]] (!%p513_p2) }
   0x9   : > { %2440 = vmatpush3.bf16.msra.mxu1 (!%p513_p2), %v2608_v0  ;;  %2447 = vmatprep.mubr.msk.bf16.mxu1 (!%p513_p2), %vm2697_vm0, %v2696_v1  ;;  %v2614_v9 = vld [vmem:[%s3220_s5 + $0x10] sm:$0xff] (!%p513_p2)   ;;  %v2615_v10 = vld [vmem:[%s3220_s5 + $0x18] sm:$0xff] (!%p513_p2)   ;;  %v2616_v13 = vld [vmem:[%s3221_s6] sm:$0xff] (!%p513_p2)   ;;  %vm838_vm2 = vcmask (!%p513_p2), 64512   ;;  %s2698_s23 = smov (!%p513_p2), 112   ;;  %s2699_s26 = smov (!%p513_p2), 120  }
   0xa   : > { %2441 = vmatprep.subr.bf16.mxu1 (!%p513_p2), %v2696_v1  ;;  %2471 = vmatprep.mubr.msk.bf16.mxu0 (!%p513_p2), %vm2697_vm0, %v2696_v1  ;;  %v2617_v14 = vld [vmem:[%s3221_s6 + $0x8] sm:$0xff] (!%p513_p2)   ;;  %v2618_v15 = vld [vmem:[%s3221_s6 + $0x10] sm:$0xff] (!%p513_p2)   ;;  %v2619_v16 = vld [vmem:[%s3221_s6 + $0x18] sm:$0xff] (!%p513_p2)   ;;  %s2700_s27 = smov (!%p513_p2), 104   ;;  %s2701_s28 = smov (!%p513_p2), 96   ;;  %vm909_vm3 = vcmask (!%p513_p2), 1043456  }
   0xb   : > { %2464 = vmatpush3.bf16.msra.mxu0 (!%p513_p2), %v2616_v13  ;;  %s2702_s29 = smov (!%p513_p2), 88   ;;  %s2703_s0 = smov (!%p513_p2), 80   ;;  %v2958_v59 = vshrl.u32 (!%p513_p2), %v886_v57, 7  ;;  %v2705_v61 = vmov (!%p513_p2), 0   ;;  %vm1769_vm6 = vcmask (!%p513_p2), 130048   ;;  %vm1771_vm7 = vcmask (!%p513_p2), 195584  }
   0xc   : > { %2465 = vmatprep.subr.bf16.mxu0 (!%p513_p2), %v2696_v1  ;;  %s2704_s30 = smov (!%p513_p2), 72   ;;  %s2707_s21 = smov (!%p513_p2), 16   ;;  %vm1773_vm8 = vcmask (!%p513_p2), 261120   ;;  %vm1775_vm9 = vcmask (!%p513_p2), 326656   ;;  %vm1777_vm10 = vcmask (!%p513_p2), 392192   ;;  %vm1779_vm11 = vcmask (!%p513_p2), 457728  }
   0xd   : > { %2442 = vmatpush3.bf16.msra.mxu1 (!%p513_p2), %v2609_v2  ;;  %v888_v60 = vsub.s32 (!%p513_p2), 0, %v2958_v59  ;;  %s2708_s22 = smov (!%p513_p2), 24   ;;  %s2710_s19 = smov (!%p513_p2), 40  }
   0xe   : > { %2443 = vmatprep.subr.bf16.mxu1 (!%p513_p2), %v2696_v1 }
   0xf   : > { %s3238_s25 = smov (!%p573_p3, %s2287_s25), 1  ;;  %2466 = vmatpush3.bf16.msra.mxu0 %v2617_v14 }
  0x10   : > { %s2830_s18 = sshll.u32 %s3238_s25, 3  ;;  %2467 = vmatprep.subr.bf16.mxu0 %v2696_v1 }
  0x11   : > { %s584_s20 = scalar_lea.vmem %s3217_s2, %s2830_s18  ;;  %2444 = vmatpush3.bf16.msra.mxu1 %v2610_v3 }
  0x12   : > { %v2840_v5 = vld [vmem:[%s584_s20] sm:$0xff]  ;;  %2445 = vmatprep.subr.bf16.mxu1 %v2696_v1  ;;  %s580_s20 = scalar_lea.vmem %s3235_s1, %s2830_s18  ;;  %s3236_s1 = sld [smem:[#allocation2_spill]] }
  0x13   : > { %v630_v7 = vpack.c.bf16 %v2840_v5, %v2840_v5  ;;  %v594_v11 = vld [vmem:[%s580_s20] sm:$0xff]  ;;  %2468 = vmatpush3.bf16.msra.mxu0 %v2618_v15 }
  0x14   : > { %v699_v12 = vpack.c.bf16 %v594_v11, %v594_v11  ;;  %2469 = vmatprep.subr.bf16.mxu0 %v2696_v1 }
  0x15   : > { %2446 = vmatpush3.bf16.msra.mxu1 %v2611_v4 }
  0x16   : > { %2451 = vmatprep.subr.bf16.mxu1 %v2696_v1 }
  0x17   : > { %2470 = vmatpush3.bf16.msra.mxu0 %v2619_v16 }
  0x18   : > { %2448 = vmatmul.mubr.msk.bf16.vlgmr.msra.gmra.mrb[0].mxu1 %vm655_vm1, %v630_v7  ;;  %s576_s20 = scalar_lea.vmem %s3236_s1, %s2830_s18  ;;  %2487 = vmatprep.subr.bf16.mxu0 %v2696_v1 }
  0x19   : > { %2452 = vmatpush3.bf16.msra.mxu1 %v2612_v6  ;;  %2459 = vmatprep.mubr.msk.bf16.mxu1 %vm2697_vm0, %v2696_v1  ;;  %v595_v17 = vld [vmem:[%s576_s20] sm:$0xff]  ;;  %s587_s20 = scalar_lea.vmem %s3218_s3, %s3238_s25  ;;  %s2706_s25 = smov 8  }
  0x1a   : > { %2453 = vmatprep.subr.bf16.mxu1 %v2696_v1  ;;  %v767_v18 = vpack.c.bf16 %v595_v17, %v595_v17  ;;  %v596_v58 = vld [vmem:[%s587_s20] sm:$0x1] }
  0x1b   : > { %vm835_vm4 = vcmp.ne.s32.totalorder %v596_v58, 0 }
  0x1c   : > { %2472 = vmatmul.mubr.msk.bf16.vlgmr.msra.gmra.mrb[0].mxu0 %vm655_vm1, %v767_v18  ;;  %v885_v62 = vsel %vm835_vm4, 1, %v2705_v61 }
  0x1d   : > { %2454 = vmatpush3.bf16.msra.mxu1 %v2613_v8  ;;  %2489 = vmatprep.mubr.msk.bf16.mxu0 %vm2697_vm0, %v2696_v1  ;;  %v2964_v63 = vrot.slane %v885_v62, %v888_v60 }
  0x1e   : > { %2455 = vmatprep.subr.bf16.mxu1 %v2696_v1 }
  0x1f   : > { %vm890_vm5 = vcmp.eq.s32.totalorder %v2964_v63, 1 }
  0x21   : > { %2456 = vmatpush3.bf16.msra.mxu1 %v2614_v9 }
  0x22   : > { %2457 = vmatprep.subr.bf16.mxu1 %v2696_v1 }
  0x25   : > { %2458 = vmatpush3.bf16.msra.mxu1 %v2615_v10 }
  0x26   : > { %2475 = vmatprep.subr.bf16.mxu1 %v2696_v1 }
  0x28   : > { %2460 = vmatmul.mubr.msk.bf16.vlgmr.msra.gmra.mrb[4].mxu1 %vm655_vm1, %v699_v12 }
  0x29   : > { %2477 = vmatprep.mubr.msk.bf16.mxu1 %vm2697_vm0, %v2696_v1 }
  0xeb   : > { %v693_v19 = vpop.f32.mrb[0].mxu1 }
  0xec   : > { %v2449_v20 = vpop.f32.mrb[1].mxu1  ;;  %v836_v29 = vpack.c.bf16 %v693_v19, %v693_v19 }
  0xed   : > { %v696_v21 = vpop.f32.mrb[2].mxu1 }
  0xee   : > { %v2450_v22 = vpop.f32.mrb[3].mxu1 }
  0xef   : > { %v829_v35 = vpop.f32.mrb[0].mxu0 }
  0xf0   : > { %v2921_v36 = vpack.c.bf16 %v829_v35, %v829_v35  ;;  %v2473_v37 = vpop.f32.mrb[1].mxu0 }
  0xf1   : > { %v832_v38 = vpop.f32.mrb[2].mxu0 }
  0xf2   : > { %v911_v39 = vsel %vm909_vm3, %v2921_v36, 0  ;;  %v2474_v41 = vpop.f32.mrb[3].mxu0 }
  0xfb   : > { %v761_v23 = vpop.f32.mrb[4].mxu1 }
  0xfc   : > { %v837_v24 = vpack.c.bf16 %v761_v23, %v761_v23  ;;  %v2461_v25 = vpop.f32.mrb[5].mxu1 }
  0xfd   : > { %v764_v26 = vpop.f32.mrb[6].mxu1 }
  0xfe   : > { %1070 = vrot.lane.b32.xlu1 %v837_v24, %s2698_s23  ;;  %957 = vrot.lane.b32.xlu0 %v837_v24, %s2699_s26  ;;  %v2462_v27 = vpop.f32.mrb[7].mxu1  ;;  %v843_v28 = vsel %vm838_vm2, %v837_v24, 0 }
  0xff   : > { %2476 = vmatpush3.bf16.xpose.msra.mxu1 %v843_v28 }
 0x100   : > { %2481 = vmatprep.subr.bf16.mxu1 %v2696_v1 }
 0x102   : > { %1068 = vrot.lane.b32.xlu1 %v836_v29, %s2698_s23  ;;  %954 = vrot.lane.b32.xlu0 %v836_v29, %s2699_s26 }
 0x106   : > { %1180 = vrot.lane.b32.xlu1 %v836_v29, %s2700_s27  ;;  %1182 = vrot.lane.b32.xlu0 %v837_v24, %s2700_s27 }
 0x107   : > { %2478 = vmatmul.mubr.msk.bf16.vlgmr.msra.gmra.mrb[8].mxu1 %vm838_vm2, %v836_v29 }
 0x108   : > { %2483 = vmatprep.mubr.msk.bf16.mxu1 %vm2697_vm0, %v2696_v1  ;;  %2482 = vmatpush3.bf16.msra.mxu1 %v911_v39 }
 0x109   : > { %2493 = vmatprep.subr.bf16.mxu1 %v2696_v1 }
 0x10a   : > { %1292 = vrot.lane.b32.xlu1 %v836_v29, %s2701_s28  ;;  %1294 = vrot.lane.b32.xlu0 %v837_v24, %s2701_s28 }
 0x10e   : > { %1404 = vrot.lane.b32.xlu1 %v836_v29, %s2702_s29  ;;  %1406 = vrot.lane.b32.xlu0 %v837_v24, %s2702_s29 }
 0x112   : > { %1516 = vrot.lane.b32.xlu1 %v836_v29, %s2703_s0  ;;  %1518 = vrot.lane.b32.xlu0 %v837_v24, %s2703_s0 }
 0x116   : > { %1628 = vrot.lane.b32.xlu1 %v836_v29, %s2704_s30  ;;  %1630 = vrot.lane.b32.xlu0 %v837_v24, %s2704_s30 }
 0x170   : > { %v958_v30 = vpop.permute.xlu0 %957  ;;  %v1071_v32 = vpop.permute.xlu1 %1070 }
 0x171   : > { %v963_v31 = vsel %vm838_vm2, %v958_v30, 0  ;;  %v1076_v34 = vsel %vm838_vm2, %v1071_v32, 0 }
 0x172   : > { %2488 = vmatpush3.bf16.xpose.msra.mxu0 %v963_v31 }
 0x173   : > { %2499 = vmatprep.subr.bf16.mxu0 %v2696_v1 }
 0x174   : > { %v955_v33 = vpop.permute.xlu0 %954  ;;  %v1069_v42 = vpop.permute.xlu1 %1068 }
 0x178   : > { %v1183_v40 = vpop.permute.xlu0 %1182  ;;  %v1181_v45 = vpop.permute.xlu1 %1180 }
 0x179   : > { %2490 = vmatmul.mubr.msk.bf16.vlgmr.msra.gmra.mrb[4].mxu0 %vm838_vm2, %v955_v33  ;;  %v1188_v43 = vsel %vm838_vm2, %v1183_v40, 0 }
 0x17a   : > { %2500 = vmatpush3.bf16.xpose.msra.mxu0 %v1076_v34  ;;  %2501 = vmatprep.mubr.msk.bf16.mxu0 %vm2697_vm0, %v2696_v1 }
 0x17b   : > { %2511 = vmatprep.subr.bf16.mxu0 %v2696_v1 }
 0x17c   : > { %v1295_v44 = vpop.permute.xlu0 %1294  ;;  %v1293_v48 = vpop.permute.xlu1 %1292 }
 0x17d   : > { %v1300_v46 = vsel %vm838_vm2, %v1295_v44, 0 }
 0x180   : > { %v1407_v47 = vpop.permute.xlu0 %1406  ;;  %v1405_v51 = vpop.permute.xlu1 %1404 }
 0x181   : > { %2502 = vmatmul.mubr.msk.bf16.vlgmr.msra.gmra.mrb[8].mxu0 %vm838_vm2, %v1069_v42  ;;  %v1412_v49 = vsel %vm838_vm2, %v1407_v47, 0 }
 0x182   : > { %2512 = vmatpush3.bf16.xpose.msra.mxu0 %v1188_v43  ;;  %2513 = vmatprep.mubr.msk.bf16.mxu0 %vm2697_vm0, %v2696_v1 }
 0x183   : > { %2523 = vmatprep.subr.bf16.mxu0 %v2696_v1 }
 0x184   : > { %v1519_v50 = vpop.permute.xlu0 %1518  ;;  %v1517_v54 = vpop.permute.xlu1 %1516 }
 0x185   : > { %v1524_v52 = vsel %vm838_vm2, %v1519_v50, 0 }
 0x188   : > { %v1631_v53 = vpop.permute.xlu0 %1630  ;;  %v1629_v56 = vpop.permute.xlu1 %1628 }
 0x189   : > { %2514 = vmatmul.mubr.msk.bf16.vlgmr.msra.gmra.mrb[12].mxu0 %vm838_vm2, %v1181_v45  ;;  %v1636_v55 = vsel %vm838_vm2, %v1631_v53, 0 }
 0x18a   : > { %2524 = vmatpush3.bf16.xpose.msra.mxu0 %v1300_v46  ;;  %2525 = vmatprep.mubr.msk.bf16.mxu0 %vm2697_vm0, %v2696_v1 }
 0x18b   : > { %2535 = vmatprep.subr.bf16.mxu0 %v2696_v1 }
 0x191   : > { %2526 = vmatmul.mubr.msk.bf16.vlgmr.msra.gmra.mrb[16].mxu0 %vm838_vm2, %v1293_v48 }
 0x192   : > { %2536 = vmatpush3.bf16.xpose.msra.mxu0 %v1412_v49  ;;  %2537 = vmatprep.mubr.msk.bf16.mxu0 %vm2697_vm0, %v2696_v1 }
 0x193   : > { %2547 = vmatprep.subr.bf16.mxu0 %v2696_v1 }
 0x199   : > { %2538 = vmatmul.mubr.msk.bf16.vlgmr.msra.gmra.mrb[20].mxu0 %vm838_vm2, %v1405_v51 }
 0x19a   : > { %2548 = vmatpush3.bf16.xpose.msra.mxu0 %v1524_v52  ;;  %2549 = vmatprep.mubr.msk.bf16.mxu0 %vm2697_vm0, %v2696_v1 }
 0x19b   : > { %2559 = vmatprep.subr.bf16.mxu0 %v2696_v1 }
 0x1a1   : > { %2550 = vmatmul.mubr.msk.bf16.vlgmr.msra.gmra.mrb[24].mxu0 %vm838_vm2, %v1517_v54 }
 0x1a2   : > { %2560 = vmatpush3.bf16.xpose.msra.mxu0 %v1636_v55  ;;  %2561 = vmatprep.mubr.msk.bf16.mxu0 %vm2697_vm0, %v2696_v1 }
 0x1a3   : > { %2571 = vmatprep.subr.bf16.mxu0 %v2696_v1 }
 0x1a9   : > { %2562 = vmatmul.mubr.msk.bf16.vlgmr.msra.gmra.mrb[28].mxu0 %vm838_vm2, %v1629_v56 }
 0x1aa   : > { %2579 = vmatprep.mubr.msk.bf16.mxu0 %vm2697_vm0, %v2696_v1 }
 0x1da   : > { %v879_v0 = vpop.f32.mrb[8].mxu1 }
 0x1db   : > { %v891_v2 = vsel %vm890_vm5, %v879_v0, -1e+20  ;;  %v2479_v3 = vpop.f32.mrb[9].mxu1 }
 0x1dc   : > { %v892_v4 = vmul.f32 0.125, %v891_v2  ;;  %v882_v6 = vpop.f32.mrb[10].mxu1 }
 0x1dd   : > { %v2480_v7 = vpop.f32.mrb[11].mxu1 }
 0x1de   : > { %v893_v8 = vsel %vm838_vm2, %v892_v4, -inf }
 0x1df   : > { %894 = vmax.xlane.f32.xlu0 %v893_v8 }
 0x24c   : > { %v999_v9 = vpop.f32.mrb[4].mxu0 }
 0x24d   : > { %v1005_v10 = vsel %vm890_vm5, %v999_v9, -1e+20  ;;  %v2491_v11 = vpop.f32.mrb[5].mxu0 }
 0x24e   : > { %v2972_v12 = vmul.f32 0.125, %v1005_v10  ;;  %v1002_v13 = vpop.f32.mrb[6].mxu0 }
 0x24f   : > { %v2492_v14 = vpop.f32.mrb[7].mxu0 }
 0x250   : > { %v1007_v15 = vsel %vm838_vm2, %v2972_v12, -inf }
 0x251   : > { %1008 = vmax.xlane.f32.xlu1 %v1007_v15 }
 0x254   : > { %v1112_v16 = vpop.f32.mrb[8].mxu0 }
 0x255   : > { %v1118_v17 = vsel %vm890_vm5, %v1112_v16, -1e+20  ;;  %v2503_v18 = vpop.f32.mrb[9].mxu0 }
 0x256   : > { %v1119_v19 = vmul.f32 0.125, %v1118_v17  ;;  %v1115_v20 = vpop.f32.mrb[10].mxu0 }
 0x257   : > { %v2504_v21 = vpop.f32.mrb[11].mxu0 }
 0x258   : > { %v1120_v22 = vsel %vm838_vm2, %v1119_v19, -inf }
 0x259   : > { %1121 = vmax.xlane.f32.xlu0 %v1120_v22 }
 0x25c   : > { %v1224_v23 = vpop.f32.mrb[12].mxu0 }
 0x25d   : > { %v1230_v24 = vsel %vm890_vm5, %v1224_v23, -1e+20  ;;  %v2515_v25 = vpop.f32.mrb[13].mxu0 }
 0x25e   : > { %v1231_v26 = vmul.f32 0.125, %v1230_v24  ;;  %v1227_v27 = vpop.f32.mrb[14].mxu0 }
 0x25f   : > { %v2516_v28 = vpop.f32.mrb[15].mxu0 }
 0x260   : > { %v1232_v29 = vsel %vm838_vm2, %v1231_v26, -inf }
 0x261   : > { %1233 = vmax.xlane.f32.xlu0 %v1232_v29 }
 0x264   : > { %v1336_v30 = vpop.f32.mrb[16].mxu0 }
 0x265   : > { %v1342_v31 = vsel %vm890_vm5, %v1336_v30, -1e+20  ;;  %v2527_v32 = vpop.f32.mrb[17].mxu0 }
 0x266   : > { %v2984_v33 = vmul.f32 0.125, %v1342_v31  ;;  %v1339_v34 = vpop.f32.mrb[18].mxu0 }
 0x267   : > { %v2528_v35 = vpop.f32.mrb[19].mxu0 }
 0x268   : > { %v1344_v37 = vsel %vm838_vm2, %v2984_v33, -inf }
 0x269   : > { %1345 = vmax.xlane.f32.xlu1 %v1344_v37 }
 0x26c   : > { %v895_v38 = vpop.xlane.xlu0 %894  ;;  %v1448_v39 = vpop.f32.mrb[20].mxu0 }
 0x26d   : > { %v896_v40 = vsub.f32 %v892_v4, %v895_v38  ;;  %v1454_v41 = vsel %vm890_vm5, %v1448_v39, -1e+20  ;;  %v2539_v42 = vpop.f32.mrb[21].mxu0 }
 0x26e   : > { %v2990_v43 = vmul.f32 0.125, %v1454_v41  ;;  %v1451_v44 = vpop.f32.mrb[22].mxu0 }
 0x26f   : > { %v897_v45 = vmul.f32 1.442695, %v896_v40  ;;  %v2540_v46 = vpop.f32.mrb[23].mxu0 }
 0x270   : > { %v1456_v47 = vsel %vm838_vm2, %v2990_v43, -inf }
 0x271   : > { %2652 = vpow2.f32 %v897_v45  ;;  %1457 = vmax.xlane.f32.xlu0 %v1456_v47 }
 0x274   : > { %v1560_v48 = vpop.f32.mrb[24].mxu0 }
 0x275   : > { %v1566_v49 = vsel %vm890_vm5, %v1560_v48, -1e+20  ;;  %v2551_v50 = vpop.f32.mrb[25].mxu0 }
 0x276   : > { %v2996_v51 = vmul.f32 0.125, %v1566_v49  ;;  %v1563_v52 = vpop.f32.mrb[26].mxu0 }
 0x277   : > { %v2552_v53 = vpop.f32.mrb[27].mxu0 }
 0x278   : > { %v1568_v54 = vsel %vm838_vm2, %v2996_v51, -inf }
 0x279   : > { %1569 = vmax.xlane.f32.xlu1 %v1568_v54 }
 0x27b   : > { %v2653_v55 = vpop.eup %2652 }
 0x27c   : > { %v1672_v56 = vpop.f32.mrb[28].mxu0  ;;  %v899_v57 = vsel %vm838_vm2, %v2653_v55, 0.0 }
 0x27d   : > { %v1678_v58 = vsel %vm890_vm5, %v1672_v56, -1e+20  ;;  %900 = vadd.xlane.f32.xlu1 %v899_v57  ;;  %v2563_v62 = vpop.f32.mrb[29].mxu0 }
 0x27e   : > { %v1679_v0 = vmul.f32 0.125, %v1678_v58  ;;  %v1675_v2 = vpop.f32.mrb[30].mxu0 }
 0x27f   : > { %v2564_v3 = vpop.f32.mrb[31].mxu0 }
 0x280   : > { %v1680_v4 = vsel %vm838_vm2, %v1679_v0, -inf }
 0x281   : > { %1681 = vmax.xlane.f32.xlu0 %v1680_v4 }
 0x28e   : > { %1132 = vrot.lane.b32.xlu1 %v2921_v36, %s2698_s23 }
 0x297   : > { %1020 = vrot.lane.b32.xlu0 %v2921_v36, %s2699_s26 }
 0x2de   : > { %v1009_v6 = vpop.xlane.xlu1 %1008 }
 0x2df   : > { %v1010_v7 = vsub.f32 %v2972_v12, %v1009_v6 }
 0x2e1   : > { %v1011_v8 = vmul.f32 1.442695, %v1010_v7 }
 0x2e3   : > { %2654 = vpow2.f32 %v1011_v8 }
 0x2e6   : > { %v1122_v63 = vpop.xlane.xlu0 %1121 }
 0x2e7   : > { %v1123_v9 = vsub.f32 %v1119_v19, %v1122_v63 }
 0x2e9   : > { %v1124_v10 = vmul.f32 1.442695, %v1123_v9 }
 0x2eb   : > { %2656 = vpow2.f32 %v1124_v10 }
 0x2ed   : > { %v3009_v11 = vpop.eup %2654 }
 0x2ee   : > { %v1234_v13 = vpop.xlane.xlu0 %1233  ;;  %v1013_v14 = vsel %vm838_vm2, %v3009_v11, 0.0 }
 0x2ef   : > { %v1235_v15 = vsub.f32 %v1231_v26, %v1234_v13  ;;  %1014 = vadd.xlane.f32.xlu0 %v1013_v14 }
 0x2f1   : > { %v1236_v16 = vmul.f32 1.442695, %v1235_v15 }
 0x2f3   : > { %2658 = vpow2.f32 %v1236_v16 }
 0x2f5   : > { %v3013_v17 = vpop.eup %2656 }
 0x2f6   : > { %v1126_v12 = vsel %vm838_vm2, %v3013_v17, 0.0  ;;  %v1346_v20 = vpop.xlane.xlu1 %1345 }
 0x2f7   : > { %1127 = vadd.xlane.f32.xlu1 %v1126_v12  ;;  %v1347_v26 = vsub.f32 %v2984_v33, %v1346_v20 }
 0x2f9   : > { %v1348_v30 = vmul.f32 1.442695, %v1347_v26 }
 0x2fd   : > { %v3017_v18 = vpop.eup %2658 }
 0x2fe   : > { %v1238_v19 = vsel %vm838_vm2, %v3017_v18, 0.0  ;;  %v1458_v23 = vpop.xlane.xlu0 %1457 }
 0x2ff   : > { %1239 = vadd.xlane.f32.xlu0 %v1238_v19  ;;  %v1459_v31 = vsub.f32 %v2990_v43, %v1458_v23 }
 0x301   : > { %v1460_v33 = vmul.f32 1.442695, %v1459_v31 }
 0x306   : > { %v1570_v21 = vpop.xlane.xlu1 %1569 }
 0x307   : > { %v1571_v34 = vsub.f32 %v2996_v51, %v1570_v21 }
 0x308   : > { %1244 = vrot.lane.b32.xlu1 %v2921_v36, %s2700_s27  ;;  %s2709_s27 = smov 32  }
 0x309   : > { %v1572_v37 = vmul.f32 1.442695, %v1571_v34 }
 0x30a   : > { %v901_v22 = vpop.xlane.xlu1 %900 }
 0x30b   : > { %2660 = vrcp.f32 %v901_v22 }
 0x30c   : > { %2662 = vpow2.f32 %v1348_v30 }
 0x30d   : > { %2664 = vpow2.f32 %v1460_v33 }
 0x30e   : > { %v1682_v24 = vpop.xlane.xlu0 %1681  ;;  %2666 = vpow2.f32 %v1572_v37  ;;  %v1133_v48 = vpop.permute.xlu1 %1132 }
 0x30f   : > { %v1683_v35 = vsub.f32 %v1679_v0, %v1682_v24  ;;  %v1138_v53 = vsel %vm909_vm3, %v1133_v48, 0  ;;  %v2621_v48 = vld [vmem:[%s3222_s7 + $0x8] sm:$0xff]  }
 0x311   : > { %v1684_v38 = vmul.f32 1.442695, %v1683_v35 }
 0x312   : > { %v1021_v28 = vpop.permute.xlu0 %1020 }
 0x313   : > { %v1026_v32 = vsel %vm909_vm3, %v1021_v28, 0  ;;  %2668 = vpow2.f32 %v1684_v38 }
 0x315   : > { %1356 = vrot.lane.b32.xlu0 %v2921_v36, %s2701_s28  ;;  %v2661_v25 = vpop.eup %2660 }
 0x316   : > { %v903_v27 = vmul.f32 %v2661_v25, %v2653_v55  ;;  %v2663_v39 = vpop.eup %2662 }
 0x317   : > { %v1350_v40 = vsel %vm838_vm2, %v2663_v39, 0.0  ;;  %v2665_v41 = vpop.eup %2664 }
 0x318   : > { %v904_v29 = vpack.c.bf16 %v903_v27, %v903_v27  ;;  %v3034_v42 = vpop.eup %2666  ;;  %v1462_v43 = vsel %vm838_vm2, %v2665_v41, 0.0 }
 0x319   : > { %v1574_v45 = vsel %vm838_vm2, %v3034_v42, 0.0 }
 0x31a   : > { %2484 = vmatmul.mubr.msk.bf16.vlgmr.msra.gmra.mrb[12].mxu1 %vm838_vm2, %v904_v29 }
 0x31b   : > { %2494 = vmatpush3.bf16.msra.mxu1 %v1026_v32  ;;  %2495 = vmatprep.mubr.msk.bf16.mxu1 %vm2697_vm0, %v2696_v1 }
 0x31c   : > { %2505 = vmatprep.subr.bf16.mxu1 %v2696_v1 }
 0x31d   : > { %v3037_v44 = vpop.eup %2668 }
 0x31e   : > { %v1686_v46 = vsel %vm838_vm2, %v3037_v44, 0.0 }
 0x32c   : > { %1351 = vadd.xlane.f32.xlu1 %v1350_v40 }
 0x330   : > { %1463 = vadd.xlane.f32.xlu1 %v1462_v43  ;;  %v2620_v43 = vld [vmem:[%s3222_s7] sm:$0xff]  }
 0x331   : > { %2572 = vmatpush3.bf16.msra.mxu0 %v2620_v43  ;;  %v2642_v43 = vld [vmem:[%s3228_s13 + $0x58] sm:$0xff]  }
 0x332   : > { %2573 = vmatprep.subr.bf16.mxu0 %v2696_v1 }
 0x334   : > { %1575 = vadd.xlane.f32.xlu0 %v1574_v45  ;;  %1687 = vadd.xlane.f32.xlu1 %v1686_v46 }
 0x335   : > { %2574 = vmatpush3.bf16.msra.mxu0 %v2621_v48  ;;  %v2647_v48 = vld [vmem:[%s3228_s13 + $0x28] sm:$0xff]  }
 0x336   : > { %2575 = vmatprep.subr.bf16.mxu0 %v2696_v1 }
 0x345   : > { %1468 = vrot.lane.b32.xlu1 %v2921_v36, %s2702_s29 }
 0x34a   : > { %1580 = vrot.lane.b32.xlu0 %v2921_v36, %s2703_s0 }
 0x34e   : > { %1692 = vrot.lane.b32.xlu0 %v2921_v36, %s2704_s30 }
 0x37c   : > { %v1015_v47 = vpop.xlane.xlu0 %1014 }
 0x37d   : > { %2670 = vrcp.f32 %v1015_v47 }
 0x384   : > { %v1128_v49 = vpop.xlane.xlu1 %1127 }
 0x385   : > { %2672 = vrcp.f32 %v1128_v49  ;;  %v2622_v49 = vld [vmem:[%s3222_s7 + $0x10] sm:$0xff]  }
 0x386   : > { %2576 = vmatpush3.bf16.msra.mxu0 %v2622_v49 }
 0x387   : > { %v2671_v50 = vpop.eup %2670  ;;  %2577 = vmatprep.subr.bf16.mxu0 %v2696_v1 }
 0x388   : > { %v1017_v51 = vmul.f32 %v2671_v50, %v3009_v11  ;;  %v1245_v56 = vpop.permute.xlu1 %1244 }
 0x389   : > { %v1250_v58 = vsel %vm909_vm3, %v1245_v56, 0 }
 0x38a   : > { %v1018_v52 = vpack.c.bf16 %v1017_v51, %v1017_v51 }
 0x38c   : > { %2496 = vmatmul.mubr.msk.bf16.vlgmr.msra.gmra.mrb[16].mxu1 %vm838_vm2, %v1018_v52  ;;  %v1240_v54 = vpop.xlane.xlu0 %1239 }
 0x38d   : > { %2506 = vmatpush3.bf16.msra.mxu1 %v1138_v53  ;;  %2674 = vrcp.f32 %v1240_v54  ;;  %2507 = vmatprep.mubr.msk.bf16.mxu1 %vm2697_vm0, %v2696_v1  ;;  %v2623_v54 = vld [vmem:[%s3222_s7 + $0x18] sm:$0xff]  }
 0x38e   : > { %2517 = vmatprep.subr.bf16.mxu1 %v2696_v1  ;;  %2578 = vmatpush3.bf16.msra.mxu0 %v2623_v54 }
 0x38f   : > { %v2673_v36 = vpop.eup %2672 }
 0x390   : > { %v1130_v55 = vmul.f32 %v2673_v36, %v3013_v17  ;;  %v1357_v2 = vpop.permute.xlu0 %1356 }
 0x391   : > { %v1362_v4 = vsel %vm909_vm3, %v1357_v2, 0 }
 0x392   : > { %v1131_v57 = vpack.c.bf16 %v1130_v55, %v1130_v55 }
 0x394   : > { %2508 = vmatmul.mubr.msk.bf16.vlgmr.msra.gmra.mrb[20].mxu1 %vm838_vm2, %v1131_v57 }
 0x395   : > { %2518 = vmatpush3.bf16.msra.mxu1 %v1250_v58  ;;  %2519 = vmatprep.mubr.msk.bf16.mxu1 %vm2697_vm0, %v2696_v1 }
 0x396   : > { %2529 = vmatprep.subr.bf16.mxu1 %v2696_v1 }
 0x397   : > { %v2675_v62 = vpop.eup %2674 }
 0x398   : > { %v1242_v0 = vmul.f32 %v2675_v62, %v3017_v18 }
 0x39a   : > { %v1243_v3 = vpack.c.bf16 %v1242_v0, %v1242_v0 }
 0x39c   : > { %2520 = vmatmul.mubr.msk.bf16.vlgmr.msra.gmra.mrb[24].mxu1 %vm838_vm2, %v1243_v3 }
 0x39d   : > { %2530 = vmatpush3.bf16.msra.mxu1 %v1362_v4  ;;  %2531 = vmatprep.mubr.msk.bf16.mxu1 %vm2697_vm0, %v2696_v1 }
 0x39e   : > { %2541 = vmatprep.subr.bf16.mxu1 %v2696_v1 }
 0x3b9   : > { %v1352_v6 = vpop.xlane.xlu1 %1351 }
 0x3ba   : > { %2676 = vrcp.f32 %v1352_v6 }
 0x3bd   : > { %v1464_v7 = vpop.xlane.xlu1 %1463 }
 0x3be   : > { %2678 = vrcp.f32 %v1464_v7 }
 0x3c1   : > { %v1688_v8 = vpop.xlane.xlu1 %1687  ;;  %v1576_v63 = vpop.xlane.xlu0 %1575 }
 0x3c2   : > { %2680 = vrcp.f32 %v1576_v63 }
 0x3c3   : > { %2682 = vrcp.f32 %v1688_v8 }
 0x3c4   : > { %v2677_v9 = vpop.eup %2676 }
 0x3c5   : > { %v1354_v10 = vmul.f32 %v2677_v9, %v2663_v39  ;;  %v1469_v11 = vpop.permute.xlu1 %1468  ;;  %v1581_v17 = vpop.permute.xlu0 %1580 }
 0x3c6   : > { %v1474_v15 = vsel %vm909_vm3, %v1469_v11, 0  ;;  %v1586_v19 = vsel %vm909_vm3, %v1581_v17, 0 }
 0x3c7   : > { %v1355_v13 = vpack.c.bf16 %v1354_v10, %v1354_v10 }
 0x3c8   : > { %v2679_v14 = vpop.eup %2678 }
 0x3c9   : > { %2532 = vmatmul.mubr.msk.bf16.vlgmr.msra.gmra.mrb[28].mxu1 %vm838_vm2, %v1355_v13  ;;  %v1466_v16 = vmul.f32 %v2679_v14, %v2665_v41  ;;  %v1693_v21 = vpop.permute.xlu0 %1692 }
 0x3ca   : > { %2542 = vmatpush3.bf16.msra.mxu1 %v1474_v15  ;;  %2543 = vmatprep.mubr.msk.bf16.mxu1 %vm2697_vm0, %v2696_v1  ;;  %v1698_v24 = vsel %vm909_vm3, %v1693_v21, 0 }
 0x3cb   : > { %2553 = vmatprep.subr.bf16.mxu1 %v2696_v1  ;;  %v1467_v12 = vpack.c.bf16 %v1466_v16, %v1466_v16 }
 0x3cc   : > { %v2681_v18 = vpop.eup %2680 }
 0x3cd   : > { %v1578_v20 = vmul.f32 %v2681_v18, %v3034_v42  ;;  %v2683_v23 = vpop.eup %2682 }
 0x3ce   : > { %v1690_v25 = vmul.f32 %v2683_v23, %v3037_v44 }
 0x3cf   : > { %v1579_v22 = vpack.c.bf16 %v1578_v20, %v1578_v20 }
 0x3d0   : > { %v1691_v26 = vpack.c.bf16 %v1690_v25, %v1690_v25 }
 0x3d1   : > { %2544 = vmatmul.mubr.msk.bf16.vlgmr.msra.gmra.mrb[32].mxu1 %vm838_vm2, %v1467_v12  ;;  %v2327_v12 = vld [vmem:[%s3223_s8] ss:$0 sm:$0xff] }
 0x3d2   : > { %2554 = vmatpush3.bf16.msra.mxu1 %v1586_v19  ;;  %2555 = vmatprep.mubr.msk.bf16.mxu1 %vm2697_vm0, %v2696_v1 }
 0x3d3   : > { %2565 = vmatprep.subr.bf16.mxu1 %v2696_v1 }
 0x3d9   : > { %2556 = vmatmul.mubr.msk.bf16.vlgmr.msra.gmra.mrb[36].mxu1 %vm838_vm2, %v1579_v22 }
 0x3da   : > { %2566 = vmatpush3.bf16.msra.mxu1 %v1698_v24  ;;  %2567 = vmatprep.mubr.msk.bf16.mxu1 %vm2697_vm0, %v2696_v1 }
 0x3e1   : > { %2568 = vmatmul.mubr.msk.bf16.vlgmr.msra.gmra.mrb[40].mxu1 %vm838_vm2, %v1691_v26 }
 0x3e2   : > { %1982 = vmatprep.mubr.bf16.mxu1 %v2705_v61 }
 0x3ed   : > { %v3085_v27 = vpop.f32.mrb[12].mxu1 }
 0x3ee   : > { %v2485_v28 = vpop.f32.mrb[13].mxu1 }
 0x3ef   : > { %v950_v29 = vpop.f32.mrb[14].mxu1 }
 0x3f0   : > { %v2486_v30 = vpop.f32.mrb[15].mxu1 }
 0x3f1   : > { %v2626_v30 = vld [vmem:[%s3226_s11 + $0x4] ss:$8 sps:$4 sm:$0xff]  }
 0x3f2   : > { %1950 = vmatprep.subr.bf16.mxu1 %v2626_v30 }
 0x45f   : > { %v1062_v31 = vpop.f32.mrb[16].mxu1 }
 0x460   : > { %1741 = vrot.lane.b32.xlu1 %v1062_v31, %s2706_s25  ;;  %v2497_v32 = vpop.f32.mrb[17].mxu1  ;;  %s2711_s25 = smov 48   ;;  %v2624_v31 = vld [vmem:[%s3226_s11] ss:$8 sps:$4 sm:$0xff]  }
 0x461   : > { %v1065_v34 = vpop.f32.mrb[18].mxu1  ;;  %1951 = vmatpush1.bf16.msra.mxu1 %v2624_v31  ;;  %v2627_v32 = vld [vmem:[%s3226_s11 + $0x10] ss:$8 sps:$4 sm:$0xff]  }
 0x462   : > { %v2498_v33 = vpop.f32.mrb[19].mxu1  ;;  %v2632_v34 = vld [vmem:[%s3226_s11 + $0x24] ss:$8 sps:$4 sm:$0xff]  }
 0x463   : > { %v2630_v33 = vld [vmem:[%s3226_s11 + $0x20] ss:$8 sps:$4 sm:$0xff]  }
 0x467   : > { %v1174_v35 = vpop.f32.mrb[20].mxu1 }
 0x468   : > { %1745 = vrot.lane.b32.xlu0 %v1174_v35, %s2707_s21  ;;  %v2509_v37 = vpop.f32.mrb[21].mxu1  ;;  %s2712_s21 = smov 56   ;;  %v2635_v35 = vld [vmem:[%s3226_s11 + $0x34] ss:$8 sps:$4 sm:$0xff]  }
 0x469   : > { %v1177_v38 = vpop.f32.mrb[22].mxu1  ;;  %v2633_v37 = vld [vmem:[%s3226_s11 + $0x30] ss:$8 sps:$4 sm:$0xff]  }
 0x46a   : > { %v2510_v39 = vpop.f32.mrb[23].mxu1  ;;  %v2636_v38 = vld [vmem:[%s3228_s13 + $0x40] sm:$0xff]  }
 0x46b   : > { %v2637_v39 = vld [vmem:[%s3228_s13] sm:$0xff]   ;;  %2417 = vmatprep.subr.bf16.mxu0 %v2636_v38 }
 0x46f   : > { %v1286_v40 = vpop.f32.mrb[24].mxu1 }
 0x470   : > { %1749 = vrot.lane.b32.xlu1 %v1286_v40, %s2708_s22  ;;  %v2521_v61 = vpop.f32.mrb[25].mxu1  ;;  %v2638_v40 = vld [vmem:[%s3228_s13 + $0x48] sm:$0xff]  }
 0x471   : > { %v1289_v41 = vpop.f32.mrb[26].mxu1  ;;  %v2639_v61 = vld [vmem:[%s3228_s13 + $0x8] sm:$0xff]  }
 0x472   : > { %v2522_v42 = vpop.f32.mrb[27].mxu1  ;;  %v2640_v41 = vld [vmem:[%s3228_s13 + $0x50] sm:$0xff]  }
 0x473   : > { %v2641_v42 = vld [vmem:[%s3228_s13 + $0x10] sm:$0xff]  }
 0x49c   : > { %v1398_v44 = vpop.f32.mrb[28].mxu1 }
 0x49d   : > { %1753 = vrot.lane.b32.xlu0 %v1398_v44, %s2709_s27  ;;  %v2533_v45 = vpop.f32.mrb[29].mxu1  ;;  %v2643_v44 = vld [vmem:[%s3228_s13 + $0x18] sm:$0xff]  }
 0x49e   : > { %v1401_v46 = vpop.f32.mrb[30].mxu1  ;;  %v2644_v45 = vld [vmem:[%s3228_s13 + $0x60] sm:$0xff]  }
 0x49f   : > { %v2534_v47 = vpop.f32.mrb[31].mxu1  ;;  %v2645_v46 = vld [vmem:[%s3228_s13 + $0x20] sm:$0xff]  }
 0x4a0   : > { %v2646_v47 = vld [vmem:[%s3228_s13 + $0x68] sm:$0xff]  }
 0x4a4   : > { %v1510_v50 = vpop.f32.mrb[32].mxu1 }
 0x4a5   : > { %1757 = vrot.lane.b32.xlu1 %v1510_v50, %s2710_s19  ;;  %v2545_v51 = vpop.f32.mrb[33].mxu1 }
 0x4a6   : > { %v1513_v52 = vpop.f32.mrb[34].mxu1 }
 0x4a7   : > { %v2546_v53 = vpop.f32.mrb[35].mxu1 }
 0x4a8   : > { %v2333_v53 = vld [vmem:[%s3224_s9] ss:$0 sm:$0xff] }
 0x4ac   : > { %v1622_v36 = vpop.f32.mrb[36].mxu1 }
 0x4ad   : > { %1761 = vrot.lane.b32.xlu0 %v1622_v36, %s2711_s25  ;;  %v2557_v55 = vpop.f32.mrb[37].mxu1  ;;  %v2334_v36 = vld [vmem:[%s3225_s10] ss:$0 sm:$0xff] }
 0x4ae   : > { %v1625_v56 = vpop.f32.mrb[38].mxu1 }
 0x4af   : > { %v2558_v57 = vpop.f32.mrb[39].mxu1 }
 0x4b4   : > { %v1734_v58 = vpop.f32.mrb[40].mxu1 }
 0x4b5   : > { %1765 = vrot.lane.b32.xlu1 %v1734_v58, %s2712_s21  ;;  %v2569_v62 = vpop.f32.mrb[41].mxu1  ;;  %v2648_v58 = vld [vmem:[%s3228_s13 + $0x70] sm:$0xff]   ;;  %s591_s21 = scalar_lea.vmem %s3232_s17, %s2830_s18 }
 0x4b6   : > { %v1737_v0 = vpop.f32.mrb[42].mxu1  ;;  %v2649_v62 = vld [vmem:[%s3228_s13 + $0x30] sm:$0xff]  }
 0x4b7   : > { %v2570_v2 = vpop.f32.mrb[43].mxu1  ;;  %v2650_v0 = vld [vmem:[%s3228_s13 + $0x78] sm:$0xff]  }
 0x4b8   : > { %v2651_v2 = vld [vmem:[%s3228_s13 + $0x38] sm:$0xff]  }
 0x4d2   : > { %v1742_v3 = vpop.permute.xlu1 %1741 }
 0x4d3   : > { %v1768_v7 = vsel %vm838_vm2, %v3085_v27, %v1742_v3  ;;  %v1895_v3 = vld [vmem:[%s3227_s12] sm:$0x3] }
 0x4da   : > { %v1746_v4 = vpop.permute.xlu0 %1745 }
 0x4db   : > { %v1770_v8 = vsel %vm1769_vm6, %v1768_v7, %v1746_v4  ;;  %v1903_v4 = vsub.s32 1, %v2958_v59 }
 0x4e2   : > { %v1750_v1 = vpop.permute.xlu1 %1749 }
 0x4e3   : > { %v1772_v9 = vsel %vm1771_vm7, %v1770_v8, %v1750_v1  ;;  %v1900_v1 = vrot.slane %v1895_v3, %v888_v60 }
 0x50f   : > { %v1754_v6 = vpop.permute.xlu0 %1753 }
 0x510   : > { %v1774_v11 = vsel %vm1773_vm8, %v1772_v9, %v1754_v6  ;;  %v1904_v6 = vrot.slane %v1895_v3, %v1903_v4 }
 0x517   : > { %v1758_v63 = vpop.permute.xlu1 %1757 }
 0x518   : > { %v1776_v13 = vsel %vm1775_vm9, %v1774_v11, %v1758_v63 }
 0x51f   : > { %v1762_v10 = vpop.permute.xlu0 %1761 }
 0x520   : > { %v1778_v14 = vsel %vm1777_vm10, %v1776_v13, %v1762_v10 }
 0x527   : > { %v1766_v15 = vpop.permute.xlu1 %1765 }
 0x528   : > { %v1780_v16 = vsel %vm1779_vm11, %v1778_v14, %v1766_v15 }
 0x529   : > { %v1781_v17 = vpack.c.bf16 %v1780_v16, %v1780_v16 }
 0x52b   : > { %2580 = vmatmul.mubr.msk.bf16.vlgmr.msra.gmra.mrb[32].mxu0 %vm655_vm1, %v1781_v17 }
 0x52c   : > { %2418 = vmatpush3.bf16.msra.mxu0 %v2637_v39 }
 0x52d   : > { %2419 = vmatprep.subr.bf16.mxu0 %v2638_v40 }
 0x530   : > { %2420 = vmatpush3.bf16.msra.mxu0 %v2639_v61 }
 0x531   : > { %2421 = vmatprep.subr.bf16.mxu0 %v2640_v41 }
 0x534   : > { %2422 = vmatpush3.bf16.msra.mxu0 %v2641_v42 }
 0x535   : > { %2423 = vmatprep.subr.bf16.mxu0 %v2642_v43 }
 0x538   : > { %2424 = vmatpush3.bf16.msra.mxu0 %v2643_v44 }
 0x539   : > { %2425 = vmatprep.subr.bf16.mxu0 %v2644_v45 }
 0x53c   : > { %2426 = vmatpush3.bf16.msra.mxu0 %v2645_v46 }
 0x53d   : > { %2427 = vmatprep.subr.bf16.mxu0 %v2646_v47 }
 0x540   : > { %2428 = vmatpush3.bf16.msra.mxu0 %v2647_v48 }
 0x541   : > { %2429 = vmatprep.subr.bf16.mxu0 %v2648_v58 }
 0x544   : > { %2430 = vmatpush3.bf16.msra.mxu0 %v2649_v62 }
 0x545   : > { %2431 = vmatprep.subr.bf16.mxu0 %v2650_v0 }
 0x548   : > { %2432 = vmatpush3.bf16.msra.mxu0 %v2651_v2 }
 0x5fe   : > { %v1849_v18 = vpop.f32.mrb[32].mxu0 }
 0x5ff   : > { %v1850_v19 = vadd.f32 %v2327_v12, %v1849_v18  ;;  %v2581_v20 = vpop.f32.mrb[33].mxu0  ;;  %v2344_v12 = vld [vmem:[%s3229_s14] ss:$0 sm:$0xff] }
 0x600   : > { %v1852_v21 = vpop.f32.mrb[34].mxu0 }
 0x601   : > { %v2582_v22 = vpop.f32.mrb[35].mxu0  ;;  %v1855_v23 = vadd.f32 %v1850_v19, %v2840_v5  ;;  %v2629_v5 = vld [vmem:[%s3226_s11 + $0x14] ss:$8 sps:$4 sm:$0xff]  }
 0x602   : > { %1952 = vmatprep.subr.bf16.mxu1 %v2629_v5  ;;  %v2361_v5 = vld [vmem:[%s3230_s15] ss:$0 sm:$0xff] }
 0x603   : > { %v1858_v24 = vsel %vm655_vm1, %v1855_v23, 0.0  ;;  %1953 = vmatpush1.bf16.msra.mxu1 %v2627_v32 }
 0x604   : > { %1859 = vadd.xlane.f32.xlu0 %v1858_v24  ;;  %1954 = vmatprep.subr.bf16.mxu1 %v2632_v34  ;;  %v2362_v34 = vld [vmem:[%s3231_s16] ss:$0 sm:$0xff] }
 0x607   : > { %1955 = vmatpush1.bf16.msra.mxu1 %v2630_v33 }
 0x608   : > { %1956 = vmatprep.subr.bf16.mxu1 %v2635_v35 }
 0x60b   : > { %1957 = vmatpush1.bf16.msra.mxu1 %v2633_v37 }
 0x691   : > { %v1860_v25 = vpop.xlane.xlu0 %1859 }
 0x692   : > { %v1862_v26 = vmul.f32 0.015625, %v1860_v25 }
 0x694   : > { %v1863_v27 = vsub.f32 %v1855_v23, %v1862_v26 }
 0x696   : > { %v1864_v28 = vmul.f32 %v1863_v27, %v1863_v27 }
 0x698   : > { %v1865_v29 = vsel %vm655_vm1, %v1864_v28, 0.0 }
 0x699   : > { %1866 = vadd.xlane.f32.xlu1 %v1865_v29 }
 0x726   : > { %v1867_v49 = vpop.xlane.xlu1 %1866 }
 0x727   : > { %v1868_v50 = vmul.f32 0.015625, %v1867_v49 }
 0x729   : > { %v1869_v51 = vadd.f32 1e-05, %v1868_v50 }
 0x72b   : > { %2684 = vrsqrt.f32 %v1869_v51 }
 0x735   : > { %v2685_v52 = vpop.eup %2684 }
 0x736   : > { %v1871_v54 = vmul.f32 %v2685_v52, %v1863_v27 }
 0x738   : > { %v1878_v55 = vmul.f32 %v2333_v53, %v1871_v54 }
 0x73a   : > { %v1885_v56 = vadd.f32 %v2334_v36, %v1878_v55 }
 0x73c   : > { %v1894_v57 = vpack.c.bf16 %v1885_v56, %v1885_v56 }
 0x73e   : > { %2343 = vmatmul.mubr.msk.bf16.vlgmr.msra.gmra.mrb[44].mxu1 %vm655_vm1, %v1894_v57 }
 0x811   : > { %v1984_v7 = vpop.f32.mrb[44].mxu1 }
 0x812   : > { %v1985_v8 = vadd.f32 %v1984_v7, %v1900_v1  ;;  %v1986_v63 = vpop.f32.mrb[45].mxu1 }
 0x813   : > { %v1987_v9 = vadd.f32 %v1986_v63, %v1904_v6  ;;  %v1988_v10 = vpop.f32.mrb[46].mxu1 }
 0x814   : > { %v1991_v11 = vmax.f32 %v1985_v8, 0.0  ;;  %v1989_v13 = vpop.f32.mrb[47].mxu1 }
 0x815   : > { %v1992_v14 = vmax.f32 %v1987_v9, 0.0 }
 0x816   : > { %v2025_v16 = vpack.c.bf16 %v1991_v11, %v1991_v11 }
 0x817   : > { %v2026_v15 = vpack.c.bf16 %v1992_v14, %v1992_v14 }
 0x819   : > { %2162 = vmatprep.mubr.bf16.mxu0 %v2026_v15 }
 0x81a   : > { %2163 = vmatmul.mubr.bf16.vlgmr.msra.gmra.mrb[36].mxu0 %v2025_v16 }
 0x8ed   : > { %v2433_v17 = vpop.f32.mrb[36].mxu0 }
 0x8ee   : > { %v2434_v59 = vpop.f32.mrb[37].mxu0 }
 0x8ef   : > { %v2435_v60 = vadd.f32 %v2434_v59, %v2433_v17  ;;  %v2436_v18 = vpop.f32.mrb[38].mxu0 }
 0x8f0   : > { %v2437_v19 = vpop.f32.mrb[39].mxu0 }
 0x8f1   : > { %v2165_v20 = vadd.f32 %v2435_v60, %v2344_v12 }
 0x8f3   : > { %v2170_v21 = vadd.f32 %v2165_v20, %v1885_v56 }
 0x8f5   : > { %v2173_v22 = vsel %vm655_vm1, %v2170_v21, 0.0 }
 0x8f6   : > { %2174 = vadd.xlane.f32.xlu0 %v2173_v22 }
 0x983   : > { %v2175_v23 = vpop.xlane.xlu0 %2174 }
 0x984   : > { %v2176_v24 = vmul.f32 0.015625, %v2175_v23 }
 0x986   : > { %v2177_v25 = vsub.f32 %v2170_v21, %v2176_v24 }
 0x988   : > { %v2178_v26 = vmul.f32 %v2177_v25, %v2177_v25 }
 0x98a   : > { %v2179_v27 = vsel %vm655_vm1, %v2178_v26, 0.0 }
 0x98b   : > { %2180 = vadd.xlane.f32.xlu0 %v2179_v27 }
 0xa18   : > { %v2181_v28 = vpop.xlane.xlu0 %2180 }
 0xa19   : > { %v2182_v29 = vmul.f32 0.015625, %v2181_v28 }
 0xa1b   : > { %v2183_v30 = vadd.f32 1e-05, %v2182_v29 }
 0xa1d   : > { %2686 = vrsqrt.f32 %v2183_v30 }
 0xa27   : > { %v2687_v31 = vpop.eup %2686 }
 0xa28   : > { %v2185_v32 = vmul.f32 %v2687_v31, %v2177_v25 }
 0xa2a   : > { %v2192_v33 = vmul.f32 %v2361_v5, %v2185_v32 }
 0xa2c   : > { %v2199_v35 = vadd.f32 %v2362_v34, %v2192_v33 }
 0xa2e   : > { %2200 = vst.msk [vmem:[%s591_s21] sm:$0xff] %vm655_vm1, %v2199_v35 }
 0xa2f PF: > { %s27_s24 = sadd.s32 1, %s2694_s24  }
 0xa30   : > { %p24_p4 = scmp.ge.s32.totalorder %s27_s24, 4  }
 0xa32   :  { %26 = sbr.rel (!%p24_p4) target bundleno = 3 (0x3), region = 127 }

// kernel: _lambda_.7
= control target key start
LH: loop header
LB: loop body
LE: loop exit
PB: predicated region body
PF: predicated region fallthrough
CT: control target
= control target key end

     0   :  { %s5259_s0 = inlined_call_operand.vmem [shape: f32[2,8,64], index: 0, kind: input, shape index: {}]   ;;  %s5260_s1 = inlined_call_operand.vmem [shape: f32[2,8,64], index: 1, kind: input, shape index: {}]   ;;  %s5261_s2 = inlined_call_operand.vmem [shape: s32[8,8], index: 2, kind: input, shape index: {}]   ;;  %s5262_s3 = inlined_call_operand.vmem [shape: s32[2,1,8], index: 3, kind: input, shape index: {}]   ;;  %s5263_s4 = inlined_call_operand.vmem [shape: bf16[64,64], index: 4, kind: input, shape index: {}]   ;;  %s5264_s5 = inlined_call_operand.vmem [shape: bf16[64,64], index: 5, kind: input, shape index: {}]   ;;  %s5265_s6 = inlined_call_operand.vmem [shape: bf16[64,64], index: 6, kind: input, shape index: {}]   ;;  %s5266_s7 = inlined_call_operand.vmem [shape: bf16[64,64], index: 7, kind: input, shape index: {}]   ;;  %s5267_s8 = inlined_call_operand.vmem [shape: f32[1,64], index: 8, kind: input, shape index: {}, may-alias: {8,10,15,17,21,23}]   ;;  %s5268_s9 = inlined_call_operand.vmem [shape: f32[1,64], index: 9, kind: input, shape index: {}, may-alias: {9,16,22}]   ;;  %s5269_s10 = inlined_call_operand.vmem [shape: f32[1,64], index: 10, kind: input, shape index: {}, may-alias: {8,10,15,17,21,23}]   ;;  %s5270_s11 = inlined_call_operand.vmem [shape: bf16[64,64], index: 11, kind: input, shape index: {}]   ;;  %s5271_s12 = inlined_call_operand.vmem [shape: bf16[64,64], index: 12, kind: input, shape index: {}]   ;;  %s5272_s13 = inlined_call_operand.vmem [shape: bf16[64,64], index: 13, kind: input, shape index: {}]   ;;  %s5273_s14 = inlined_call_operand.vmem [shape: bf16[64,64], index: 14, kind: input, shape index: {}]   ;;  %s5274_s15 = inlined_call_operand.vmem [shape: f32[1,64], index: 15, kind: input, shape index: {}, may-alias: {8,10,15,17,21,23}]   ;;  %s5275_s16 = inlined_call_operand.vmem [shape: f32[1,64], index: 16, kind: input, shape index: {}, may-alias: {9,16,22}]   ;;  %s5276_s17 = inlined_call_operand.vmem [shape: f32[1,64], index: 17, kind: input, shape index: {}, may-alias: {8,10,15,17,21,23}]   ;;  %s5277_s18 = inlined_call_operand.vmem [shape: bf16[64,256], index: 18, kind: input, shape index: {}]   ;;  %s5278_s19 = inlined_call_operand.vmem [shape: f32[1,256], index: 19, kind: input, shape index: {}]   ;;  %s5279_s20 = inlined_call_operand.vmem [shape: bf16[256,64], index: 20, kind: input, shape index: {}]   ;;  %s5280_s21 = inlined_call_operand.vmem [shape: f32[1,64], index: 21, kind: input, shape index: {}, may-alias: {8,10,15,17,21,23}]   ;;  %s5281_s22 = inlined_call_operand.vmem [shape: f32[1,64], index: 22, kind: input, shape index: {}, may-alias: {9,16,22}]   ;;  %s5282_s23 = inlined_call_operand.vmem [shape: f32[1,64], index: 23, kind: input, shape index: {}, may-alias: {8,10,15,17,21,23}]   ;;  %s5283_s24 = inlined_call_operand.vmem [shape: f32[2,8,64], index: 24, kind: output, shape index: {}]  }
   0x1   :  { %5313 = sst [smem:[#allocation2_spill]] %s5259_s0 }
   0x2   :  { %5314 = sst [smem:[#allocation3_spill]] %s5260_s1 }
   0x3   :  { %5315 = sst [smem:[#allocation4_spill]] %s5261_s2 }
   0x4   :  { %5316 = sst [smem:[#allocation5_spill]] %s5262_s3 }
   0x5   :  { %5317 = sst [smem:[#allocation6_spill]] %s5263_s4 }
   0x6   :  { %5318 = sst [smem:[#allocation7_spill]] %s5264_s5  ;;  %s4544_s5 = smov 0  }
   0x7   :  { %5319 = sst [smem:[#allocation8_spill]] %s5265_s6 }
   0x8   :  { %5320 = sst [smem:[#allocation9_spill]] %s5266_s7 }
   0x9   :  { %5321 = sst [smem:[#allocation10_spill]] %s5267_s8 }
   0xa   :  { %5322 = sst [smem:[#allocation11_spill]] %s5268_s9 }
   0xb   :  { %5323 = sst [smem:[#allocation12_spill]] %s5269_s10 }
   0xc   :  { %5324 = sst [smem:[#allocation13_spill]] %s5270_s11 }
   0xd LB: > { %s3708_s26 = sadd.s32 4294967295, %s4400_s5   ;;  %p3712_p0 = scmp.ge.s32.totalorder %s4400_s5, 1  ;;  %s4400_s5 = sphi %s4544_s5, %s34_s5  }
   0xe   : > { %p678_p1 = scmp.lt.s32.totalorder %s4400_s5, 3 }
  0x10   : > { %p679_p2 = pnand %p3712_p0, %p678_p1 }
  0x11   : > { %s5325_s6 = sld [smem:[#allocation6_spill]] (!%p679_p2)  ;;  %v4402_v1 = vmov (!%p679_p2), 0.0   ;;  %vm4403_vm0 = vmmov (!%p679_p2), 0   ;;  %p749_p3 = scmp.lt.s32.totalorder (!%p679_p2), %s3708_s26, 1  ;;  %vm826_vm1 = vcmask (!%p679_p2), 523264   ;;  %vm1001_vm2 = vcmask (!%p679_p2), 64512  }
  0x12   : > { %682 = sbr.rel (%p679_p2) target bundleno = 4428 (0x114c), region = 116  ;;  %3950 = vmatprep.subr.bf16.mxu1 (!%p679_p2), %v4402_v1  ;;  %3974 = vmatprep.subr.bf16.mxu0 (!%p679_p2), %v4402_v1  ;;  %s5326_s8 = sld [smem:[#allocation2_spill]] (!%p679_p2)  ;;  %vm1066_vm3 = vcmask (!%p679_p2), 1043456   ;;  %vm1926_vm5 = vcmask (!%p679_p2), 130048   ;;  %vm1928_vm6 = vcmask (!%p679_p2), 195584   ;;  %vm1930_vm7 = vcmask (!%p679_p2), 261120  }
  0x13   : > { %3958 = vmatprep.mubr.msk.bf16.mxu1 (!%p679_p2), %vm4403_vm0, %v4402_v1  ;;  %3982 = vmatprep.mubr.msk.bf16.mxu0 (!%p679_p2), %vm4403_vm0, %v4402_v1  ;;  %s5327_s29 = sld [smem:[#allocation7_spill]] (!%p679_p2)  ;;  %s5328_s2 = sld [smem:[#allocation8_spill]] (!%p679_p2)  ;;  %vm1932_vm8 = vcmask (!%p679_p2), 326656   ;;  %vm1934_vm9 = vcmask (!%p679_p2), 392192   ;;  %vm1936_vm10 = vcmask (!%p679_p2), 457728  }
  0x14   : > { %s5298_s27 = smov (!%p679_p2), 112   ;;  %s5301_s28 = smov (!%p679_p2), 120  }
  0x15   : > { %s5296_s0 = smov (!%p679_p2), 104   ;;  %s5294_s7 = smov (!%p679_p2), 96  }
  0x16   : > { %s5292_s3 = smov (!%p679_p2), 88   ;;  %s5290_s25 = smov (!%p679_p2), 80  }
  0x17   : > { %v4263_v0 = vld [vmem:[%s5325_s6] sm:$0xff] (!%p679_p2)   ;;  %v4264_v2 = vld [vmem:[%s5325_s6 + $0x8] sm:$0xff] (!%p679_p2)   ;;  %v4265_v3 = vld [vmem:[%s5325_s6 + $0x10] sm:$0xff] (!%p679_p2)   ;;  %s5300_s1 = smov (!%p679_p2), 8   ;;  %s5335_s11 = sld [smem:[#allocation13_spill]] (!%p679_p2) }
  0x18   : > { %3951 = vmatpush3.bf16.msra.mxu1 (!%p679_p2), %v4263_v0  ;;  %v4266_v4 = vld [vmem:[%s5325_s6 + $0x18] sm:$0xff] (!%p679_p2)   ;;  %s5308_s6 = smov (!%p679_p2), 48   ;;  %s5341_s9 = sld [smem:[#allocation11_spill]] (!%p679_p2) }
  0x19   : > { %3952 = vmatprep.subr.bf16.mxu1 %v4402_v1  ;;  %s5352_s26 = smov (!%p749_p3, %s3708_s26), 1  ;;  %v4267_v6 = vld [vmem:[%s5327_s29] sm:$0xff]   ;;  %v4268_v8 = vld [vmem:[%s5327_s29 + $0x8] sm:$0xff]   ;;  %v4269_v9 = vld [vmem:[%s5327_s29 + $0x10] sm:$0xff]   ;;  %s5342_s10 = sld [smem:[#allocation12_spill]] }
  0x1a   : > { %s4571_s30 = sshll.u32 %s5352_s26, 3  ;;  %v4270_v10 = vld [vmem:[%s5327_s29 + $0x18] sm:$0xff]   ;;  %v4271_v11 = vld [vmem:[%s5328_s2] sm:$0xff]   ;;  %v4272_v12 = vld [vmem:[%s5328_s2 + $0x8] sm:$0xff]  }
  0x1b   : > { %s4578_s4 = scalar_lea.vmem %s5326_s8, %s4571_s30  ;;  %3975 = vmatpush3.bf16.msra.mxu0 %v4271_v11  ;;  %v4273_v13 = vld [vmem:[%s5328_s2 + $0x10] sm:$0xff]   ;;  %v4274_v14 = vld [vmem:[%s5328_s2 + $0x18] sm:$0xff]   ;;  %s5288_s8 = smov 72  }
  0x1c   : > { %3953 = vmatpush3.bf16.msra.mxu1 %v4264_v2  ;;  %v765_v5 = vld [vmem:[%s4578_s4] sm:$0xff]  ;;  %3976 = vmatprep.subr.bf16.mxu0 %v4402_v1  ;;  %s5333_s2 = sld [smem:[#allocation10_spill]] }
  0x1d   : > { %3954 = vmatprep.subr.bf16.mxu1 %v4402_v1  ;;  %v801_v7 = vpack.c.bf16 %v765_v5, %v765_v5 }
  0x1f   : > { %3977 = vmatpush3.bf16.msra.mxu0 %v4272_v12 }
  0x20   : > { %3955 = vmatpush3.bf16.msra.mxu1 %v4265_v3  ;;  %3978 = vmatprep.subr.bf16.mxu0 %v4402_v1 }
  0x21   : > { %3956 = vmatprep.subr.bf16.mxu1 %v4402_v1 }
  0x23   : > { %3979 = vmatpush3.bf16.msra.mxu0 %v4273_v13 }
  0x24   : > { %3957 = vmatpush3.bf16.msra.mxu1 %v4266_v4  ;;  %3980 = vmatprep.subr.bf16.mxu0 %v4402_v1 }
  0x25   : > { %3962 = vmatprep.subr.bf16.mxu1 %v4402_v1 }
  0x27   : > { %3959 = vmatmul.mubr.msk.bf16.vlgmr.msra.gmra.mrb[0].mxu1 %vm826_vm1, %v801_v7  ;;  %3981 = vmatpush3.bf16.msra.mxu0 %v4274_v14 }
  0x28   : > { %3963 = vmatpush3.bf16.msra.mxu1 %v4267_v6  ;;  %3970 = vmatprep.mubr.msk.bf16.mxu1 %vm4403_vm0, %v4402_v1 }
  0x29   : > { %3964 = vmatprep.subr.bf16.mxu1 %v4402_v1  ;;  %3998 = vmatprep.subr.bf16.mxu0 %v4402_v1 }
  0x2a   : > { %3983 = vmatmul.mubr.msk.bf16.vlgmr.msra.gmra.mrb[0].mxu0 %vm826_vm1, %v801_v7 }
  0x2b   : > { %4000 = vmatprep.mubr.msk.bf16.mxu0 %vm4403_vm0, %v4402_v1 }
  0x2c   : > { %3965 = vmatpush3.bf16.msra.mxu1 %v4268_v8 }
  0x2d   : > { %3966 = vmatprep.subr.bf16.mxu1 %v4402_v1 }
  0x30   : > { %3967 = vmatpush3.bf16.msra.mxu1 %v4269_v9 }
  0x31   : > { %3968 = vmatprep.subr.bf16.mxu1 %v4402_v1 }
  0x34   : > { %3969 = vmatpush3.bf16.msra.mxu1 %v4270_v10 }
  0x35   : > { %3986 = vmatprep.subr.bf16.mxu1 %v4402_v1 }
  0x37   : > { %3971 = vmatmul.mubr.msk.bf16.vlgmr.msra.gmra.mrb[4].mxu1 %vm826_vm1, %v801_v7 }
  0x38   : > { %3988 = vmatprep.mubr.msk.bf16.mxu1 %vm4403_vm0, %v4402_v1 }
  0xfa   : > { %v864_v15 = vpop.f32.mrb[0].mxu1 }
  0xfb   : > { %v3960_v16 = vpop.f32.mrb[1].mxu1  ;;  %v999_v25 = vpack.c.bf16 %v864_v15, %v864_v15 }
  0xfc   : > { %v867_v17 = vpop.f32.mrb[2].mxu1 }
  0xfd   : > { %v3961_v18 = vpop.f32.mrb[3].mxu1  ;;  %v992_v31 = vpop.f32.mrb[0].mxu0 }
  0xfe   : > { %v4653_v32 = vpack.c.bf16 %v992_v31, %v992_v31  ;;  %v3984_v33 = vpop.f32.mrb[1].mxu0 }
  0xff   : > { %v995_v34 = vpop.f32.mrb[2].mxu0 }
 0x100   : > { %v1068_v35 = vsel %vm1066_vm3, %v4653_v32, 0  ;;  %v3985_v37 = vpop.f32.mrb[3].mxu0 }
 0x10a   : > { %v928_v19 = vpop.f32.mrb[4].mxu1 }
 0x10b   : > { %v1000_v20 = vpack.c.bf16 %v928_v19, %v928_v19  ;;  %v3972_v21 = vpop.f32.mrb[5].mxu1 }
 0x10c   : > { %v931_v22 = vpop.f32.mrb[6].mxu1 }
 0x10d   : > { %1227 = vrot.lane.b32.xlu1 %v1000_v20, %s5298_s27  ;;  %1114 = vrot.lane.b32.xlu0 %v1000_v20, %s5301_s28  ;;  %v3973_v23 = vpop.f32.mrb[7].mxu1  ;;  %v1006_v24 = vsel %vm1001_vm2, %v1000_v20, 0 }
 0x10e   : > { %3987 = vmatpush3.bf16.xpose.msra.mxu1 %v1006_v24 }
 0x10f   : > { %3992 = vmatprep.subr.bf16.mxu1 %v4402_v1 }
 0x111   : > { %1225 = vrot.lane.b32.xlu1 %v999_v25, %s5298_s27  ;;  %1111 = vrot.lane.b32.xlu0 %v999_v25, %s5301_s28 }
 0x115   : > { %1337 = vrot.lane.b32.xlu1 %v999_v25, %s5296_s0  ;;  %1339 = vrot.lane.b32.xlu0 %v1000_v20, %s5296_s0 }
 0x116   : > { %3989 = vmatmul.mubr.msk.bf16.vlgmr.msra.gmra.mrb[8].mxu1 %vm1001_vm2, %v999_v25 }
 0x117   : > { %3994 = vmatprep.mubr.msk.bf16.mxu1 %vm4403_vm0, %v4402_v1  ;;  %3993 = vmatpush3.bf16.msra.mxu1 %v1068_v35 }
 0x118   : > { %4004 = vmatprep.subr.bf16.mxu1 %v4402_v1 }
 0x119   : > { %1449 = vrot.lane.b32.xlu1 %v999_v25, %s5294_s7  ;;  %1451 = vrot.lane.b32.xlu0 %v1000_v20, %s5294_s7 }
 0x11d   : > { %1561 = vrot.lane.b32.xlu1 %v999_v25, %s5292_s3  ;;  %1563 = vrot.lane.b32.xlu0 %v1000_v20, %s5292_s3 }
 0x121   : > { %1673 = vrot.lane.b32.xlu1 %v999_v25, %s5290_s25  ;;  %1675 = vrot.lane.b32.xlu0 %v1000_v20, %s5290_s25  ;;  %s5329_s25 = sld [smem:[#allocation4_spill]] }
 0x125   : > { %1785 = vrot.lane.b32.xlu1 %v999_v25, %s5288_s8  ;;  %1787 = vrot.lane.b32.xlu0 %v1000_v20, %s5288_s8  ;;  %s5331_s8 = smov 72  }
 0x127   : > { %v4689_v53 = vld [vmem:[%s5329_s25] sm:$0xff]  ;;  %s5330_s25 = smov 80  }
 0x128   : > { %vm998_vm4 = vcmp.ne.s32.totalorder %v4689_v53, 0 }
 0x17f   : > { %v1115_v26 = vpop.permute.xlu0 %1114  ;;  %v1228_v28 = vpop.permute.xlu1 %1227 }
 0x180   : > { %v1120_v27 = vsel %vm1001_vm2, %v1115_v26, 0  ;;  %v1233_v30 = vsel %vm1001_vm2, %v1228_v28, 0 }
 0x181   : > { %3999 = vmatpush3.bf16.xpose.msra.mxu0 %v1120_v27 }
 0x182   : > { %4010 = vmatprep.subr.bf16.mxu0 %v4402_v1 }
 0x183   : > { %v1112_v29 = vpop.permute.xlu0 %1111  ;;  %v1226_v38 = vpop.permute.xlu1 %1225 }
 0x187   : > { %v1340_v36 = vpop.permute.xlu0 %1339  ;;  %v1338_v41 = vpop.permute.xlu1 %1337 }
 0x188   : > { %4001 = vmatmul.mubr.msk.bf16.vlgmr.msra.gmra.mrb[4].mxu0 %vm1001_vm2, %v1112_v29  ;;  %v1345_v39 = vsel %vm1001_vm2, %v1340_v36, 0 }
 0x189   : > { %4011 = vmatpush3.bf16.xpose.msra.mxu0 %v1233_v30  ;;  %4012 = vmatprep.mubr.msk.bf16.mxu0 %vm4403_vm0, %v4402_v1 }
 0x18a   : > { %4022 = vmatprep.subr.bf16.mxu0 %v4402_v1 }
 0x18b   : > { %v1452_v40 = vpop.permute.xlu0 %1451  ;;  %v1450_v44 = vpop.permute.xlu1 %1449 }
 0x18c   : > { %v1457_v42 = vsel %vm1001_vm2, %v1452_v40, 0 }
 0x18f   : > { %v1564_v43 = vpop.permute.xlu0 %1563  ;;  %v1562_v47 = vpop.permute.xlu1 %1561 }
 0x190   : > { %4013 = vmatmul.mubr.msk.bf16.vlgmr.msra.gmra.mrb[8].mxu0 %vm1001_vm2, %v1226_v38  ;;  %v1569_v45 = vsel %vm1001_vm2, %v1564_v43, 0 }
 0x191   : > { %4023 = vmatpush3.bf16.xpose.msra.mxu0 %v1345_v39  ;;  %4024 = vmatprep.mubr.msk.bf16.mxu0 %vm4403_vm0, %v4402_v1 }
 0x192   : > { %4034 = vmatprep.subr.bf16.mxu0 %v4402_v1 }
 0x193   : > { %v1676_v46 = vpop.permute.xlu0 %1675  ;;  %v1674_v50 = vpop.permute.xlu1 %1673 }
 0x194   : > { %v1681_v48 = vsel %vm1001_vm2, %v1676_v46, 0 }
 0x197   : > { %v1788_v49 = vpop.permute.xlu0 %1787  ;;  %v1786_v52 = vpop.permute.xlu1 %1785 }
 0x198   : > { %4025 = vmatmul.mubr.msk.bf16.vlgmr.msra.gmra.mrb[12].mxu0 %vm1001_vm2, %v1338_v41  ;;  %v1793_v51 = vsel %vm1001_vm2, %v1788_v49, 0 }
 0x199   : > { %4035 = vmatpush3.bf16.xpose.msra.mxu0 %v1457_v42  ;;  %4036 = vmatprep.mubr.msk.bf16.mxu0 %vm4403_vm0, %v4402_v1 }
 0x19a   : > { %4046 = vmatprep.subr.bf16.mxu0 %v4402_v1 }
 0x1a0   : > { %4037 = vmatmul.mubr.msk.bf16.vlgmr.msra.gmra.mrb[16].mxu0 %vm1001_vm2, %v1450_v44 }
 0x1a1   : > { %4047 = vmatpush3.bf16.xpose.msra.mxu0 %v1569_v45  ;;  %4048 = vmatprep.mubr.msk.bf16.mxu0 %vm4403_vm0, %v4402_v1 }
 0x1a2   : > { %4058 = vmatprep.subr.bf16.mxu0 %v4402_v1 }
 0x1a8   : > { %4049 = vmatmul.mubr.msk.bf16.vlgmr.msra.gmra.mrb[20].mxu0 %vm1001_vm2, %v1562_v47 }
 0x1a9   : > { %4059 = vmatpush3.bf16.xpose.msra.mxu0 %v1681_v48  ;;  %4060 = vmatprep.mubr.msk.bf16.mxu0 %vm4403_vm0, %v4402_v1 }
 0x1aa   : > { %4070 = vmatprep.subr.bf16.mxu0 %v4402_v1 }
 0x1b0   : > { %4061 = vmatmul.mubr.msk.bf16.vlgmr.msra.gmra.mrb[24].mxu0 %vm1001_vm2, %v1674_v50 }
 0x1b1   : > { %4071 = vmatpush3.bf16.xpose.msra.mxu0 %v1793_v51  ;;  %4072 = vmatprep.mubr.msk.bf16.mxu0 %vm4403_vm0, %v4402_v1 }
 0x1b2   : > { %4082 = vmatprep.subr.bf16.mxu0 %v4402_v1 }
 0x1b8   : > { %4073 = vmatmul.mubr.msk.bf16.vlgmr.msra.gmra.mrb[28].mxu0 %vm1001_vm2, %v1786_v52 }
 0x1b9   : > { %4090 = vmatprep.mubr.msk.bf16.mxu0 %vm4403_vm0, %v4402_v1 }
 0x1e9   : > { %v1042_v54 = vpop.f32.mrb[8].mxu1 }
 0x1ea   : > { %v1048_v55 = vsel %vm998_vm4, %v1042_v54, -1e+20  ;;  %v3990_v56 = vpop.f32.mrb[9].mxu1 }
 0x1eb   : > { %v1049_v57 = vmul.f32 0.125, %v1048_v55  ;;  %v1045_v58 = vpop.f32.mrb[10].mxu1 }
 0x1ec   : > { %v3991_v59 = vpop.f32.mrb[11].mxu1 }
 0x1ed   : > { %v1050_v60 = vsel %vm1001_vm2, %v1049_v57, -inf }
 0x1ee   : > { %1051 = vmax.xlane.f32.xlu0 %v1050_v60 }
 0x25b   : > { %v1156_v61 = vpop.f32.mrb[4].mxu0 }
 0x25c   : > { %v1162_v62 = vsel %vm998_vm4, %v1156_v61, -1e+20  ;;  %v4002_v63 = vpop.f32.mrb[5].mxu0 }
 0x25d   : > { %v4697_v0 = vmul.f32 0.125, %v1162_v62  ;;  %v1159_v2 = vpop.f32.mrb[6].mxu0 }
 0x25e   : > { %v4003_v3 = vpop.f32.mrb[7].mxu0 }
 0x25f   : > { %v1164_v4 = vsel %vm1001_vm2, %v4697_v0, -inf }
 0x260   : > { %1165 = vmax.xlane.f32.xlu1 %v1164_v4 }
 0x263   : > { %v1269_v5 = vpop.f32.mrb[8].mxu0 }
 0x264   : > { %v1275_v6 = vsel %vm998_vm4, %v1269_v5, -1e+20  ;;  %v4014_v7 = vpop.f32.mrb[9].mxu0 }
 0x265   : > { %v1276_v8 = vmul.f32 0.125, %v1275_v6  ;;  %v1272_v9 = vpop.f32.mrb[10].mxu0 }
 0x266   : > { %v4015_v10 = vpop.f32.mrb[11].mxu0 }
 0x267   : > { %v1277_v11 = vsel %vm1001_vm2, %v1276_v8, -inf }
 0x268   : > { %1278 = vmax.xlane.f32.xlu0 %v1277_v11 }
 0x26b   : > { %v1381_v12 = vpop.f32.mrb[12].mxu0 }
 0x26c   : > { %v1387_v13 = vsel %vm998_vm4, %v1381_v12, -1e+20  ;;  %v4026_v14 = vpop.f32.mrb[13].mxu0 }
 0x26d   : > { %v1388_v15 = vmul.f32 0.125, %v1387_v13  ;;  %v1384_v16 = vpop.f32.mrb[14].mxu0 }
 0x26e   : > { %v4027_v17 = vpop.f32.mrb[15].mxu0 }
 0x26f   : > { %v1389_v18 = vsel %vm1001_vm2, %v1388_v15, -inf }
 0x270   : > { %1390 = vmax.xlane.f32.xlu0 %v1389_v18 }
 0x273   : > { %v1493_v19 = vpop.f32.mrb[16].mxu0 }
 0x274   : > { %v1499_v20 = vsel %vm998_vm4, %v1493_v19, -1e+20  ;;  %v4038_v21 = vpop.f32.mrb[17].mxu0 }
 0x275   : > { %v4709_v22 = vmul.f32 0.125, %v1499_v20  ;;  %v1496_v23 = vpop.f32.mrb[18].mxu0 }
 0x276   : > { %v4039_v24 = vpop.f32.mrb[19].mxu0 }
 0x277   : > { %v1501_v25 = vsel %vm1001_vm2, %v4709_v22, -inf }
 0x278   : > { %1502 = vmax.xlane.f32.xlu1 %v1501_v25 }
 0x27b   : > { %v1052_v26 = vpop.xlane.xlu0 %1051  ;;  %v1605_v27 = vpop.f32.mrb[20].mxu0 }
 0x27c   : > { %v1053_v28 = vsub.f32 %v1049_v57, %v1052_v26  ;;  %v1611_v29 = vsel %vm998_vm4, %v1605_v27, -1e+20  ;;  %v4050_v30 = vpop.f32.mrb[21].mxu0 }
 0x27d   : > { %v4715_v31 = vmul.f32 0.125, %v1611_v29  ;;  %v1608_v33 = vpop.f32.mrb[22].mxu0 }
 0x27e   : > { %v1054_v34 = vmul.f32 1.442695, %v1053_v28  ;;  %v4051_v35 = vpop.f32.mrb[23].mxu0 }
 0x27f   : > { %v1613_v36 = vsel %vm1001_vm2, %v4715_v31, -inf }
 0x280   : > { %4323 = vpow2.f32 %v1054_v34  ;;  %1614 = vmax.xlane.f32.xlu0 %v1613_v36 }
 0x283   : > { %v1717_v37 = vpop.f32.mrb[24].mxu0 }
 0x284   : > { %v1723_v38 = vsel %vm998_vm4, %v1717_v37, -1e+20  ;;  %v4062_v39 = vpop.f32.mrb[25].mxu0 }
 0x285   : > { %v4721_v40 = vmul.f32 0.125, %v1723_v38  ;;  %v1720_v41 = vpop.f32.mrb[26].mxu0 }
 0x286   : > { %v4063_v42 = vpop.f32.mrb[27].mxu0 }
 0x287   : > { %v1725_v43 = vsel %vm1001_vm2, %v4721_v40, -inf }
 0x288   : > { %1726 = vmax.xlane.f32.xlu1 %v1725_v43 }
 0x28a   : > { %v4324_v44 = vpop.eup %4323 }
 0x28b   : > { %v1829_v45 = vpop.f32.mrb[28].mxu0  ;;  %v1056_v46 = vsel %vm1001_vm2, %v4324_v44, 0.0 }
 0x28c   : > { %v1835_v47 = vsel %vm998_vm4, %v1829_v45, -1e+20  ;;  %v4074_v48 = vpop.f32.mrb[29].mxu0  ;;  %1057 = vadd.xlane.f32.xlu1 %v1056_v46 }
 0x28d   : > { %v1836_v49 = vmul.f32 0.125, %v1835_v47  ;;  %v1832_v50 = vpop.f32.mrb[30].mxu0 }
 0x28e   : > { %v4075_v51 = vpop.f32.mrb[31].mxu0 }
 0x28f   : > { %v1837_v52 = vsel %vm1001_vm2, %v1836_v49, -inf }
 0x290   : > { %1838 = vmax.xlane.f32.xlu0 %v1837_v52 }
 0x29d   : > { %1289 = vrot.lane.b32.xlu1 %v4653_v32, %s5298_s27  ;;  %s5309_s27 = smov 40  }
 0x2a6   : > { %1177 = vrot.lane.b32.xlu0 %v4653_v32, %s5301_s28  ;;  %s5310_s28 = smov 32  }
 0x2ed   : > { %v1166_v54 = vpop.xlane.xlu1 %1165 }
 0x2ee   : > { %v1167_v55 = vsub.f32 %v4697_v0, %v1166_v54 }
 0x2f0   : > { %v1168_v56 = vmul.f32 1.442695, %v1167_v55 }
 0x2f2   : > { %4325 = vpow2.f32 %v1168_v56 }
 0x2f5   : > { %v1279_v53 = vpop.xlane.xlu0 %1278 }
 0x2f6   : > { %v1280_v57 = vsub.f32 %v1276_v8, %v1279_v53 }
 0x2f8   : > { %v1281_v58 = vmul.f32 1.442695, %v1280_v57 }
 0x2fa   : > { %4327 = vpow2.f32 %v1281_v58 }
 0x2fc   : > { %v4734_v59 = vpop.eup %4325 }
 0x2fd   : > { %v1391_v60 = vpop.xlane.xlu0 %1390  ;;  %v1170_v61 = vsel %vm1001_vm2, %v4734_v59, 0.0 }
 0x2fe   : > { %v1392_v62 = vsub.f32 %v1388_v15, %v1391_v60  ;;  %1171 = vadd.xlane.f32.xlu0 %v1170_v61 }
 0x300   : > { %v1393_v63 = vmul.f32 1.442695, %v1392_v62 }
 0x302   : > { %4329 = vpow2.f32 %v1393_v63 }
 0x304   : > { %v4738_v2 = vpop.eup %4327 }
 0x305   : > { %v1283_v0 = vsel %vm1001_vm2, %v4738_v2, 0.0  ;;  %v1503_v5 = vpop.xlane.xlu1 %1502 }
 0x306   : > { %1284 = vadd.xlane.f32.xlu1 %v1283_v0  ;;  %v1504_v11 = vsub.f32 %v4709_v22, %v1503_v5 }
 0x308   : > { %v1505_v15 = vmul.f32 1.442695, %v1504_v11 }
 0x30c   : > { %v4742_v3 = vpop.eup %4329 }
 0x30d   : > { %v1395_v4 = vsel %vm1001_vm2, %v4742_v3, 0.0  ;;  %v1615_v8 = vpop.xlane.xlu0 %1614 }
 0x30e   : > { %1396 = vadd.xlane.f32.xlu0 %v1395_v4  ;;  %v1616_v16 = vsub.f32 %v4715_v31, %v1615_v8 }
 0x310   : > { %v1617_v19 = vmul.f32 1.442695, %v1616_v16 }
 0x315   : > { %v1727_v6 = vpop.xlane.xlu1 %1726 }
 0x316   : > { %v1728_v18 = vsub.f32 %v4721_v40, %v1727_v6 }
 0x317   : > { %1401 = vrot.lane.b32.xlu1 %v4653_v32, %s5296_s0  ;;  %s5348_s0 = smov 40  }
 0x318   : > { %v1729_v21 = vmul.f32 1.442695, %v1728_v18 }
 0x319   : > { %v1058_v7 = vpop.xlane.xlu1 %1057 }
 0x31a   : > { %4331 = vrcp.f32 %v1058_v7 }
 0x31b   : > { %4333 = vpow2.f32 %v1505_v15 }
 0x31c   : > { %4335 = vpow2.f32 %v1617_v19 }
 0x31d   : > { %v1839_v9 = vpop.xlane.xlu0 %1838  ;;  %4337 = vpow2.f32 %v1729_v21  ;;  %v1290_v33 = vpop.permute.xlu1 %1289 }
 0x31e   : > { %v1840_v20 = vsub.f32 %v1836_v49, %v1839_v9  ;;  %v1295_v38 = vsel %vm1066_vm3, %v1290_v33, 0 }
 0x320   : > { %v1841_v22 = vmul.f32 1.442695, %v1840_v20 }
 0x321   : > { %v1178_v13 = vpop.permute.xlu0 %1177 }
 0x322   : > { %v1183_v17 = vsel %vm1066_vm3, %v1178_v13, 0  ;;  %4339 = vpow2.f32 %v1841_v22 }
 0x324   : > { %1513 = vrot.lane.b32.xlu0 %v4653_v32, %s5294_s7  ;;  %v4332_v10 = vpop.eup %4331  ;;  %s5305_s7 = smov 24  }
 0x325   : > { %v1060_v12 = vmul.f32 %v4332_v10, %v4324_v44  ;;  %v4334_v23 = vpop.eup %4333 }
 0x326   : > { %v1507_v24 = vsel %vm1001_vm2, %v4334_v23, 0.0  ;;  %v4336_v25 = vpop.eup %4335 }
 0x327   : > { %v1061_v14 = vpack.c.bf16 %v1060_v12, %v1060_v12  ;;  %v4759_v26 = vpop.eup %4337  ;;  %v1619_v27 = vsel %vm1001_vm2, %v4336_v25, 0.0 }
 0x328   : > { %v1731_v29 = vsel %vm1001_vm2, %v4759_v26, 0.0 }
 0x329   : > { %3995 = vmatmul.mubr.msk.bf16.vlgmr.msra.gmra.mrb[12].mxu1 %vm1001_vm2, %v1061_v14 }
 0x32a   : > { %4005 = vmatpush3.bf16.msra.mxu1 %v1183_v17  ;;  %4006 = vmatprep.mubr.msk.bf16.mxu1 %vm4403_vm0, %v4402_v1 }
 0x32b   : > { %4016 = vmatprep.subr.bf16.mxu1 %v4402_v1 }
 0x32c   : > { %v4762_v28 = vpop.eup %4339 }
 0x32d   : > { %v1843_v30 = vsel %vm1001_vm2, %v4762_v28, 0.0 }
 0x33b   : > { %1508 = vadd.xlane.f32.xlu1 %v1507_v24 }
 0x33f   : > { %1620 = vadd.xlane.f32.xlu1 %v1619_v27 }
 0x343   : > { %1732 = vadd.xlane.f32.xlu0 %v1731_v29  ;;  %1844 = vadd.xlane.f32.xlu1 %v1843_v30 }
 0x354   : > { %1625 = vrot.lane.b32.xlu1 %v4653_v32, %s5292_s3  ;;  %s5303_s3 = smov 16  }
 0x359   : > { %1737 = vrot.lane.b32.xlu0 %v4653_v32, %s5330_s25 }
 0x35d   : > { %1849 = vrot.lane.b32.xlu0 %v4653_v32, %s5331_s8 }
 0x38b   : > { %v1172_v31 = vpop.xlane.xlu0 %1171 }
 0x38c   : > { %4341 = vrcp.f32 %v1172_v31 }
 0x393   : > { %v1285_v34 = vpop.xlane.xlu1 %1284 }
 0x394   : > { %4343 = vrcp.f32 %v1285_v34 }
 0x396   : > { %v4342_v35 = vpop.eup %4341 }
 0x397   : > { %v1174_v36 = vmul.f32 %v4342_v35, %v4734_v59  ;;  %v1402_v41 = vpop.permute.xlu1 %1401 }
 0x398   : > { %v1407_v43 = vsel %vm1066_vm3, %v1402_v41, 0 }
 0x399   : > { %v1175_v37 = vpack.c.bf16 %v1174_v36, %v1174_v36 }
 0x39b   : > { %4007 = vmatmul.mubr.msk.bf16.vlgmr.msra.gmra.mrb[16].mxu1 %vm1001_vm2, %v1175_v37  ;;  %v1397_v39 = vpop.xlane.xlu0 %1396 }
 0x39c   : > { %4017 = vmatpush3.bf16.msra.mxu1 %v1295_v38  ;;  %4345 = vrcp.f32 %v1397_v39  ;;  %4018 = vmatprep.mubr.msk.bf16.mxu1 %vm4403_vm0, %v4402_v1 }
 0x39d   : > { %4028 = vmatprep.subr.bf16.mxu1 %v4402_v1 }
 0x39e   : > { %v4344_v32 = vpop.eup %4343 }
 0x39f   : > { %v1287_v40 = vmul.f32 %v4344_v32, %v4738_v2  ;;  %v1514_v46 = vpop.permute.xlu0 %1513 }
 0x3a0   : > { %v1519_v48 = vsel %vm1066_vm3, %v1514_v46, 0 }
 0x3a1   : > { %v1288_v42 = vpack.c.bf16 %v1287_v40, %v1287_v40 }
 0x3a3   : > { %4019 = vmatmul.mubr.msk.bf16.vlgmr.msra.gmra.mrb[20].mxu1 %vm1001_vm2, %v1288_v42 }
 0x3a4   : > { %4029 = vmatpush3.bf16.msra.mxu1 %v1407_v43  ;;  %4030 = vmatprep.mubr.msk.bf16.mxu1 %vm4403_vm0, %v4402_v1 }
 0x3a5   : > { %4040 = vmatprep.subr.bf16.mxu1 %v4402_v1 }
 0x3a6   : > { %v4346_v44 = vpop.eup %4345 }
 0x3a7   : > { %v1399_v45 = vmul.f32 %v4346_v44, %v4742_v3 }
 0x3a9   : > { %v1400_v47 = vpack.c.bf16 %v1399_v45, %v1399_v45 }
 0x3ab   : > { %4031 = vmatmul.mubr.msk.bf16.vlgmr.msra.gmra.mrb[24].mxu1 %vm1001_vm2, %v1400_v47 }
 0x3ac   : > { %4041 = vmatpush3.bf16.msra.mxu1 %v1519_v48  ;;  %4042 = vmatprep.mubr.msk.bf16.mxu1 %vm4403_vm0, %v4402_v1 }
 0x3ad   : > { %4052 = vmatprep.subr.bf16.mxu1 %v4402_v1 }
 0x3c8   : > { %v1509_v49 = vpop.xlane.xlu1 %1508 }
 0x3c9   : > { %4347 = vrcp.f32 %v1509_v49 }
 0x3cc   : > { %v1621_v50 = vpop.xlane.xlu1 %1620 }
 0x3cd   : > { %4349 = vrcp.f32 %v1621_v50 }
 0x3d0   : > { %v1845_v51 = vpop.xlane.xlu1 %1844  ;;  %v1733_v52 = vpop.xlane.xlu0 %1732 }
 0x3d1   : > { %4351 = vrcp.f32 %v1733_v52 }
 0x3d2   : > { %4353 = vrcp.f32 %v1845_v51 }
 0x3d3   : > { %v4348_v54 = vpop.eup %4347 }
 0x3d4   : > { %v1511_v55 = vmul.f32 %v4348_v54, %v4334_v23  ;;  %v1626_v56 = vpop.permute.xlu1 %1625  ;;  %v1738_v60 = vpop.permute.xlu0 %1737 }
 0x3d5   : > { %v1631_v58 = vsel %vm1066_vm3, %v1626_v56, 0  ;;  %v1743_v63 = vsel %vm1066_vm3, %v1738_v60, 0 }
 0x3d6   : > { %v1512_v53 = vpack.c.bf16 %v1511_v55, %v1511_v55 }
 0x3d7   : > { %v4350_v57 = vpop.eup %4349 }
 0x3d8   : > { %4043 = vmatmul.mubr.msk.bf16.vlgmr.msra.gmra.mrb[28].mxu1 %vm1001_vm2, %v1512_v53  ;;  %v1623_v59 = vmul.f32 %v4350_v57, %v4336_v25  ;;  %v1850_v0 = vpop.permute.xlu0 %1849 }
 0x3d9   : > { %4053 = vmatpush3.bf16.msra.mxu1 %v1631_v58  ;;  %4054 = vmatprep.mubr.msk.bf16.mxu1 %vm4403_vm0, %v4402_v1  ;;  %v1855_v5 = vsel %vm1066_vm3, %v1850_v0, 0  ;;  %v4393_v0 = vld [vmem:[%s4578_s4] sm:$0xff] }
 0x3da   : > { %4064 = vmatprep.subr.bf16.mxu1 %v4402_v1  ;;  %v1624_v61 = vpack.c.bf16 %v1623_v59, %v1623_v59  ;;  %v3747_v59 = vld [vmem:[%s5333_s2] ss:$0 sm:$0xff] }
 0x3db   : > { %v4352_v62 = vpop.eup %4351 }
 0x3dc   : > { %v1735_v2 = vmul.f32 %v4352_v62, %v4759_v26  ;;  %v4354_v4 = vpop.eup %4353 }
 0x3dd   : > { %v1847_v6 = vmul.f32 %v4354_v4, %v4762_v28 }
 0x3de   : > { %v1736_v3 = vpack.c.bf16 %v1735_v2, %v1735_v2 }
 0x3df   : > { %v1848_v7 = vpack.c.bf16 %v1847_v6, %v1847_v6  ;;  %v4280_v6 = vld [vmem:[%s5271_s12 + $0x8] sm:$0xff]  }
 0x3e0   : > { %4055 = vmatmul.mubr.msk.bf16.vlgmr.msra.gmra.mrb[32].mxu1 %vm1001_vm2, %v1624_v61 }
 0x3e1   : > { %4065 = vmatpush3.bf16.msra.mxu1 %v1743_v63  ;;  %4066 = vmatprep.mubr.msk.bf16.mxu1 %vm4403_vm0, %v4402_v1 }
 0x3e2   : > { %4076 = vmatprep.subr.bf16.mxu1 %v4402_v1 }
 0x3e8   : > { %4067 = vmatmul.mubr.msk.bf16.vlgmr.msra.gmra.mrb[36].mxu1 %vm1001_vm2, %v1736_v3 }
 0x3e9   : > { %4077 = vmatpush3.bf16.msra.mxu1 %v1855_v5  ;;  %4078 = vmatprep.mubr.msk.bf16.mxu1 %vm4403_vm0, %v4402_v1  ;;  %v4279_v5 = vld [vmem:[%s5271_s12] sm:$0xff]  }
 0x3ea   : > { %4094 = vmatprep.subr.bf16.mxu1 %v4402_v1 }
 0x3f0   : > { %4079 = vmatmul.mubr.msk.bf16.vlgmr.msra.gmra.mrb[40].mxu1 %vm1001_vm2, %v1848_v7  ;;  %v4281_v7 = vld [vmem:[%s5271_s12 + $0x10] sm:$0xff]  }
 0x3f1   : > { %4102 = vmatprep.mubr.msk.bf16.mxu1 %vm4403_vm0, %v4402_v1 }
 0x3fc   : > { %v4812_v8 = vpop.f32.mrb[12].mxu1 }
 0x3fd   : > { %v3996_v9 = vpop.f32.mrb[13].mxu1 }
 0x3fe   : > { %v1107_v10 = vpop.f32.mrb[14].mxu1 }
 0x3ff   : > { %v3997_v11 = vpop.f32.mrb[15].mxu1 }
 0x46e   : > { %v1219_v12 = vpop.f32.mrb[16].mxu1 }
 0x46f   : > { %1898 = vrot.lane.b32.xlu1 %v1219_v12, %s5300_s1  ;;  %v4008_v13 = vpop.f32.mrb[17].mxu1  ;;  %s5332_s1 = sld [smem:[#allocation9_spill]] }
 0x470   : > { %v1222_v14 = vpop.f32.mrb[18].mxu1 }
 0x471   : > { %v4009_v15 = vpop.f32.mrb[19].mxu1 }
 0x475   : > { %v4275_v24 = vld [vmem:[%s5332_s1] sm:$0xff]   ;;  %v4276_v29 = vld [vmem:[%s5332_s1 + $0x8] sm:$0xff]   ;;  %v4277_v30 = vld [vmem:[%s5332_s1 + $0x10] sm:$0xff]  }
 0x476   : > { %v1331_v16 = vpop.f32.mrb[20].mxu1  ;;  %4083 = vmatpush3.bf16.msra.mxu0 %v4275_v24  ;;  %v4278_v36 = vld [vmem:[%s5332_s1 + $0x18] sm:$0xff]   ;;  %s5334_s1 = sld [smem:[#allocation3_spill]] }
 0x477   : > { %1902 = vrot.lane.b32.xlu0 %v1331_v16, %s5303_s3  ;;  %v4020_v17 = vpop.f32.mrb[21].mxu1  ;;  %4084 = vmatprep.subr.bf16.mxu0 %v4402_v1  ;;  %v4283_v16 = vld [vmem:[%s5335_s11] sm:$0xff]  }
 0x478   : > { %v1334_v18 = vpop.f32.mrb[22].mxu1  ;;  %4095 = vmatpush3.bf16.msra.mxu1 %v4283_v16  ;;  %v4284_v17 = vld [vmem:[%s5335_s11 + $0x8] sm:$0xff]  }
 0x479   : > { %v4021_v19 = vpop.f32.mrb[23].mxu1  ;;  %4096 = vmatprep.subr.bf16.mxu1 %v4402_v1  ;;  %v4285_v18 = vld [vmem:[%s5335_s11 + $0x10] sm:$0xff]  }
 0x47a   : > { %4085 = vmatpush3.bf16.msra.mxu0 %v4276_v29  ;;  %v4286_v19 = vld [vmem:[%s5335_s11 + $0x18] sm:$0xff]   ;;  %s5343_s11 = sld [smem:[#allocation5_spill]] }
 0x47b   : > { %4086 = vmatprep.subr.bf16.mxu0 %v4402_v1 }
 0x47c   : > { %s756_s29 = scalar_lea.vmem %s5334_s1, %s4571_s30  ;;  %4097 = vmatpush3.bf16.msra.mxu1 %v4284_v17  ;;  %s5340_s1 = smov 88  }
 0x47d   : > { %v766_v9 = vld [vmem:[%s756_s29] sm:$0xff]  ;;  %4098 = vmatprep.subr.bf16.mxu1 %v4402_v1  ;;  %s5338_s29 = smov 104  }
 0x47e   : > { %v1443_v20 = vpop.f32.mrb[24].mxu1  ;;  %4087 = vmatpush3.bf16.msra.mxu0 %v4277_v30  ;;  %v4872_v10 = vpack.c.bf16 %v766_v9, %v766_v9  ;;  %v3753_v30 = vld [vmem:[%s5341_s9] ss:$0 sm:$0xff] }
 0x47f   : > { %1906 = vrot.lane.b32.xlu1 %v1443_v20, %s5305_s7  ;;  %v4032_v21 = vpop.f32.mrb[25].mxu1  ;;  %4088 = vmatprep.subr.bf16.mxu0 %v4402_v1  ;;  %s5307_s7 = smov 56  }
 0x480   : > { %v1446_v22 = vpop.f32.mrb[26].mxu1  ;;  %4099 = vmatpush3.bf16.msra.mxu1 %v4285_v18  ;;  %s759_s2 = scalar_lea.vmem %s5343_s11, %s5352_s26  ;;  %s5344_s26 = smov 8  }
 0x481   : > { %v4033_v23 = vpop.f32.mrb[27].mxu1  ;;  %4100 = vmatprep.subr.bf16.mxu1 %v4402_v1  ;;  %s5350_s11 = smov 56  }
 0x482   : > { %4089 = vmatpush3.bf16.msra.mxu0 %v4278_v36 }
 0x483   : > { %4106 = vmatprep.subr.bf16.mxu0 %v4402_v1 }
 0x484   : > { %4101 = vmatpush3.bf16.msra.mxu1 %v4286_v19 }
 0x485   : > { %4118 = vmatprep.subr.bf16.mxu1 %v4402_v1 }
 0x4ab   : > { %v1555_v25 = vpop.f32.mrb[28].mxu1 }
 0x4ac   : > { %1910 = vrot.lane.b32.xlu0 %v1555_v25, %s5310_s28  ;;  %v4044_v26 = vpop.f32.mrb[29].mxu1  ;;  %s5339_s28 = smov 96  }
 0x4ad   : > { %v1558_v27 = vpop.f32.mrb[30].mxu1 }
 0x4ae   : > { %v4045_v28 = vpop.f32.mrb[31].mxu1 }
 0x4b3   : > { %v1667_v31 = vpop.f32.mrb[32].mxu1 }
 0x4b4   : > { %1914 = vrot.lane.b32.xlu1 %v1667_v31, %s5309_s27  ;;  %v4056_v33 = vpop.f32.mrb[33].mxu1 }
 0x4b5   : > { %v1670_v34 = vpop.f32.mrb[34].mxu1  ;;  %v3754_v33 = vld [vmem:[%s5342_s10] ss:$0 sm:$0xff]  ;;  %s5349_s10 = smov 48  }
 0x4b6   : > { %v4057_v35 = vpop.f32.mrb[35].mxu1 }
 0x4bb   : > { %v1779_v37 = vpop.f32.mrb[36].mxu1 }
 0x4bc   : > { %1918 = vrot.lane.b32.xlu0 %v1779_v37, %s5308_s6  ;;  %v4068_v38 = vpop.f32.mrb[37].mxu1  ;;  %s5336_s6 = smov 120  }
 0x4bd   : > { %v1782_v39 = vpop.f32.mrb[38].mxu1 }
 0x4be   : > { %v4069_v32 = vpop.f32.mrb[39].mxu1 }
 0x4c3   : > { %v1891_v40 = vpop.f32.mrb[40].mxu1 }
 0x4c4   : > { %1922 = vrot.lane.b32.xlu1 %v1891_v40, %s5307_s7  ;;  %v4080_v41 = vpop.f32.mrb[41].mxu1  ;;  %s5337_s7 = smov 112  }
 0x4c5   : > { %v1894_v42 = vpop.f32.mrb[42].mxu1 }
 0x4c6   : > { %v4081_v43 = vpop.f32.mrb[43].mxu1 }
 0x4c7   : > { %v4287_v43 = vld [vmem:[%s5272_s13] sm:$0xff]  }
 0x4e1   : > { %v1899_v44 = vpop.permute.xlu1 %1898 }
 0x4e2   : > { %v1925_v48 = vsel %vm1001_vm2, %v4812_v8, %v1899_v44  ;;  %v4282_v8 = vld [vmem:[%s5271_s12 + $0x18] sm:$0xff]   ;;  %v4288_v44 = vld [vmem:[%s5272_s13 + $0x8] sm:$0xff]  }
 0x4e9   : > { %v1903_v45 = vpop.permute.xlu0 %1902 }
 0x4ea   : > { %v1927_v49 = vsel %vm1926_vm5, %v1925_v48, %v1903_v45  ;;  %v4289_v45 = vld [vmem:[%s5272_s13 + $0x10] sm:$0xff]  }
 0x4f1   : > { %v1907_v46 = vpop.permute.xlu1 %1906 }
 0x4f2   : > { %v1929_v51 = vsel %vm1928_vm6, %v1927_v49, %v1907_v46  ;;  %v4290_v46 = vld [vmem:[%s5272_s13 + $0x18] sm:$0xff]  }
 0x51e   : > { %v1911_v47 = vpop.permute.xlu0 %1910 }
 0x51f   : > { %v1931_v54 = vsel %vm1930_vm7, %v1929_v51, %v1911_v47 }
 0x526   : > { %v1915_v50 = vpop.permute.xlu1 %1914 }
 0x527   : > { %v1933_v55 = vsel %vm1932_vm8, %v1931_v54, %v1915_v50 }
 0x52e   : > { %v1919_v52 = vpop.permute.xlu0 %1918 }
 0x52f   : > { %v1935_v56 = vsel %vm1934_vm9, %v1933_v55, %v1919_v52 }
 0x536   : > { %v1923_v53 = vpop.permute.xlu1 %1922 }
 0x537   : > { %v1937_v57 = vsel %vm1936_vm10, %v1935_v56, %v1923_v53 }
 0x538   : > { %v1938_v58 = vpack.c.bf16 %v1937_v57, %v1937_v57 }
 0x53a   : > { %4091 = vmatmul.mubr.msk.bf16.vlgmr.msra.gmra.mrb[32].mxu0 %vm826_vm1, %v1938_v58 }
 0x53b   : > { %4114 = vmatprep.mubr.msk.bf16.mxu0 %vm4403_vm0, %v4402_v1  ;;  %4107 = vmatpush3.bf16.msra.mxu0 %v4279_v5 }
 0x53c   : > { %4108 = vmatprep.subr.bf16.mxu0 %v4402_v1 }
 0x53f   : > { %4109 = vmatpush3.bf16.msra.mxu0 %v4280_v6 }
 0x540   : > { %4110 = vmatprep.subr.bf16.mxu0 %v4402_v1 }
 0x543   : > { %4111 = vmatpush3.bf16.msra.mxu0 %v4281_v7  ;;  %v4418_v7 = vmov 0  }
 0x544   : > { %4112 = vmatprep.subr.bf16.mxu0 %v4402_v1 }
 0x547   : > { %4113 = vmatpush3.bf16.msra.mxu0 %v4282_v8 }
 0x548   : > { %4130 = vmatprep.subr.bf16.mxu0 %v4402_v1 }
 0x54a   : > { %4115 = vmatmul.mubr.msk.bf16.vlgmr.msra.gmra.mrb[36].mxu0 %vm826_vm1, %v4872_v10 }
 0x54b   : > { %4132 = vmatprep.mubr.msk.bf16.mxu0 %vm4403_vm0, %v4402_v1 }
 0x60d   : > { %v2006_v60 = vpop.f32.mrb[32].mxu0 }
 0x60e   : > { %v2007_v61 = vadd.f32 %v3747_v59, %v2006_v60  ;;  %v4092_v62 = vpop.f32.mrb[33].mxu0 }
 0x60f   : > { %v2009_v63 = vpop.f32.mrb[34].mxu0 }
 0x610   : > { %v4093_v2 = vpop.f32.mrb[35].mxu0  ;;  %v2012_v3 = vadd.f32 %v4393_v0, %v2007_v61 }
 0x612   : > { %v2015_v4 = vsel %vm826_vm1, %v2012_v3, 0.0 }
 0x613   : > { %2016 = vadd.xlane.f32.xlu0 %v2015_v4  ;;  %v2043_v4 = vld [vmem:[%s759_s2] sm:$0x1]  ;;  %s763_s2 = scalar_lea.vmem %s5283_s24, %s4571_s30 }
 0x614   : > { %vm2277_vm11 = vcmp.ne.s32.totalorder %v2043_v4, 0 }
 0x615   : > { %v2326_v8 = vsel %vm2277_vm11, 1, %v4418_v7 }
 0x61d   : > { %v2207_v20 = vpop.f32.mrb[36].mxu0 }
 0x61e   : > { %v2279_v21 = vpack.c.bf16 %v2207_v20, %v2207_v20  ;;  %v4116_v22 = vpop.f32.mrb[37].mxu0 }
 0x61f   : > { %v2210_v23 = vpop.f32.mrb[38].mxu0 }
 0x620   : > { %v4117_v24 = vpop.f32.mrb[39].mxu0  ;;  %v2284_v25 = vsel %vm1001_vm2, %v2279_v21, 0 }
 0x621   : > { %4131 = vmatpush3.bf16.xpose.msra.mxu0 %v2284_v25 }
 0x622   : > { %4142 = vmatprep.subr.bf16.mxu0 %v4402_v1 }
 0x629   : > { %2397 = vrot.lane.b32.xlu0 %v2279_v21, %s5336_s6 }
 0x62d   : > { %2510 = vrot.lane.b32.xlu0 %v2279_v21, %s5337_s7 }
 0x631   : > { %2622 = vrot.lane.b32.xlu0 %v2279_v21, %s5338_s29 }
 0x635   : > { %2734 = vrot.lane.b32.xlu0 %v2279_v21, %s5339_s28 }
 0x639   : > { %2846 = vrot.lane.b32.xlu0 %v2279_v21, %s5340_s1 }
 0x63d   : > { %2958 = vrot.lane.b32.xlu0 %v2279_v21, %s5330_s25 }
 0x641   : > { %3070 = vrot.lane.b32.xlu0 %v2279_v21, %s5331_s8 }
 0x6a0   : > { %v2017_v11 = vpop.xlane.xlu0 %2016 }
 0x6a1   : > { %v2019_v12 = vmul.f32 0.015625, %v2017_v11 }
 0x6a3   : > { %v2020_v13 = vsub.f32 %v2012_v3, %v2019_v12  ;;  %v2327_v3 = vlaneseq }
 0x6a4   : > { %v2398_v38 = vpop.permute.xlu0 %2397 }
 0x6a5   : > { %v2021_v14 = vmul.f32 %v2020_v13, %v2020_v13  ;;  %v2403_v40 = vsel %vm1001_vm2, %v2398_v38, 0  ;;  %v4987_v5 = vshrl.u32 %v2327_v3, 7 }
 0x6a7   : > { %v2022_v15 = vsel %vm826_vm1, %v2021_v14, 0.0  ;;  %v2329_v6 = vsub.s32 0, %v4987_v5 }
 0x6a8   : > { %2023 = vadd.xlane.f32.xlu1 %v2022_v15  ;;  %v2511_v47 = vpop.permute.xlu0 %2510 }
 0x6a9   : > { %v2516_v49 = vsel %vm1001_vm2, %v2511_v47, 0  ;;  %v4993_v9 = vrot.slane %v2326_v8, %v2329_v6 }
 0x6ab   : > { %vm2331_vm12 = vcmp.eq.s32.totalorder %v4993_v9, 1 }
 0x6ac   : > { %v2623_v50 = vpop.permute.xlu0 %2622 }
 0x6ad   : > { %v2628_v52 = vsel %vm1001_vm2, %v2623_v50, 0 }
 0x6b0   : > { %v2735_v54 = vpop.permute.xlu0 %2734 }
 0x6b1   : > { %v2740_v56 = vsel %vm1001_vm2, %v2735_v54, 0 }
 0x6b4   : > { %v2847_v53 = vpop.permute.xlu0 %2846 }
 0x6b5   : > { %v2852_v58 = vsel %vm1001_vm2, %v2847_v53, 0 }
 0x6b8   : > { %v2959_v59 = vpop.permute.xlu0 %2958 }
 0x6b9   : > { %v2964_v61 = vsel %vm1001_vm2, %v2959_v59, 0 }
 0x6bc   : > { %v3071_v62 = vpop.permute.xlu0 %3070 }
 0x6bd   : > { %v3076_v2 = vsel %vm1001_vm2, %v3071_v62, 0 }
 0x735   : > { %v2024_v26 = vpop.xlane.xlu1 %2023 }
 0x736   : > { %v2025_v27 = vmul.f32 0.015625, %v2024_v26 }
 0x738   : > { %v2026_v28 = vadd.f32 1e-05, %v2025_v27 }
 0x73a   : > { %4355 = vrsqrt.f32 %v2026_v28 }
 0x744   : > { %v4356_v29 = vpop.eup %4355 }
 0x745   : > { %v2028_v31 = vmul.f32 %v4356_v29, %v2020_v13 }
 0x747   : > { %v2035_v34 = vmul.f32 %v3753_v30, %v2028_v31 }
 0x749   : > { %v4911_v35 = vadd.f32 %v3754_v33, %v2035_v34 }
 0x74b   : > { %v2077_v36 = vpack.c.bf16 %v4911_v35, %v4911_v35 }
 0x74d   : > { %4103 = vmatmul.mubr.msk.bf16.vlgmr.msra.gmra.mrb[44].mxu1 %vm826_vm1, %v2077_v36 }
 0x74e   : > { %4126 = vmatprep.mubr.msk.bf16.mxu1 %vm4403_vm0, %v4402_v1  ;;  %4119 = vmatpush3.bf16.msra.mxu1 %v4287_v43 }
 0x74f   : > { %4120 = vmatprep.subr.bf16.mxu1 %v4402_v1 }
 0x752   : > { %4121 = vmatpush3.bf16.msra.mxu1 %v4288_v44 }
 0x753   : > { %4122 = vmatprep.subr.bf16.mxu1 %v4402_v1 }
 0x756   : > { %4123 = vmatpush3.bf16.msra.mxu1 %v4289_v45 }
 0x757   : > { %4124 = vmatprep.subr.bf16.mxu1 %v4402_v1 }
 0x75a   : > { %4125 = vmatpush3.bf16.msra.mxu1 %v4290_v46 }
 0x75b   : > { %4136 = vmatprep.subr.bf16.mxu1 %v4402_v1 }
 0x75d   : > { %4127 = vmatmul.mubr.msk.bf16.vlgmr.msra.gmra.mrb[48].mxu1 %vm826_vm1, %v4872_v10 }
 0x75e   : > { %4138 = vmatprep.mubr.msk.bf16.mxu1 %vm4403_vm0, %v4402_v1 }
 0x820   : > { %v2139_v37 = vpop.f32.mrb[44].mxu1 }
 0x821   : > { %v2278_v39 = vpack.c.bf16 %v2139_v37, %v2139_v37  ;;  %v4104_v32 = vpop.f32.mrb[45].mxu1 }
 0x822   : > { %v2142_v41 = vpop.f32.mrb[46].mxu1 }
 0x823   : > { %2394 = vrot.lane.b32.xlu1 %v2278_v39, %s5336_s6  ;;  %v4105_v42 = vpop.f32.mrb[47].mxu1  ;;  %4133 = vmatmul.mubr.msk.bf16.vlgmr.msra.gmra.mrb[40].mxu0 %vm1001_vm2, %v2278_v39 }
 0x824   : > { %4143 = vmatpush3.bf16.xpose.msra.mxu0 %v2403_v40  ;;  %4144 = vmatprep.mubr.msk.bf16.mxu0 %vm4403_vm0, %v4402_v1 }
 0x825   : > { %4154 = vmatprep.subr.bf16.mxu0 %v4402_v1 }
 0x827   : > { %2508 = vrot.lane.b32.xlu1 %v2278_v39, %s5337_s7 }
 0x82b   : > { %2620 = vrot.lane.b32.xlu1 %v2278_v39, %s5338_s29 }
 0x82f   : > { %2732 = vrot.lane.b32.xlu1 %v2278_v39, %s5339_s28 }
 0x830   : > { %v2271_v17 = vpop.f32.mrb[48].mxu1 }
 0x831   : > { %v4999_v18 = vpack.c.bf16 %v2271_v17, %v2271_v17  ;;  %v4128_v19 = vpop.f32.mrb[49].mxu1 }
 0x832   : > { %v2274_v20 = vpop.f32.mrb[50].mxu1 }
 0x833   : > { %2844 = vrot.lane.b32.xlu1 %v2278_v39, %s5340_s1  ;;  %v4129_v21 = vpop.f32.mrb[51].mxu1  ;;  %v2351_v22 = vsel %vm1066_vm3, %v4999_v18, 0 }
 0x834   : > { %4137 = vmatpush3.bf16.msra.mxu1 %v2351_v22 }
 0x835   : > { %4148 = vmatprep.subr.bf16.mxu1 %v4402_v1 }
 0x837   : > { %2956 = vrot.lane.b32.xlu1 %v2278_v39, %s5330_s25 }
 0x83b   : > { %3068 = vrot.lane.b32.xlu1 %v2278_v39, %s5331_s8 }
 0x895   : > { %v2395_v48 = vpop.permute.xlu1 %2394 }
 0x896   : > { %4145 = vmatmul.mubr.msk.bf16.vlgmr.msra.gmra.mrb[44].mxu0 %vm1001_vm2, %v2395_v48 }
 0x897   : > { %4155 = vmatpush3.bf16.xpose.msra.mxu0 %v2516_v49  ;;  %4156 = vmatprep.mubr.msk.bf16.mxu0 %vm4403_vm0, %v4402_v1 }
 0x898   : > { %4166 = vmatprep.subr.bf16.mxu0 %v4402_v1 }
 0x899   : > { %v2509_v51 = vpop.permute.xlu1 %2508 }
 0x89d   : > { %v2621_v55 = vpop.permute.xlu1 %2620 }
 0x89e   : > { %4157 = vmatmul.mubr.msk.bf16.vlgmr.msra.gmra.mrb[48].mxu0 %vm1001_vm2, %v2509_v51 }
 0x89f   : > { %4167 = vmatpush3.bf16.xpose.msra.mxu0 %v2628_v52  ;;  %4168 = vmatprep.mubr.msk.bf16.mxu0 %vm4403_vm0, %v4402_v1 }
 0x8a0   : > { %4178 = vmatprep.subr.bf16.mxu0 %v4402_v1 }
 0x8a1   : > { %v2733_v57 = vpop.permute.xlu1 %2732 }
 0x8a5   : > { %v2845_v60 = vpop.permute.xlu1 %2844 }
 0x8a6   : > { %4169 = vmatmul.mubr.msk.bf16.vlgmr.msra.gmra.mrb[52].mxu0 %vm1001_vm2, %v2621_v55 }
 0x8a7   : > { %4179 = vmatpush3.bf16.xpose.msra.mxu0 %v2740_v56  ;;  %4180 = vmatprep.mubr.msk.bf16.mxu0 %vm4403_vm0, %v4402_v1 }
 0x8a8   : > { %4190 = vmatprep.subr.bf16.mxu0 %v4402_v1 }
 0x8a9   : > { %v2957_v63 = vpop.permute.xlu1 %2956 }
 0x8ad   : > { %v3069_v0 = vpop.permute.xlu1 %3068 }
 0x8ae   : > { %4181 = vmatmul.mubr.msk.bf16.vlgmr.msra.gmra.mrb[56].mxu0 %vm1001_vm2, %v2733_v57 }
 0x8af   : > { %4191 = vmatpush3.bf16.xpose.msra.mxu0 %v2852_v58  ;;  %4192 = vmatprep.mubr.msk.bf16.mxu0 %vm4403_vm0, %v4402_v1 }
 0x8b0   : > { %4202 = vmatprep.subr.bf16.mxu0 %v4402_v1 }
 0x8b6   : > { %4193 = vmatmul.mubr.msk.bf16.vlgmr.msra.gmra.mrb[60].mxu0 %vm1001_vm2, %v2845_v60 }
 0x8b7   : > { %4203 = vmatpush3.bf16.xpose.msra.mxu0 %v2964_v61  ;;  %4204 = vmatprep.mubr.msk.bf16.mxu0 %vm4403_vm0, %v4402_v1 }
 0x8b8   : > { %4214 = vmatprep.subr.bf16.mxu0 %v4402_v1 }
 0x8be   : > { %4205 = vmatmul.mubr.msk.bf16.vlgmr.msra.gmra.mrb[64].mxu0 %vm1001_vm2, %v2957_v63 }
 0x8bf   : > { %4215 = vmatpush3.bf16.xpose.msra.mxu0 %v3076_v2  ;;  %4216 = vmatprep.mubr.msk.bf16.mxu0 %vm4403_vm0, %v4402_v1 }
 0x8c0   : > { %4226 = vmatprep.subr.bf16.mxu0 %v4402_v1 }
 0x8c6   : > { %4217 = vmatmul.mubr.msk.bf16.vlgmr.msra.gmra.mrb[68].mxu0 %vm1001_vm2, %v3069_v0 }
 0x8c7   : > { %4234 = vmatprep.mubr.msk.bf16.mxu0 %vm4403_vm0, %v4402_v1 }
 0x8f6   : > { %v2320_v10 = vpop.f32.mrb[40].mxu0 }
 0x8f7   : > { %v2332_v11 = vsel %vm2331_vm12, %v2320_v10, -1e+20  ;;  %v4134_v12 = vpop.f32.mrb[41].mxu0 }
 0x8f8   : > { %v2333_v13 = vmul.f32 0.125, %v2332_v11  ;;  %v2323_v14 = vpop.f32.mrb[42].mxu0 }
 0x8f9   : > { %v4135_v15 = vpop.f32.mrb[43].mxu0 }
 0x8fa   : > { %v2334_v16 = vsel %vm1001_vm2, %v2333_v13, -inf }
 0x8fb   : > { %2335 = vmax.xlane.f32.xlu0 %v2334_v16 }
 0x969   : > { %v2439_v23 = vpop.f32.mrb[44].mxu0 }
 0x96a   : > { %v2445_v24 = vsel %vm2331_vm12, %v2439_v23, -1e+20  ;;  %v4146_v25 = vpop.f32.mrb[45].mxu0 }
 0x96b   : > { %v5006_v26 = vmul.f32 0.125, %v2445_v24  ;;  %v2442_v27 = vpop.f32.mrb[46].mxu0 }
 0x96c   : > { %v4147_v28 = vpop.f32.mrb[47].mxu0 }
 0x96d   : > { %v2447_v29 = vsel %vm1001_vm2, %v5006_v26, -inf }
 0x96e   : > { %2448 = vmax.xlane.f32.xlu1 %v2447_v29 }
 0x971   : > { %v2552_v30 = vpop.f32.mrb[48].mxu0 }
 0x972   : > { %v2558_v31 = vsel %vm2331_vm12, %v2552_v30, -1e+20  ;;  %v4158_v33 = vpop.f32.mrb[49].mxu0 }
 0x973   : > { %v2559_v34 = vmul.f32 0.125, %v2558_v31  ;;  %v2555_v36 = vpop.f32.mrb[50].mxu0 }
 0x974   : > { %v4159_v37 = vpop.f32.mrb[51].mxu0 }
 0x975   : > { %v2560_v38 = vsel %vm1001_vm2, %v2559_v34, -inf }
 0x976   : > { %2561 = vmax.xlane.f32.xlu0 %v2560_v38 }
 0x979   : > { %v2664_v39 = vpop.f32.mrb[52].mxu0 }
 0x97a   : > { %v2670_v32 = vsel %vm2331_vm12, %v2664_v39, -1e+20  ;;  %v4170_v40 = vpop.f32.mrb[53].mxu0 }
 0x97b   : > { %v2671_v41 = vmul.f32 0.125, %v2670_v32  ;;  %v2667_v42 = vpop.f32.mrb[54].mxu0 }
 0x97c   : > { %v4171_v43 = vpop.f32.mrb[55].mxu0 }
 0x97d   : > { %v2672_v44 = vsel %vm1001_vm2, %v2671_v41, -inf }
 0x97e   : > { %2673 = vmax.xlane.f32.xlu0 %v2672_v44 }
 0x981   : > { %v2776_v45 = vpop.f32.mrb[56].mxu0 }
 0x982   : > { %v2782_v46 = vsel %vm2331_vm12, %v2776_v45, -1e+20  ;;  %v4182_v47 = vpop.f32.mrb[57].mxu0 }
 0x983   : > { %v5018_v48 = vmul.f32 0.125, %v2782_v46  ;;  %v2779_v49 = vpop.f32.mrb[58].mxu0 }
 0x984   : > { %v4183_v50 = vpop.f32.mrb[59].mxu0 }
 0x985   : > { %v2784_v51 = vsel %vm1001_vm2, %v5018_v48, -inf }
 0x986   : > { %2785 = vmax.xlane.f32.xlu1 %v2784_v51 }
 0x988   : > { %v2336_v52 = vpop.xlane.xlu0 %2335 }
 0x989   : > { %v2337_v54 = vsub.f32 %v2333_v13, %v2336_v52  ;;  %v2888_v55 = vpop.f32.mrb[60].mxu0 }
 0x98a   : > { %v2894_v56 = vsel %vm2331_vm12, %v2888_v55, -1e+20  ;;  %v4194_v53 = vpop.f32.mrb[61].mxu0 }
 0x98b   : > { %v2338_v57 = vmul.f32 1.442695, %v2337_v54  ;;  %v5024_v58 = vmul.f32 0.125, %v2894_v56  ;;  %v2891_v59 = vpop.f32.mrb[62].mxu0 }
 0x98c   : > { %v4195_v60 = vpop.f32.mrb[63].mxu0 }
 0x98d   : > { %4357 = vpow2.f32 %v2338_v57  ;;  %v2896_v61 = vsel %vm1001_vm2, %v5024_v58, -inf }
 0x98e   : > { %2897 = vmax.xlane.f32.xlu0 %v2896_v61 }
 0x991   : > { %v3000_v62 = vpop.f32.mrb[64].mxu0 }
 0x992   : > { %v3006_v63 = vsel %vm2331_vm12, %v3000_v62, -1e+20  ;;  %v4206_v2 = vpop.f32.mrb[65].mxu0 }
 0x993   : > { %v5030_v0 = vmul.f32 0.125, %v3006_v63  ;;  %v3003_v3 = vpop.f32.mrb[66].mxu0 }
 0x994   : > { %v4207_v4 = vpop.f32.mrb[67].mxu0 }
 0x995   : > { %v3008_v8 = vsel %vm1001_vm2, %v5030_v0, -inf }
 0x996   : > { %3009 = vmax.xlane.f32.xlu1 %v3008_v8 }
 0x997   : > { %v4358_v10 = vpop.eup %4357 }
 0x998   : > { %v2340_v11 = vsel %vm1001_vm2, %v4358_v10, 0.0 }
 0x999   : > { %v3112_v12 = vpop.f32.mrb[68].mxu0 }
 0x99a   : > { %v3118_v13 = vsel %vm2331_vm12, %v3112_v12, -1e+20  ;;  %2341 = vadd.xlane.f32.xlu1 %v2340_v11  ;;  %v4218_v14 = vpop.f32.mrb[69].mxu0 }
 0x99b   : > { %v3119_v15 = vmul.f32 0.125, %v3118_v13  ;;  %v3115_v16 = vpop.f32.mrb[70].mxu0 }
 0x99c   : > { %v4219_v17 = vpop.f32.mrb[71].mxu0 }
 0x99d   : > { %v3120_v19 = vsel %vm1001_vm2, %v3119_v15, -inf }
 0x99e   : > { %3121 = vmax.xlane.f32.xlu0 %v3120_v19 }
 0x9ab   : > { %2572 = vrot.lane.b32.xlu1 %v4999_v18, %s5337_s7 }
 0x9b4   : > { %2460 = vrot.lane.b32.xlu0 %v4999_v18, %s5336_s6 }
 0x9fb   : > { %v2449_v20 = vpop.xlane.xlu1 %2448 }
 0x9fc   : > { %v2450_v21 = vsub.f32 %v5006_v26, %v2449_v20 }
 0x9fe   : > { %v2451_v22 = vmul.f32 1.442695, %v2450_v21 }
 0xa00   : > { %4359 = vpow2.f32 %v2451_v22 }
 0xa03   : > { %v2562_v9 = vpop.xlane.xlu0 %2561 }
 0xa04   : > { %v2563_v23 = vsub.f32 %v2559_v34, %v2562_v9 }
 0xa06   : > { %v2564_v24 = vmul.f32 1.442695, %v2563_v23 }
 0xa08   : > { %4361 = vpow2.f32 %v2564_v24 }
 0xa0a   : > { %v5043_v25 = vpop.eup %4359 }
 0xa0b   : > { %v2674_v27 = vpop.xlane.xlu0 %2673  ;;  %v2453_v28 = vsel %vm1001_vm2, %v5043_v25, 0.0 }
 0xa0c   : > { %v2675_v29 = vsub.f32 %v2671_v41, %v2674_v27  ;;  %2454 = vadd.xlane.f32.xlu0 %v2453_v28 }
 0xa0e   : > { %v2676_v30 = vmul.f32 1.442695, %v2675_v29 }
 0xa10   : > { %4363 = vpow2.f32 %v2676_v30 }
 0xa12   : > { %v5047_v31 = vpop.eup %4361 }
 0xa13   : > { %v2566_v26 = vsel %vm1001_vm2, %v5047_v31, 0.0  ;;  %v2786_v36 = vpop.xlane.xlu1 %2785 }
 0xa14   : > { %2567 = vadd.xlane.f32.xlu1 %v2566_v26  ;;  %v2787_v41 = vsub.f32 %v5018_v48, %v2786_v36 }
 0xa16   : > { %v2788_v46 = vmul.f32 1.442695, %v2787_v41 }
 0xa1a   : > { %v5051_v33 = vpop.eup %4363 }
 0xa1b   : > { %v2678_v34 = vsel %vm1001_vm2, %v5051_v33, 0.0  ;;  %v2898_v39 = vpop.xlane.xlu0 %2897 }
 0xa1c   : > { %2679 = vadd.xlane.f32.xlu0 %v2678_v34  ;;  %v2899_v47 = vsub.f32 %v5024_v58, %v2898_v39 }
 0xa1e   : > { %v2900_v48 = vmul.f32 1.442695, %v2899_v47 }
 0xa23   : > { %v3010_v37 = vpop.xlane.xlu1 %3009 }
 0xa24   : > { %v3011_v49 = vsub.f32 %v5030_v0, %v3010_v37 }
 0xa25   : > { %2684 = vrot.lane.b32.xlu1 %v4999_v18, %s5338_s29  ;;  %s5347_s29 = smov 32  }
 0xa26   : > { %v3012_v51 = vmul.f32 1.442695, %v3011_v49 }
 0xa27   : > { %v2342_v38 = vpop.xlane.xlu1 %2341 }
 0xa28   : > { %4365 = vrcp.f32 %v2342_v38 }
 0xa29   : > { %4367 = vpow2.f32 %v2788_v46 }
 0xa2a   : > { %4369 = vpow2.f32 %v2900_v48 }
 0xa2b   : > { %v3122_v32 = vpop.xlane.xlu0 %3121  ;;  %4371 = vpow2.f32 %v3012_v51  ;;  %v2573_v62 = vpop.permute.xlu1 %2572 }
 0xa2c   : > { %v3123_v50 = vsub.f32 %v3119_v15, %v3122_v32  ;;  %v2578_v4 = vsel %vm1066_vm3, %v2573_v62, 0  ;;  %v4292_v62 = vld [vmem:[%s5273_s14 + $0x8] sm:$0xff]  }
 0xa2e   : > { %v3124_v52 = vmul.f32 1.442695, %v3123_v50 }
 0xa2f   : > { %v2461_v42 = vpop.permute.xlu0 %2460 }
 0xa30   : > { %v2466_v45 = vsel %vm1066_vm3, %v2461_v42, 0  ;;  %4373 = vpow2.f32 %v3124_v52 }
 0xa32   : > { %2796 = vrot.lane.b32.xlu0 %v4999_v18, %s5339_s28  ;;  %v4366_v40 = vpop.eup %4365 }
 0xa33   : > { %v2344_v43 = vmul.f32 %v4366_v40, %v4358_v10  ;;  %v4368_v54 = vpop.eup %4367 }
 0xa34   : > { %v2790_v55 = vsel %vm1001_vm2, %v4368_v54, 0.0  ;;  %v4370_v56 = vpop.eup %4369 }
 0xa35   : > { %v2345_v44 = vpack.c.bf16 %v2344_v43, %v2344_v43  ;;  %v5068_v53 = vpop.eup %4371  ;;  %v2902_v57 = vsel %vm1001_vm2, %v4370_v56, 0.0 }
 0xa36   : > { %v3014_v60 = vsel %vm1001_vm2, %v5068_v53, 0.0 }
 0xa37   : > { %4139 = vmatmul.mubr.msk.bf16.vlgmr.msra.gmra.mrb[52].mxu1 %vm1001_vm2, %v2345_v44 }
 0xa38   : > { %4149 = vmatpush3.bf16.msra.mxu1 %v2466_v45  ;;  %4150 = vmatprep.mubr.msk.bf16.mxu1 %vm4403_vm0, %v4402_v1 }
 0xa39   : > { %4160 = vmatprep.subr.bf16.mxu1 %v4402_v1 }
 0xa3a   : > { %v5071_v58 = vpop.eup %4373 }
 0xa3b   : > { %v3126_v59 = vsel %vm1001_vm2, %v5071_v58, 0.0 }
 0xa49   : > { %2791 = vadd.xlane.f32.xlu1 %v2790_v55 }
 0xa4d   : > { %2903 = vadd.xlane.f32.xlu1 %v2902_v57  ;;  %v4291_v57 = vld [vmem:[%s5273_s14] sm:$0xff]  }
 0xa4e   : > { %4227 = vmatpush3.bf16.msra.mxu0 %v4291_v57  ;;  %v4313_v57 = vld [vmem:[%s5279_s20 + $0x58] sm:$0xff]  }
 0xa4f   : > { %4228 = vmatprep.subr.bf16.mxu0 %v4402_v1 }
 0xa51   : > { %3127 = vadd.xlane.f32.xlu1 %v3126_v59  ;;  %3015 = vadd.xlane.f32.xlu0 %v3014_v60 }
 0xa52   : > { %4229 = vmatpush3.bf16.msra.mxu0 %v4292_v62  ;;  %v4318_v62 = vld [vmem:[%s5279_s20 + $0x28] sm:$0xff]  }
 0xa53   : > { %4230 = vmatprep.subr.bf16.mxu0 %v4402_v1 }
 0xa62   : > { %2908 = vrot.lane.b32.xlu1 %v4999_v18, %s5340_s1 }
 0xa67   : > { %3020 = vrot.lane.b32.xlu0 %v4999_v18, %s5330_s25  ;;  %s5345_s25 = smov 16  }
 0xa6b   : > { %3132 = vrot.lane.b32.xlu0 %v4999_v18, %s5331_s8  ;;  %s5346_s8 = smov 24  }
 0xa99   : > { %v2455_v61 = vpop.xlane.xlu0 %2454 }
 0xa9a   : > { %4375 = vrcp.f32 %v2455_v61 }
 0xaa1   : > { %v2568_v63 = vpop.xlane.xlu1 %2567 }
 0xaa2   : > { %4377 = vrcp.f32 %v2568_v63  ;;  %v4293_v63 = vld [vmem:[%s5273_s14 + $0x10] sm:$0xff]  }
 0xaa3   : > { %4231 = vmatpush3.bf16.msra.mxu0 %v4293_v63 }
 0xaa4   : > { %v4376_v2 = vpop.eup %4375  ;;  %4232 = vmatprep.subr.bf16.mxu0 %v4402_v1 }
 0xaa5   : > { %v2457_v0 = vmul.f32 %v4376_v2, %v5043_v25  ;;  %v2685_v11 = vpop.permute.xlu1 %2684 }
 0xaa6   : > { %v2690_v13 = vsel %vm1066_vm3, %v2685_v11, 0 }
 0xaa7   : > { %v2458_v3 = vpack.c.bf16 %v2457_v0, %v2457_v0 }
 0xaa9   : > { %v2680_v8 = vpop.xlane.xlu0 %2679  ;;  %4151 = vmatmul.mubr.msk.bf16.vlgmr.msra.gmra.mrb[56].mxu1 %vm1001_vm2, %v2458_v3 }
 0xaaa   : > { %4379 = vrcp.f32 %v2680_v8  ;;  %4161 = vmatpush3.bf16.msra.mxu1 %v2578_v4  ;;  %4162 = vmatprep.mubr.msk.bf16.mxu1 %vm4403_vm0, %v4402_v1  ;;  %v4294_v8 = vld [vmem:[%s5273_s14 + $0x18] sm:$0xff]  }
 0xaab   : > { %4172 = vmatprep.subr.bf16.mxu1 %v4402_v1  ;;  %4233 = vmatpush3.bf16.msra.mxu0 %v4294_v8 }
 0xaac   : > { %v4378_v18 = vpop.eup %4377 }
 0xaad   : > { %v2570_v10 = vmul.f32 %v4378_v18, %v5047_v31  ;;  %v2797_v16 = vpop.permute.xlu0 %2796 }
 0xaae   : > { %v2802_v19 = vsel %vm1066_vm3, %v2797_v16, 0 }
 0xaaf   : > { %v2571_v12 = vpack.c.bf16 %v2570_v10, %v2570_v10 }
 0xab1   : > { %4163 = vmatmul.mubr.msk.bf16.vlgmr.msra.gmra.mrb[60].mxu1 %vm1001_vm2, %v2571_v12 }
 0xab2   : > { %4173 = vmatpush3.bf16.msra.mxu1 %v2690_v13  ;;  %4174 = vmatprep.mubr.msk.bf16.mxu1 %vm4403_vm0, %v4402_v1 }
 0xab3   : > { %4184 = vmatprep.subr.bf16.mxu1 %v4402_v1 }
 0xab4   : > { %v4380_v14 = vpop.eup %4379 }
 0xab5   : > { %v2682_v15 = vmul.f32 %v4380_v14, %v5051_v33 }
 0xab7   : > { %v2683_v17 = vpack.c.bf16 %v2682_v15, %v2682_v15 }
 0xab9   : > { %4175 = vmatmul.mubr.msk.bf16.vlgmr.msra.gmra.mrb[64].mxu1 %vm1001_vm2, %v2683_v17 }
 0xaba   : > { %4185 = vmatpush3.bf16.msra.mxu1 %v2802_v19  ;;  %4186 = vmatprep.mubr.msk.bf16.mxu1 %vm4403_vm0, %v4402_v1 }
 0xabb   : > { %4196 = vmatprep.subr.bf16.mxu1 %v4402_v1 }
 0xad6   : > { %v2792_v20 = vpop.xlane.xlu1 %2791 }
 0xad7   : > { %4381 = vrcp.f32 %v2792_v20 }
 0xada   : > { %v2904_v21 = vpop.xlane.xlu1 %2903 }
 0xadb   : > { %4383 = vrcp.f32 %v2904_v21 }
 0xade   : > { %v3128_v22 = vpop.xlane.xlu1 %3127  ;;  %v3016_v9 = vpop.xlane.xlu0 %3015 }
 0xadf   : > { %4385 = vrcp.f32 %v3016_v9 }
 0xae0   : > { %4387 = vrcp.f32 %v3128_v22 }
 0xae1   : > { %v4382_v23 = vpop.eup %4381 }
 0xae2   : > { %v2794_v24 = vmul.f32 %v4382_v23, %v4368_v54  ;;  %v2909_v25 = vpop.permute.xlu1 %2908  ;;  %v3021_v31 = vpop.permute.xlu0 %3020 }
 0xae3   : > { %v2914_v29 = vsel %vm1066_vm3, %v2909_v25, 0  ;;  %v3026_v34 = vsel %vm1066_vm3, %v3021_v31, 0 }
 0xae4   : > { %v2795_v27 = vpack.c.bf16 %v2794_v24, %v2794_v24 }
 0xae5   : > { %v4384_v28 = vpop.eup %4383 }
 0xae6   : > { %4187 = vmatmul.mubr.msk.bf16.vlgmr.msra.gmra.mrb[68].mxu1 %vm1001_vm2, %v2795_v27  ;;  %v2906_v30 = vmul.f32 %v4384_v28, %v4370_v56  ;;  %v3133_v37 = vpop.permute.xlu0 %3132 }
 0xae7   : > { %4197 = vmatpush3.bf16.msra.mxu1 %v2914_v29  ;;  %4198 = vmatprep.mubr.msk.bf16.mxu1 %vm4403_vm0, %v4402_v1  ;;  %v3138_v32 = vsel %vm1066_vm3, %v3133_v37, 0 }
 0xae8   : > { %4208 = vmatprep.subr.bf16.mxu1 %v4402_v1  ;;  %v2907_v26 = vpack.c.bf16 %v2906_v30, %v2906_v30 }
 0xae9   : > { %v4386_v33 = vpop.eup %4385 }
 0xaea   : > { %v3018_v36 = vmul.f32 %v4386_v33, %v5068_v53  ;;  %v4388_v39 = vpop.eup %4387 }
 0xaeb   : > { %v3130_v40 = vmul.f32 %v4388_v39, %v5071_v58 }
 0xaec   : > { %v3019_v38 = vpack.c.bf16 %v3018_v36, %v3018_v36 }
 0xaed   : > { %v3131_v41 = vpack.c.bf16 %v3130_v40, %v3130_v40 }
 0xaee   : > { %4199 = vmatmul.mubr.msk.bf16.vlgmr.msra.gmra.mrb[72].mxu1 %vm1001_vm2, %v2907_v26  ;;  %v3786_v26 = vld [vmem:[%s5274_s15] ss:$0 sm:$0xff] }
 0xaef   : > { %4209 = vmatpush3.bf16.msra.mxu1 %v3026_v34  ;;  %4210 = vmatprep.mubr.msk.bf16.mxu1 %vm4403_vm0, %v4402_v1 }
 0xaf0   : > { %4220 = vmatprep.subr.bf16.mxu1 %v4402_v1 }
 0xaf6   : > { %4211 = vmatmul.mubr.msk.bf16.vlgmr.msra.gmra.mrb[76].mxu1 %vm1001_vm2, %v3019_v38 }
 0xaf7   : > { %4221 = vmatpush3.bf16.msra.mxu1 %v3138_v32  ;;  %4222 = vmatprep.mubr.msk.bf16.mxu1 %vm4403_vm0, %v4402_v1 }
 0xafe   : > { %4223 = vmatmul.mubr.msk.bf16.vlgmr.msra.gmra.mrb[80].mxu1 %vm1001_vm2, %v3131_v41 }
 0xaff   : > { %3415 = vmatprep.mubr.bf16.mxu1 %v4418_v7 }
 0xb0a   : > { %v2387_v42 = vpop.f32.mrb[52].mxu1 }
 0xb0b   : > { %v4140_v43 = vpop.f32.mrb[53].mxu1 }
 0xb0c   : > { %v2390_v44 = vpop.f32.mrb[54].mxu1 }
 0xb0d   : > { %v4141_v45 = vpop.f32.mrb[55].mxu1 }
 0xb0e   : > { %v4297_v45 = vld [vmem:[%s5277_s18 + $0x4] ss:$8 sps:$4 sm:$0xff]  }
 0xb0f   : > { %3383 = vmatprep.subr.bf16.mxu1 %v4297_v45 }
 0xb7c   : > { %v2502_v46 = vpop.f32.mrb[56].mxu1 }
 0xb7d   : > { %3181 = vrot.lane.b32.xlu1 %v2502_v46, %s5344_s26  ;;  %v4152_v47 = vpop.f32.mrb[57].mxu1  ;;  %v4295_v46 = vld [vmem:[%s5277_s18] ss:$8 sps:$4 sm:$0xff]  }
 0xb7e   : > { %v2505_v49 = vpop.f32.mrb[58].mxu1  ;;  %3384 = vmatpush1.bf16.msra.mxu1 %v4295_v46  ;;  %v4298_v47 = vld [vmem:[%s5277_s18 + $0x10] ss:$8 sps:$4 sm:$0xff]  }
 0xb7f   : > { %v4153_v48 = vpop.f32.mrb[59].mxu1  ;;  %v4303_v49 = vld [vmem:[%s5277_s18 + $0x24] ss:$8 sps:$4 sm:$0xff]  }
 0xb80   : > { %v4301_v48 = vld [vmem:[%s5277_s18 + $0x20] ss:$8 sps:$4 sm:$0xff]  }
 0xb84   : > { %v2614_v50 = vpop.f32.mrb[60].mxu1 }
 0xb85   : > { %3185 = vrot.lane.b32.xlu0 %v2614_v50, %s5345_s25  ;;  %v4164_v51 = vpop.f32.mrb[61].mxu1  ;;  %v4306_v50 = vld [vmem:[%s5277_s18 + $0x34] ss:$8 sps:$4 sm:$0xff]  }
 0xb86   : > { %v2617_v52 = vpop.f32.mrb[62].mxu1  ;;  %v4304_v51 = vld [vmem:[%s5277_s18 + $0x30] ss:$8 sps:$4 sm:$0xff]  }
 0xb87   : > { %v4165_v54 = vpop.f32.mrb[63].mxu1  ;;  %v4307_v52 = vld [vmem:[%s5279_s20 + $0x40] sm:$0xff]  }
 0xb88   : > { %v4308_v54 = vld [vmem:[%s5279_s20] sm:$0xff]   ;;  %3928 = vmatprep.subr.bf16.mxu0 %v4307_v52 }
 0xb8c   : > { %v2726_v55 = vpop.f32.mrb[64].mxu1 }
 0xb8d   : > { %3189 = vrot.lane.b32.xlu1 %v2726_v55, %s5346_s8  ;;  %v4176_v7 = vpop.f32.mrb[65].mxu1  ;;  %v4309_v55 = vld [vmem:[%s5279_s20 + $0x48] sm:$0xff]  }
 0xb8e   : > { %v2729_v56 = vpop.f32.mrb[66].mxu1  ;;  %v4310_v7 = vld [vmem:[%s5279_s20 + $0x8] sm:$0xff]  }
 0xb8f   : > { %v4177_v53 = vpop.f32.mrb[67].mxu1  ;;  %v4311_v56 = vld [vmem:[%s5279_s20 + $0x50] sm:$0xff]  }
 0xb90   : > { %v4312_v53 = vld [vmem:[%s5279_s20 + $0x10] sm:$0xff]  }
 0xbb9   : > { %v2838_v58 = vpop.f32.mrb[68].mxu1 }
 0xbba   : > { %3193 = vrot.lane.b32.xlu0 %v2838_v58, %s5347_s29  ;;  %v4188_v59 = vpop.f32.mrb[69].mxu1  ;;  %v4314_v58 = vld [vmem:[%s5279_s20 + $0x18] sm:$0xff]  }
 0xbbb   : > { %v2841_v60 = vpop.f32.mrb[70].mxu1  ;;  %v4315_v59 = vld [vmem:[%s5279_s20 + $0x60] sm:$0xff]  }
 0xbbc   : > { %v4189_v61 = vpop.f32.mrb[71].mxu1  ;;  %v4316_v60 = vld [vmem:[%s5279_s20 + $0x20] sm:$0xff]  }
 0xbbd   : > { %v4317_v61 = vld [vmem:[%s5279_s20 + $0x68] sm:$0xff]  }
 0xbc1   : > { %v2950_v2 = vpop.f32.mrb[72].mxu1 }
 0xbc2   : > { %3197 = vrot.lane.b32.xlu1 %v2950_v2, %s5348_s0  ;;  %v4200_v0 = vpop.f32.mrb[73].mxu1 }
 0xbc3   : > { %v2953_v3 = vpop.f32.mrb[74].mxu1 }
 0xbc4   : > { %v4201_v4 = vpop.f32.mrb[75].mxu1 }
 0xbc5   : > { %v3792_v4 = vld [vmem:[%s5275_s16] ss:$0 sm:$0xff] }
 0xbc9   : > { %v3062_v18 = vpop.f32.mrb[76].mxu1 }
 0xbca   : > { %3201 = vrot.lane.b32.xlu0 %v3062_v18, %s5349_s10  ;;  %v4212_v10 = vpop.f32.mrb[77].mxu1  ;;  %v3793_v18 = vld [vmem:[%s5276_s17] ss:$0 sm:$0xff] }
 0xbcb   : > { %v3065_v11 = vpop.f32.mrb[78].mxu1 }
 0xbcc   : > { %v4213_v12 = vpop.f32.mrb[79].mxu1 }
 0xbd1   : > { %v3174_v13 = vpop.f32.mrb[80].mxu1 }
 0xbd2   : > { %3205 = vrot.lane.b32.xlu1 %v3174_v13, %s5350_s11  ;;  %v4224_v14 = vpop.f32.mrb[81].mxu1  ;;  %v4319_v13 = vld [vmem:[%s5279_s20 + $0x70] sm:$0xff]  }
 0xbd3   : > { %v3177_v15 = vpop.f32.mrb[82].mxu1  ;;  %v4320_v14 = vld [vmem:[%s5279_s20 + $0x30] sm:$0xff]  }
 0xbd4   : > { %v4225_v16 = vpop.f32.mrb[83].mxu1  ;;  %v4321_v15 = vld [vmem:[%s5279_s20 + $0x78] sm:$0xff]  }
 0xbd5   : > { %v4322_v16 = vld [vmem:[%s5279_s20 + $0x38] sm:$0xff]  }
 0xbef   : > { %v3182_v17 = vpop.permute.xlu1 %3181 }
 0xbf0   : > { %v3208_v21 = vsel %vm1001_vm2, %v2387_v42, %v3182_v17  ;;  %v3328_v17 = vld [vmem:[%s5278_s19] sm:$0x3] }
 0xbf7   : > { %v3186_v19 = vpop.permute.xlu0 %3185 }
 0xbf8   : > { %v3209_v22 = vsel %vm1926_vm5, %v3208_v21, %v3186_v19  ;;  %v3336_v19 = vsub.s32 1, %v4987_v5 }
 0xbff   : > { %v3190_v1 = vpop.permute.xlu1 %3189 }
 0xc00   : > { %v3210_v23 = vsel %vm1928_vm6, %v3209_v22, %v3190_v1  ;;  %v3333_v1 = vrot.slane %v3328_v17, %v2329_v6 }
 0xc2c   : > { %v3194_v20 = vpop.permute.xlu0 %3193 }
 0xc2d   : > { %v3211_v25 = vsel %vm1930_vm7, %v3210_v23, %v3194_v20  ;;  %v3337_v20 = vrot.slane %v3328_v17, %v3336_v19 }
 0xc34   : > { %v3198_v9 = vpop.permute.xlu1 %3197 }
 0xc35   : > { %v3212_v27 = vsel %vm1932_vm8, %v3211_v25, %v3198_v9 }
 0xc3c   : > { %v3202_v24 = vpop.permute.xlu0 %3201 }
 0xc3d   : > { %v3213_v28 = vsel %vm1934_vm9, %v3212_v27, %v3202_v24 }
 0xc44   : > { %v3206_v29 = vpop.permute.xlu1 %3205 }
 0xc45   : > { %v3214_v30 = vsel %vm1936_vm10, %v3213_v28, %v3206_v29 }
 0xc46   : > { %v3215_v31 = vpack.c.bf16 %v3214_v30, %v3214_v30 }
 0xc48   : > { %4235 = vmatmul.mubr.msk.bf16.vlgmr.msra.gmra.mrb[72].mxu0 %vm826_vm1, %v3215_v31 }
 0xc49   : > { %3929 = vmatpush3.bf16.msra.mxu0 %v4308_v54 }
 0xc4a   : > { %3930 = vmatprep.subr.bf16.mxu0 %v4309_v55 }
 0xc4d   : > { %3931 = vmatpush3.bf16.msra.mxu0 %v4310_v7 }
 0xc4e   : > { %3932 = vmatprep.subr.bf16.mxu0 %v4311_v56 }
 0xc51   : > { %3933 = vmatpush3.bf16.msra.mxu0 %v4312_v53 }
 0xc52   : > { %3934 = vmatprep.subr.bf16.mxu0 %v4313_v57 }
 0xc55   : > { %3935 = vmatpush3.bf16.msra.mxu0 %v4314_v58 }
 0xc56   : > { %3936 = vmatprep.subr.bf16.mxu0 %v4315_v59 }
 0xc59   : > { %3937 = vmatpush3.bf16.msra.mxu0 %v4316_v60 }
 0xc5a   : > { %3938 = vmatprep.subr.bf16.mxu0 %v4317_v61 }
 0xc5d   : > { %3939 = vmatpush3.bf16.msra.mxu0 %v4318_v62 }
 0xc5e   : > { %3940 = vmatprep.subr.bf16.mxu0 %v4319_v13 }
 0xc61   : > { %3941 = vmatpush3.bf16.msra.mxu0 %v4320_v14 }
 0xc62   : > { %3942 = vmatprep.subr.bf16.mxu0 %v4321_v15 }
 0xc65   : > { %3943 = vmatpush3.bf16.msra.mxu0 %v4322_v16 }
 0xd1b   : > { %v3283_v33 = vpop.f32.mrb[72].mxu0 }
 0xd1c   : > { %v3284_v34 = vadd.f32 %v3786_v26, %v3283_v33  ;;  %v4236_v36 = vpop.f32.mrb[73].mxu0  ;;  %v3803_v26 = vld [vmem:[%s5280_s21] ss:$0 sm:$0xff] }
 0xd1d   : > { %v3286_v37 = vpop.f32.mrb[74].mxu0 }
 0xd1e   : > { %v4237_v38 = vpop.f32.mrb[75].mxu0  ;;  %v3289_v39 = vadd.f32 %v3284_v34, %v4911_v35  ;;  %v4300_v35 = vld [vmem:[%s5277_s18 + $0x14] ss:$8 sps:$4 sm:$0xff]  }
 0xd1f   : > { %3385 = vmatprep.subr.bf16.mxu1 %v4300_v35  ;;  %v3820_v35 = vld [vmem:[%s5281_s22] ss:$0 sm:$0xff] }
 0xd20   : > { %v3292_v32 = vsel %vm826_vm1, %v3289_v39, 0.0  ;;  %3386 = vmatpush1.bf16.msra.mxu1 %v4298_v47 }
 0xd21   : > { %3293 = vadd.xlane.f32.xlu0 %v3292_v32  ;;  %3387 = vmatprep.subr.bf16.mxu1 %v4303_v49  ;;  %v3821_v49 = vld [vmem:[%s5282_s23] ss:$0 sm:$0xff] }
 0xd24   : > { %3388 = vmatpush1.bf16.msra.mxu1 %v4301_v48 }
 0xd25   : > { %3389 = vmatprep.subr.bf16.mxu1 %v4306_v50 }
 0xd28   : > { %3390 = vmatpush1.bf16.msra.mxu1 %v4304_v51 }
 0xdae   : > { %v3294_v40 = vpop.xlane.xlu0 %3293 }
 0xdaf   : > { %v3295_v41 = vmul.f32 0.015625, %v3294_v40 }
 0xdb1   : > { %v3296_v42 = vsub.f32 %v3289_v39, %v3295_v41 }
 0xdb3   : > { %v3297_v43 = vmul.f32 %v3296_v42, %v3296_v42 }
 0xdb5   : > { %v3298_v44 = vsel %vm826_vm1, %v3297_v43, 0.0 }
 0xdb6   : > { %3299 = vadd.xlane.f32.xlu1 %v3298_v44 }
 0xe43   : > { %v3300_v63 = vpop.xlane.xlu1 %3299 }
 0xe44   : > { %v3301_v2 = vmul.f32 0.015625, %v3300_v63 }
 0xe46   : > { %v3302_v0 = vadd.f32 1e-05, %v3301_v2 }
 0xe48   : > { %4389 = vrsqrt.f32 %v3302_v0 }
 0xe52   : > { %v4390_v3 = vpop.eup %4389 }
 0xe53   : > { %v3304_v8 = vmul.f32 %v4390_v3, %v3296_v42 }
 0xe55   : > { %v3311_v10 = vmul.f32 %v3792_v4, %v3304_v8 }
 0xe57   : > { %v3318_v11 = vadd.f32 %v3793_v18, %v3311_v10 }
 0xe59   : > { %v3327_v12 = vpack.c.bf16 %v3318_v11, %v3318_v11 }
 0xe5b   : > { %3802 = vmatmul.mubr.msk.bf16.vlgmr.msra.gmra.mrb[84].mxu1 %vm826_vm1, %v3327_v12 }
 0xf2e   : > { %v3417_v21 = vpop.f32.mrb[84].mxu1 }
 0xf2f   : > { %v3418_v22 = vadd.f32 %v3417_v21, %v3333_v1  ;;  %v3419_v9 = vpop.f32.mrb[85].mxu1 }
 0xf30   : > { %v3420_v23 = vadd.f32 %v3419_v9, %v3337_v20  ;;  %v3421_v24 = vpop.f32.mrb[86].mxu1 }
 0xf31   : > { %v3424_v25 = vmax.f32 %v3418_v22, 0.0  ;;  %v3422_v27 = vpop.f32.mrb[87].mxu1 }
 0xf32   : > { %v3425_v28 = vmax.f32 %v3420_v23, 0.0 }
 0xf33   : > { %v3458_v30 = vpack.c.bf16 %v3424_v25, %v3424_v25 }
 0xf34   : > { %v3459_v29 = vpack.c.bf16 %v3425_v28, %v3425_v28 }
 0xf36   : > { %3595 = vmatprep.mubr.bf16.mxu0 %v3459_v29 }
 0xf37   : > { %3596 = vmatmul.mubr.bf16.vlgmr.msra.gmra.mrb[76].mxu0 %v3458_v30 }
0x100a   : > { %v3944_v31 = vpop.f32.mrb[76].mxu0 }
0x100b   : > { %v3945_v5 = vpop.f32.mrb[77].mxu0 }
0x100c   : > { %v3946_v6 = vadd.f32 %v3945_v5, %v3944_v31  ;;  %v3947_v33 = vpop.f32.mrb[78].mxu0 }
0x100d   : > { %v3948_v34 = vpop.f32.mrb[79].mxu0 }
0x100e   : > { %v3598_v36 = vadd.f32 %v3946_v6, %v3803_v26 }
0x1010   : > { %v3603_v37 = vadd.f32 %v3598_v36, %v3318_v11 }
0x1012   : > { %v3606_v38 = vsel %vm826_vm1, %v3603_v37, 0.0 }
0x1013   : > { %3607 = vadd.xlane.f32.xlu0 %v3606_v38 }
0x10a0   : > { %v3608_v39 = vpop.xlane.xlu0 %3607 }
0x10a1   : > { %v3609_v32 = vmul.f32 0.015625, %v3608_v39 }
0x10a3   : > { %v3610_v40 = vsub.f32 %v3603_v37, %v3609_v32 }
0x10a5   : > { %v3611_v41 = vmul.f32 %v3610_v40, %v3610_v40 }
0x10a7   : > { %v3612_v42 = vsel %vm826_vm1, %v3611_v41, 0.0 }
0x10a8   : > { %3613 = vadd.xlane.f32.xlu0 %v3612_v42 }
0x1135   : > { %v3614_v43 = vpop.xlane.xlu0 %3613 }
0x1136   : > { %v3615_v44 = vmul.f32 0.015625, %v3614_v43 }
0x1138   : > { %v3616_v45 = vadd.f32 1e-05, %v3615_v44 }
0x113a   : > { %4391 = vrsqrt.f32 %v3616_v45 }
0x1144   : > { %v4392_v46 = vpop.eup %4391 }
0x1145   : > { %v3618_v47 = vmul.f32 %v4392_v46, %v3610_v40 }
0x1147   : > { %v3625_v48 = vmul.f32 %v3820_v35, %v3618_v47 }
0x1149   : > { %v3632_v50 = vadd.f32 %v3821_v49, %v3625_v48 }
0x114b   : > { %3633 = vst.msk [vmem:[%s763_s2] sm:$0xff] %vm826_vm1, %v3632_v50 }
0x114c PF: > { %s34_s5 = sadd.s32 1, %s4400_s5  }
0x114d   : > { %p31_p4 = scmp.ge.s32.totalorder %s34_s5, 4  }
0x114f   :  { %33 = sbr.rel (!%p31_p4) target bundleno = 13 (0xd), region = 152 }

</bundles_post_ra>
